<compile_context>
chip_gen: v6e
topology: v6e:2x2x1
jax: 0.10.0
libtpu: 0.0.40
codegen_flags: <defaults>
</compile_context>

<pallas_src>
import math

import jax
import jax.numpy as jnp
from jax.experimental import pallas as pl
from jax.experimental.pallas import tpu as pltpu

# ----------------------- small but valid configuration ----------------------
# ViTs_face requires num_patches > MIN_NUM_PATCHES (=16).
B = 2
CHANNELS = 3
IMAGE_SIZE = 40
PATCH_SIZE = 8
AC_PATCH_SIZE = 12
PAD = 2
DIM = 64
DEPTH = 2
HEADS = 4
DIM_HEAD = 16
MLP_DIM = 128

INNER = HEADS * DIM_HEAD                         # 64
NUM_PATCHES = (IMAGE_SIZE // PATCH_SIZE) ** 2    # 25 (> 16)
PATCH_DIM = CHANNELS * AC_PATCH_SIZE ** 2        # 432
SEQ = NUM_PATCHES + 1                            # 26 (cls token + patches)
SEQ_PAD = 32                                     # sublane-aligned sequence length
PATCH_DIM_PAD = 512                              # lane-aligned embedding K
SCALE = DIM ** (-0.5)                            # matches reference: dim**-0.5
LN_EPS = 1e-5
NEG_INF = -1e30


# --------------------------------- kernel -----------------------------------
def _layernorm(x, g, b):
    mu = jnp.mean(x, axis=-1, keepdims=True)
    var = jnp.mean((x - mu) ** 2, axis=-1, keepdims=True)
    return (x - mu) * jax.lax.rsqrt(var + LN_EPS) * g + b


def _gelu(x):
    # exact (erf-based) GELU, matching torch.nn.GELU(approximate='none')
    return 0.5 * x * (1.0 + jax.lax.erf(x * (1.0 / math.sqrt(2.0))))


def make_vit_face_kernel(tb):
    """Build the kernel for `tb` images per grid step (rows = tb * SEQ_PAD)."""

    def vit_face_kernel(patch_ref, add_ref, kmask_ref, w_emb_ref,
                        ln1_g_ref, ln1_b_ref, q_w_ref, k_w_ref, v_w_ref,
                        out_w_ref, out_b_ref,
                        ln2_g_ref, ln2_b_ref, ff_w1_ref, ff_b1_ref,
                        ff_w2_ref, ff_b2_ref, lnf_g_ref, lnf_b_ref,
                        emb_ref):
        # patch_to_embedding (+bias) + cls token + pos embedding, folded into
        # one aligned (rows, 512) @ (512, DIM) matmul plus a precomputed
        # additive term (cls+pos on cls rows, bias+pos on patch rows, zeros on
        # pad rows).  emb_dropout / dropout are identity (p = 0.0).
        x = jnp.dot(patch_ref[...], w_emb_ref[...],
                    preferred_element_type=jnp.float32) + add_ref[...]

        # Key-validity bias (padded keys >= SEQ masked out), host-precomputed.
        kmask = kmask_ref[...]                               # (SEQ_PAD, SEQ_PAD)

        for l in range(DEPTH):
            # ---------------- Residual(PreNorm(Attention)) ----------------
            h = _layernorm(x, ln1_g_ref[l], ln1_b_ref[l]).astype(jnp.bfloat16)
            # Pre-split q/k/v weights: no sub-vreg slicing of a 192-wide qkv.
            # SCALE is already folded into q_w on the host.
            q = jnp.dot(h, q_w_ref[l],
                        preferred_element_type=jnp.float32).astype(jnp.bfloat16)
            k = jnp.dot(h, k_w_ref[l],
                        preferred_element_type=jnp.float32).astype(jnp.bfloat16)
            v = jnp.dot(h, v_w_ref[l],
                        preferred_element_type=jnp.float32).astype(jnp.bfloat16)
            ow = out_w_ref[l]                                # (INNER, DIM) bf16

            img_att = []
            for bb in range(tb):                             # per-image attention
                r0 = bb * SEQ_PAD
                acc = jnp.zeros((SEQ_PAD, DIM), jnp.float32)
                for hh in range(HEADS):
                    lo = hh * DIM_HEAD
                    qh = q[r0:r0 + SEQ_PAD, lo:lo + DIM_HEAD]
                    kh = k[r0:r0 + SEQ_PAD, lo:lo + DIM_HEAD]
                    vh = v[r0:r0 + SEQ_PAD, lo:lo + DIM_HEAD]
                    # dots = (q*scale) @ k^T  (einsum 'id,jd->ij'), masked softmax
                    dots = jax.lax.dot_general(
                        qh, kh, (((1,), (1,)), ((), ())),
                        preferred_element_type=jnp.float32) + kmask
                    m = jnp.max(dots, axis=-1, keepdims=True)
                    p = jnp.exp(dots - m)
                    attn = p * pl.reciprocal(
                        jnp.sum(p, axis=-1, keepdims=True), approx=True)
                    ctx = jnp.dot(attn.astype(jnp.bfloat16), vh,
                                  preferred_element_type=jnp.float32)
                    # Per-head projection with a sublane-aligned out_w slice
                    # (offsets 0/16/32/48): no lane concat of head contexts.
                    acc = acc + jnp.dot(ctx.astype(jnp.bfloat16),
                                        ow[lo:lo + DIM_HEAD, :],
                                        preferred_element_type=jnp.float32)
                img_att.append(acc)
            att = img_att[0] if tb == 1 else jnp.concatenate(img_att, axis=0)
            x = x + att + out_b_ref[l]

            # ---------------- Residual(PreNorm(FeedForward)) ----------------
            h = _layernorm(x, ln2_g_ref[l], ln2_b_ref[l]).astype(jnp.bfloat16)
            h1 = jnp.dot(h, ff_w1_ref[l],
                         preferred_element_type=jnp.float32) + ff_b1_ref[l]
            h1 = _gelu(h1)
            h2 = jnp.dot(h1.astype(jnp.bfloat16), ff_w2_ref[l],
                         preferred_element_type=jnp.float32) + ff_b2_ref[l]
            x = x + h2

        # pool = 'cls' -> row 0 of every image block; mlp_head = LayerNorm(dim)
        # TODO(synk): for tb >= 4, replace the per-row concat with one strided
        # sublane slice; at tb <= 2 it is two aligned single-row copies.
        if tb == 1:
            cls_rows = x[0:1, :]
        else:
            cls_rows = jnp.concatenate(
                [x[bb * SEQ_PAD:bb * SEQ_PAD + 1, :] for bb in range(tb)],
                axis=0)
        emb_ref[...] = _layernorm(cls_rows, lnf_g_ref[...], lnf_b_ref[...])

    return vit_face_kernel


# ------------------------------ JAX glue -------------------------------------
def _pick_tb(batch):
    """Images per grid step.

    v7x has 2 TensorCores -> split the batch into 2 "parallel" steps so both
    cores work.  v5e/v6e have 1 TC, so extra grid steps are pure serial
    overhead (~0.35 us each) -> keep one fat step (fill MXU M first).
    """
    try:
        kind = jax.devices()[0].device_kind.lower()
    except Exception:  # pragma: no cover - defensive, e.g. no devices yet
        kind = ""
    if "7" in kind and batch % 2 == 0 and batch >= 2:
        return batch // 2
    return batch


def unfold_nchw(img, kernel, stride, pad):
    """Equivalent of nn.Unfold(kernel,(stride,stride),(pad,pad)).transpose(1,2).

    img: (B, C, H, W) -> (B, L, C*k*k) with PyTorch feature ordering (C, kh, kw).
    """
    Bn, C, H, W = img.shape
    img_p = jnp.pad(img, ((0, 0), (0, 0), (pad, pad), (pad, pad)))
    Hp, Wp = H + 2 * pad, W + 2 * pad
    oh = (Hp - kernel) // stride + 1
    ow = (Wp - kernel) // stride + 1
    rows = (jnp.arange(oh) * stride)[:, None] + jnp.arange(kernel)[None, :]   # (oh, k)
    cols = (jnp.arange(ow) * stride)[:, None] + jnp.arange(kernel)[None, :]   # (ow, k)
    patches = img_p[:, :, rows[:, None, :, None], cols[None, :, None, :]]     # (B,C,oh,ow,k,k)
    patches = patches.transpose(0, 2, 3, 1, 4, 5)                             # (B,oh,ow,C,k,k)
    return patches.reshape(Bn, oh * ow, C * kernel * kernel)


def init_params(key):
    ks = jax.random.split(key, 8)

    def w(k, shape, scale=0.02):
        return scale * jax.random.normal(k, shape, jnp.float32)

    return dict(
        w_emb=w(ks[0], (PATCH_DIM, DIM)),
        b_emb=jnp.zeros((1, DIM), jnp.float32),
        cls=jax.random.normal(ks[1], (1, DIM), jnp.float32),
        pos=jax.random.normal(ks[2], (SEQ, DIM), jnp.float32),
        ln1_g=jnp.ones((DEPTH, 1, DIM), jnp.float32),
        ln1_b=jnp.zeros((DEPTH, 1, DIM), jnp.float32),
        qkv_w=w(ks[3], (DEPTH, DIM, 3 * INNER)),
        out_w=w(ks[4], (DEPTH, INNER, DIM)),
        out_b=jnp.zeros((DEPTH, 1, DIM), jnp.float32),
        ln2_g=jnp.ones((DEPTH, 1, DIM), jnp.float32),
        ln2_b=jnp.zeros((DEPTH, 1, DIM), jnp.float32),
        ff_w1=w(ks[5], (DEPTH, DIM, MLP_DIM)),
        ff_b1=jnp.zeros((DEPTH, 1, MLP_DIM), jnp.float32),
        ff_w2=w(ks[6], (DEPTH, MLP_DIM, DIM)),
        ff_b2=jnp.zeros((DEPTH, 1, DIM), jnp.float32),
        lnf_g=jnp.ones((1, DIM), jnp.float32),
        lnf_b=jnp.zeros((1, DIM), jnp.float32),
    )


def vit_face_forward(img, params):
    tb = _pick_tb(B)                     # images per grid step
    num_tiles = B // tb                  # grid steps ("parallel")
    rows = tb * SEQ_PAD                  # sublane rows per step

    patches = unfold_nchw(img, AC_PATCH_SIZE, PATCH_SIZE, PAD)   # (B, N, patch_dim)

    # (B*SEQ_PAD, 512) bf16 patch matrix: row 0 of each image block is the cls
    # slot (zeros), rows 1..NUM_PATCHES hold the patches, rows 26..31 and the
    # padded K columns are zeros.
    patch_mat = jnp.zeros((B, SEQ_PAD, PATCH_DIM_PAD), jnp.float32)
    patch_mat = patch_mat.at[:, 1:SEQ, :PATCH_DIM].set(patches)
    patch_mat = patch_mat.reshape(B * SEQ_PAD, PATCH_DIM_PAD).astype(jnp.bfloat16)

    # Additive term folding cls token, pos embedding and the embedding bias
    # (bias must NOT hit the cls row, so it only appears on patch rows).
    add = jnp.zeros((B, SEQ_PAD, DIM), jnp.float32)
    add = add.at[:, 0, :].set(params["cls"][0] + params["pos"][0])
    add = add.at[:, 1:SEQ, :].set(params["pos"][1:SEQ] + params["b_emb"][0])
    add = add.reshape(B * SEQ_PAD, DIM)

    # Per-image key-validity bias: keys >= SEQ (padded rows) are masked.
    col = jnp.arange(SEQ_PAD)
    kmask = jnp.where(col[None, :] < SEQ, 0.0, NEG_INF).astype(jnp.float32)
    kmask = jnp.broadcast_to(kmask, (SEQ_PAD, SEQ_PAD))

    # Zero-pad embedding weight K 432 -> 512; bf16 weights for MXU + halved DMA.
    w_emb = jnp.zeros((PATCH_DIM_PAD, DIM), jnp.float32)
    w_emb = w_emb.at[:PATCH_DIM, :].set(params["w_emb"]).astype(jnp.bfloat16)

    # Pre-split qkv weights (removes in-kernel 192-wide lane slicing) and fold
    # the attention scale into q_w.
    qkv_w = params["qkv_w"]
    q_w = (qkv_w[:, :, 0 * INNER:1 * INNER] * SCALE).astype(jnp.bfloat16)
    k_w = qkv_w[:, :, 1 * INNER:2 * INNER].astype(jnp.bfloat16)
    v_w = qkv_w[:, :, 2 * INNER:3 * INNER].astype(jnp.bfloat16)
    out_w = params["out_w"].astype(jnp.bfloat16)
    ff_w1 = params["ff_w1"].astype(jnp.bfloat16)
    ff_w2 = params["ff_w2"].astype(jnp.bfloat16)

    def full(shape):
        n = len(shape)
        return pl.BlockSpec(shape, lambda i, _n=n: (0,) * _n)

    in_specs = [
        pl.BlockSpec((rows, PATCH_DIM_PAD), lambda i: (i, 0)),   # stacked patches
        pl.BlockSpec((rows, DIM), lambda i: (i, 0)),             # additive term
        full((SEQ_PAD, SEQ_PAD)),                                # key-validity bias
        full((PATCH_DIM_PAD, DIM)),
        full((DEPTH, 1, DIM)), full((DEPTH, 1, DIM)),
        full((DEPTH, DIM, INNER)), full((DEPTH, DIM, INNER)), full((DEPTH, DIM, INNER)),
        full((DEPTH, INNER, DIM)), full((DEPTH, 1, DIM)),
        full((DEPTH, 1, DIM)), full((DEPTH, 1, DIM)),
        full((DEPTH, DIM, MLP_DIM)), full((DEPTH, 1, MLP_DIM)),
        full((DEPTH, MLP_DIM, DIM)), full((DEPTH, 1, DIM)),
        full((1, DIM)), full((1, DIM)),
    ]
    # 3-D output so the block stays (8,128)/full-dim legal for any num_tiles.
    out_spec = pl.BlockSpec((None, tb, DIM), lambda i: (i, 0, 0))

    out = pl.pallas_call(
        make_vit_face_kernel(tb),
        out_shape=jax.ShapeDtypeStruct((num_tiles, tb, DIM), jnp.float32),
        grid=(num_tiles,),
        in_specs=in_specs,
        out_specs=out_spec,
        compiler_params=pltpu.CompilerParams(
            dimension_semantics=("parallel",)),   # v7x: 2 steps -> 2 TensorCores
    )(
        patch_mat, add, kmask, w_emb,
        params["ln1_g"], params["ln1_b"], q_w, k_w, v_w,
        out_w, params["out_b"],
        params["ln2_g"], params["ln2_b"], ff_w1, params["ff_b1"],
        ff_w2, params["ff_b2"],
        params["lnf_g"], params["lnf_b"],
    )
    return out.reshape(B, DIM)

# TODO(synk): the optional classification heads (Softmax/CosFace/ArcFace/SFace)
# are only used when `label is not None`; this kernel implements the
# `label=None` path (returns the embedding), matching loss_type='None'.


if __name__ == "__main__":
    key = jax.random.PRNGKey(0)
    img_key, param_key = jax.random.split(key)
    img = jax.random.normal(img_key, (B, CHANNELS, IMAGE_SIZE, IMAGE_SIZE),
                            jnp.float32)
    params = init_params(param_key)

    fwd = jax.jit(vit_face_forward)
    emb = fwd(img, params)
    emb = jax.block_until_ready(emb)

    assert emb.shape == (B, DIM), emb.shape
    assert bool(jnp.all(jnp.isfinite(emb)))
    print("KERNEL_OK")
</pallas_src>

<mosaic_0001>
module attributes {stable_mosaic.version = 11 : i64} {
  func.func @vit_face_kernel(%arg0: i32, %arg1: memref<64x512xbf16, #tpu.memory_space<vmem>>, %arg2: memref<64x64xf32, #tpu.memory_space<vmem>>, %arg3: memref<32x32xf32, #tpu.memory_space<vmem>>, %arg4: memref<512x64xbf16, #tpu.memory_space<vmem>>, %arg5: memref<2x1x64xf32, #tpu.memory_space<vmem>>, %arg6: memref<2x1x64xf32, #tpu.memory_space<vmem>>, %arg7: memref<2x64x64xbf16, #tpu.memory_space<vmem>>, %arg8: memref<2x64x64xbf16, #tpu.memory_space<vmem>>, %arg9: memref<2x64x64xbf16, #tpu.memory_space<vmem>>, %arg10: memref<2x64x64xbf16, #tpu.memory_space<vmem>>, %arg11: memref<2x1x64xf32, #tpu.memory_space<vmem>>, %arg12: memref<2x1x64xf32, #tpu.memory_space<vmem>>, %arg13: memref<2x1x64xf32, #tpu.memory_space<vmem>>, %arg14: memref<2x64x128xbf16, #tpu.memory_space<vmem>>, %arg15: memref<2x1x128xf32, #tpu.memory_space<vmem>>, %arg16: memref<2x128x64xbf16, #tpu.memory_space<vmem>>, %arg17: memref<2x1x64xf32, #tpu.memory_space<vmem>>, %arg18: memref<1x64xf32, #tpu.memory_space<vmem>>, %arg19: memref<1x64xf32, #tpu.memory_space<vmem>>, %arg20: memref<1x2x64xf32, #tpu.memory_space<vmem>>) attributes {dimension_semantics = [#tpu.dimension_semantics<parallel>], iteration_bounds = array<i64: 1>, scalar_prefetch = 0 : i64, scratch_operands = 0 : i64, tpu.core_type = #tpu.core_type<tc>, window_params = [{transform_indices = @transform_0, window_bounds = array<i64: 64, 512>}, {transform_indices = @transform_1, window_bounds = array<i64: 64, 64>}, {pipeline_mode = #tpu.pipeline_mode<synchronous>, transform_indices = @transform_2, window_bounds = array<i64: 32, 32>}, {pipeline_mode = #tpu.pipeline_mode<synchronous>, transform_indices = @transform_3, window_bounds = array<i64: 512, 64>}, {pipeline_mode = #tpu.pipeline_mode<synchronous>, transform_indices = @transform_4, window_bounds = array<i64: 2, 1, 64>}, {pipeline_mode = #tpu.pipeline_mode<synchronous>, transform_indices = @transform_5, window_bounds = array<i64: 2, 1, 64>}, {pipeline_mode = #tpu.pipeline_mode<synchronous>, transform_indices = @transform_6, window_bounds = array<i64: 2, 64, 64>}, {pipeline_mode = #tpu.pipeline_mode<synchronous>, transform_indices = @transform_7, window_bounds = array<i64: 2, 64, 64>}, {pipeline_mode = #tpu.pipeline_mode<synchronous>, transform_indices = @transform_8, window_bounds = array<i64: 2, 64, 64>}, {pipeline_mode = #tpu.pipeline_mode<synchronous>, transform_indices = @transform_9, window_bounds = array<i64: 2, 64, 64>}, {pipeline_mode = #tpu.pipeline_mode<synchronous>, transform_indices = @transform_10, window_bounds = array<i64: 2, 1, 64>}, {pipeline_mode = #tpu.pipeline_mode<synchronous>, transform_indices = @transform_11, window_bounds = array<i64: 2, 1, 64>}, {pipeline_mode = #tpu.pipeline_mode<synchronous>, transform_indices = @transform_12, window_bounds = array<i64: 2, 1, 64>}, {pipeline_mode = #tpu.pipeline_mode<synchronous>, transform_indices = @transform_13, window_bounds = array<i64: 2, 64, 128>}, {pipeline_mode = #tpu.pipeline_mode<synchronous>, transform_indices = @transform_14, window_bounds = array<i64: 2, 1, 128>}, {pipeline_mode = #tpu.pipeline_mode<synchronous>, transform_indices = @transform_15, window_bounds = array<i64: 2, 128, 64>}, {pipeline_mode = #tpu.pipeline_mode<synchronous>, transform_indices = @transform_16, window_bounds = array<i64: 2, 1, 64>}, {pipeline_mode = #tpu.pipeline_mode<synchronous>, transform_indices = @transform_17, window_bounds = array<i64: 1, 64>}, {pipeline_mode = #tpu.pipeline_mode<synchronous>, transform_indices = @transform_18, window_bounds = array<i64: 1, 64>}, {transform_indices = @transform_19, window_bounds = array<i64: 1, 2, 64>}]} {
    %c0 = arith.constant 0 : index
    %c0_0 = arith.constant 0 : index
    %0 = vector.load %arg1[%c0, %c0_0] : memref<64x512xbf16, #tpu.memory_space<vmem>>, vector<64x512xbf16>
    %c0_1 = arith.constant 0 : index
    %c0_2 = arith.constant 0 : index
    %1 = vector.load %arg4[%c0_1, %c0_2] : memref<512x64xbf16, #tpu.memory_space<vmem>>, vector<512x64xbf16>
    %cst = arith.constant dense<0.000000e+00> : vector<64x64xf32>
    %2 = tpu.matmul %0, %1, %cst {dimension_numbers = #tpu.dot_dimension_numbers<[1], [0], [0], [1], [0, 0, 1, 1], [], []>} : vector<64x512xbf16>, vector<512x64xbf16>, vector<64x64xf32> -> vector<64x64xf32>
    %c0_3 = arith.constant 0 : index
    %c0_4 = arith.constant 0 : index
    %3 = vector.load %arg2[%c0_3, %c0_4] : memref<64x64xf32, #tpu.memory_space<vmem>>, vector<64x64xf32>
    %4 = arith.addf %2, %3 : vector<64x64xf32>
    %c0_5 = arith.constant 0 : index
    %c0_6 = arith.constant 0 : index
    %5 = vector.load %arg3[%c0_5, %c0_6] : memref<32x32xf32, #tpu.memory_space<vmem>>, vector<32x32xf32>
    %c0_7 = arith.constant 0 : index
    %c0_8 = arith.constant 0 : index
    %c0_9 = arith.constant 0 : index
    %6 = vector.load %arg5[%c0_7, %c0_8, %c0_9] : memref<2x1x64xf32, #tpu.memory_space<vmem>>, vector<1x1x64xf32>
    %7 = vector.shape_cast %6 : vector<1x1x64xf32> to vector<1x64xf32>
    %c0_10 = arith.constant 0 : index
    %c0_11 = arith.constant 0 : index
    %c0_12 = arith.constant 0 : index
    %8 = vector.load %arg6[%c0_10, %c0_11, %c0_12] : memref<2x1x64xf32, #tpu.memory_space<vmem>>, vector<1x1x64xf32>
    %9 = vector.shape_cast %8 : vector<1x1x64xf32> to vector<1x64xf32>
    %cst_13 = arith.constant dense<0.000000e+00> : vector<64xf32>
    %10 = vector.multi_reduction <add>, %4, %cst_13 [1] : vector<64x64xf32> to vector<64xf32>
    %11 = vector.shape_cast %10 : vector<64xf32> to vector<64x1xf32>
    %cst_14 = arith.constant 6.400000e+01 : f32
    %12 = vector.broadcast %cst_14 : f32 to vector<64x1xf32>
    %13 = arith.divf %11, %12 : vector<64x1xf32>
    %14 = vector.broadcast %13 : vector<64x1xf32> to vector<64x64xf32>
    %15 = arith.subf %4, %14 : vector<64x64xf32>
    %16 = arith.mulf %15, %15 : vector<64x64xf32>
    %cst_15 = arith.constant dense<0.000000e+00> : vector<64xf32>
    %17 = vector.multi_reduction <add>, %16, %cst_15 [1] : vector<64x64xf32> to vector<64xf32>
    %18 = vector.shape_cast %17 : vector<64xf32> to vector<64x1xf32>
    %cst_16 = arith.constant 6.400000e+01 : f32
    %19 = vector.broadcast %cst_16 : f32 to vector<64x1xf32>
    %20 = arith.divf %18, %19 : vector<64x1xf32>
    %21 = vector.broadcast %13 : vector<64x1xf32> to vector<64x64xf32>
    %22 = arith.subf %4, %21 : vector<64x64xf32>
    %cst_17 = arith.constant 9.99999974E-6 : f32
    %23 = vector.broadcast %cst_17 : f32 to vector<64x1xf32>
    %24 = arith.addf %20, %23 : vector<64x1xf32>
    %25 = math.rsqrt %24 : vector<64x1xf32>
    %26 = vector.broadcast %25 : vector<64x1xf32> to vector<64x64xf32>
    %27 = arith.mulf %22, %26 : vector<64x64xf32>
    %28 = vector.broadcast %7 : vector<1x64xf32> to vector<64x64xf32>
    %29 = arith.mulf %27, %28 : vector<64x64xf32>
    %30 = vector.broadcast %9 : vector<1x64xf32> to vector<64x64xf32>
    %31 = arith.addf %29, %30 : vector<64x64xf32>
    %32 = arith.truncf %31 : vector<64x64xf32> to vector<64x64xbf16>
    %c0_18 = arith.constant 0 : index
    %c0_19 = arith.constant 0 : index
    %c0_20 = arith.constant 0 : index
    %33 = vector.load %arg7[%c0_18, %c0_19, %c0_20] : memref<2x64x64xbf16, #tpu.memory_space<vmem>>, vector<1x64x64xbf16>
    %34 = vector.shape_cast %33 : vector<1x64x64xbf16> to vector<64x64xbf16>
    %cst_21 = arith.constant dense<0.000000e+00> : vector<64x64xf32>
    %35 = tpu.matmul %32, %34, %cst_21 {dimension_numbers = #tpu.dot_dimension_numbers<[1], [0], [0], [1], [0, 0, 1, 1], [], []>} : vector<64x64xbf16>, vector<64x64xbf16>, vector<64x64xf32> -> vector<64x64xf32>
    %36 = arith.truncf %35 : vector<64x64xf32> to vector<64x64xbf16>
    %c0_22 = arith.constant 0 : index
    %c0_23 = arith.constant 0 : index
    %c0_24 = arith.constant 0 : index
    %37 = vector.load %arg8[%c0_22, %c0_23, %c0_24] : memref<2x64x64xbf16, #tpu.memory_space<vmem>>, vector<1x64x64xbf16>
    %38 = vector.shape_cast %37 : vector<1x64x64xbf16> to vector<64x64xbf16>
    %cst_25 = arith.constant dense<0.000000e+00> : vector<64x64xf32>
    %39 = tpu.matmul %32, %38, %cst_25 {dimension_numbers = #tpu.dot_dimension_numbers<[1], [0], [0], [1], [0, 0, 1, 1], [], []>} : vector<64x64xbf16>, vector<64x64xbf16>, vector<64x64xf32> -> vector<64x64xf32>
    %40 = arith.truncf %39 : vector<64x64xf32> to vector<64x64xbf16>
    %c0_26 = arith.constant 0 : index
    %c0_27 = arith.constant 0 : index
    %c0_28 = arith.constant 0 : index
    %41 = vector.load %arg9[%c0_26, %c0_27, %c0_28] : memref<2x64x64xbf16, #tpu.memory_space<vmem>>, vector<1x64x64xbf16>
    %42 = vector.shape_cast %41 : vector<1x64x64xbf16> to vector<64x64xbf16>
    %cst_29 = arith.constant dense<0.000000e+00> : vector<64x64xf32>
    %43 = tpu.matmul %32, %42, %cst_29 {dimension_numbers = #tpu.dot_dimension_numbers<[1], [0], [0], [1], [0, 0, 1, 1], [], []>} : vector<64x64xbf16>, vector<64x64xbf16>, vector<64x64xf32> -> vector<64x64xf32>
    %44 = arith.truncf %43 : vector<64x64xf32> to vector<64x64xbf16>
    %c0_30 = arith.constant 0 : index
    %c0_31 = arith.constant 0 : index
    %c0_32 = arith.constant 0 : index
    %45 = vector.load %arg10[%c0_30, %c0_31, %c0_32] : memref<2x64x64xbf16, #tpu.memory_space<vmem>>, vector<1x64x64xbf16>
    %46 = vector.shape_cast %45 : vector<1x64x64xbf16> to vector<64x64xbf16>
    %cst_33 = arith.constant 0.000000e+00 : f32
    %47 = vector.broadcast %cst_33 : f32 to vector<32x64xf32>
    %48 = vector.extract_strided_slice %36 {offsets = [0, 0], sizes = [32, 16], strides = [1, 1]} : vector<64x64xbf16> to vector<32x16xbf16>
    %49 = vector.extract_strided_slice %40 {offsets = [0, 0], sizes = [32, 16], strides = [1, 1]} : vector<64x64xbf16> to vector<32x16xbf16>
    %50 = vector.extract_strided_slice %44 {offsets = [0, 0], sizes = [32, 16], strides = [1, 1]} : vector<64x64xbf16> to vector<32x16xbf16>
    %cst_34 = arith.constant dense<0.000000e+00> : vector<32x32xf32>
    %51 = tpu.matmul %48, %49, %cst_34 {dimension_numbers = #tpu.dot_dimension_numbers<[1], [1], [0], [0], [0, 0, 1, 0], [], []>} : vector<32x16xbf16>, vector<32x16xbf16>, vector<32x32xf32> -> vector<32x32xf32>
    %52 = arith.addf %51, %5 : vector<32x32xf32>
    %cst_35 = arith.constant dense<0xFF800000> : vector<32xf32>
    %53 = vector.multi_reduction <maximumf>, %52, %cst_35 [1] : vector<32x32xf32> to vector<32xf32>
    %54 = vector.shape_cast %53 : vector<32xf32> to vector<32x1xf32>
    %55 = vector.broadcast %54 : vector<32x1xf32> to vector<32x32xf32>
    %56 = arith.subf %52, %55 : vector<32x32xf32>
    %57 = math.exp %56 : vector<32x32xf32>
    %cst_36 = arith.constant dense<0.000000e+00> : vector<32xf32>
    %58 = vector.multi_reduction <add>, %57, %cst_36 [1] : vector<32x32xf32> to vector<32xf32>
    %59 = vector.shape_cast %58 : vector<32xf32> to vector<32x1xf32>
    %60 = tpu.reciprocal %59 {approx = true} : vector<32x1xf32> -> vector<32x1xf32>
    %61 = vector.broadcast %60 : vector<32x1xf32> to vector<32x32xf32>
    %62 = arith.mulf %57, %61 : vector<32x32xf32>
    %63 = arith.truncf %62 : vector<32x32xf32> to vector<32x32xbf16>
    %cst_37 = arith.constant dense<0.000000e+00> : vector<32x16xf32>
    %64 = tpu.matmul %63, %50, %cst_37 {dimension_numbers = #tpu.dot_dimension_numbers<[1], [0], [0], [1], [0, 0, 1, 1], [], []>} : vector<32x32xbf16>, vector<32x16xbf16>, vector<32x16xf32> -> vector<32x16xf32>
    %65 = arith.truncf %64 : vector<32x16xf32> to vector<32x16xbf16>
    %66 = vector.extract_strided_slice %46 {offsets = [0, 0], sizes = [16, 64], strides = [1, 1]} : vector<64x64xbf16> to vector<16x64xbf16>
    %cst_38 = arith.constant dense<0.000000e+00> : vector<32x64xf32>
    %67 = tpu.matmul %65, %66, %cst_38 {dimension_numbers = #tpu.dot_dimension_numbers<[1], [0], [0], [1], [0, 0, 1, 1], [], []>} : vector<32x16xbf16>, vector<16x64xbf16>, vector<32x64xf32> -> vector<32x64xf32>
    %68 = arith.addf %47, %67 : vector<32x64xf32>
    %69 = vector.extract_strided_slice %36 {offsets = [0, 16], sizes = [32, 16], strides = [1, 1]} : vector<64x64xbf16> to vector<32x16xbf16>
    %70 = vector.extract_strided_slice %40 {offsets = [0, 16], sizes = [32, 16], strides = [1, 1]} : vector<64x64xbf16> to vector<32x16xbf16>
    %71 = vector.extract_strided_slice %44 {offsets = [0, 16], sizes = [32, 16], strides = [1, 1]} : vector<64x64xbf16> to vector<32x16xbf16>
    %cst_39 = arith.constant dense<0.000000e+00> : vector<32x32xf32>
    %72 = tpu.matmul %69, %70, %cst_39 {dimension_numbers = #tpu.dot_dimension_numbers<[1], [1], [0], [0], [0, 0, 1, 0], [], []>} : vector<32x16xbf16>, vector<32x16xbf16>, vector<32x32xf32> -> vector<32x32xf32>
    %73 = arith.addf %72, %5 : vector<32x32xf32>
    %cst_40 = arith.constant dense<0xFF800000> : vector<32xf32>
    %74 = vector.multi_reduction <maximumf>, %73, %cst_40 [1] : vector<32x32xf32> to vector<32xf32>
    %75 = vector.shape_cast %74 : vector<32xf32> to vector<32x1xf32>
    %76 = vector.broadcast %75 : vector<32x1xf32> to vector<32x32xf32>
    %77 = arith.subf %73, %76 : vector<32x32xf32>
    %78 = math.exp %77 : vector<32x32xf32>
    %cst_41 = arith.constant dense<0.000000e+00> : vector<32xf32>
    %79 = vector.multi_reduction <add>, %78, %cst_41 [1] : vector<32x32xf32> to vector<32xf32>
    %80 = vector.shape_cast %79 : vector<32xf32> to vector<32x1xf32>
    %81 = tpu.reciprocal %80 {approx = true} : vector<32x1xf32> -> vector<32x1xf32>
    %82 = vector.broadcast %81 : vector<32x1xf32> to vector<32x32xf32>
    %83 = arith.mulf %78, %82 : vector<32x32xf32>
    %84 = arith.truncf %83 : vector<32x32xf32> to vector<32x32xbf16>
    %cst_42 = arith.constant dense<0.000000e+00> : vector<32x16xf32>
    %85 = tpu.matmul %84, %71, %cst_42 {dimension_numbers = #tpu.dot_dimension_numbers<[1], [0], [0], [1], [0, 0, 1, 1], [], []>} : vector<32x32xbf16>, vector<32x16xbf16>, vector<32x16xf32> -> vector<32x16xf32>
    %86 = arith.truncf %85 : vector<32x16xf32> to vector<32x16xbf16>
    %87 = vector.extract_strided_slice %46 {offsets = [16, 0], sizes = [16, 64], strides = [1, 1]} : vector<64x64xbf16> to vector<16x64xbf16>
    %cst_43 = arith.constant dense<0.000000e+00> : vector<32x64xf32>
    %88 = tpu.matmul %86, %87, %cst_43 {dimension_numbers = #tpu.dot_dimension_numbers<[1], [0], [0], [1], [0, 0, 1, 1], [], []>} : vector<32x16xbf16>, vector<16x64xbf16>, vector<32x64xf32> -> vector<32x64xf32>
    %89 = arith.addf %68, %88 : vector<32x64xf32>
    %90 = vector.extract_strided_slice %36 {offsets = [0, 32], sizes = [32, 16], strides = [1, 1]} : vector<64x64xbf16> to vector<32x16xbf16>
    %91 = vector.extract_strided_slice %40 {offsets = [0, 32], sizes = [32, 16], strides = [1, 1]} : vector<64x64xbf16> to vector<32x16xbf16>
    %92 = vector.extract_strided_slice %44 {offsets = [0, 32], sizes = [32, 16], strides = [1, 1]} : vector<64x64xbf16> to vector<32x16xbf16>
    %cst_44 = arith.constant dense<0.000000e+00> : vector<32x32xf32>
    %93 = tpu.matmul %90, %91, %cst_44 {dimension_numbers = #tpu.dot_dimension_numbers<[1], [1], [0], [0], [0, 0, 1, 0], [], []>} : vector<32x16xbf16>, vector<32x16xbf16>, vector<32x32xf32> -> vector<32x32xf32>
    %94 = arith.addf %93, %5 : vector<32x32xf32>
    %cst_45 = arith.constant dense<0xFF800000> : vector<32xf32>
    %95 = vector.multi_reduction <maximumf>, %94, %cst_45 [1] : vector<32x32xf32> to vector<32xf32>
    %96 = vector.shape_cast %95 : vector<32xf32> to vector<32x1xf32>
    %97 = vector.broadcast %96 : vector<32x1xf32> to vector<32x32xf32>
    %98 = arith.subf %94, %97 : vector<32x32xf32>
    %99 = math.exp %98 : vector<32x32xf32>
    %cst_46 = arith.constant dense<0.000000e+00> : vector<32xf32>
    %100 = vector.multi_reduction <add>, %99, %cst_46 [1] : vector<32x32xf32> to vector<32xf32>
    %101 = vector.shape_cast %100 : vector<32xf32> to vector<32x1xf32>
    %102 = tpu.reciprocal %101 {approx = true} : vector<32x1xf32> -> vector<32x1xf32>
    %103 = vector.broadcast %102 : vector<32x1xf32> to vector<32x32xf32>
    %104 = arith.mulf %99, %103 : vector<32x32xf32>
    %105 = arith.truncf %104 : vector<32x32xf32> to vector<32x32xbf16>
    %cst_47 = arith.constant dense<0.000000e+00> : vector<32x16xf32>
    %106 = tpu.matmul %105, %92, %cst_47 {dimension_numbers = #tpu.dot_dimension_numbers<[1], [0], [0], [1], [0, 0, 1, 1], [], []>} : vector<32x32xbf16>, vector<32x16xbf16>, vector<32x16xf32> -> vector<32x16xf32>
    %107 = arith.truncf %106 : vector<32x16xf32> to vector<32x16xbf16>
    %108 = vector.extract_strided_slice %46 {offsets = [32, 0], sizes = [16, 64], strides = [1, 1]} : vector<64x64xbf16> to vector<16x64xbf16>
    %cst_48 = arith.constant dense<0.000000e+00> : vector<32x64xf32>
    %109 = tpu.matmul %107, %108, %cst_48 {dimension_numbers = #tpu.dot_dimension_numbers<[1], [0], [0], [1], [0, 0, 1, 1], [], []>} : vector<32x16xbf16>, vector<16x64xbf16>, vector<32x64xf32> -> vector<32x64xf32>
    %110 = arith.addf %89, %109 : vector<32x64xf32>
    %111 = vector.extract_strided_slice %36 {offsets = [0, 48], sizes = [32, 16], strides = [1, 1]} : vector<64x64xbf16> to vector<32x16xbf16>
    %112 = vector.extract_strided_slice %40 {offsets = [0, 48], sizes = [32, 16], strides = [1, 1]} : vector<64x64xbf16> to vector<32x16xbf16>
    %113 = vector.extract_strided_slice %44 {offsets = [0, 48], sizes = [32, 16], strides = [1, 1]} : vector<64x64xbf16> to vector<32x16xbf16>
    %cst_49 = arith.constant dense<0.000000e+00> : vector<32x32xf32>
    %114 = tpu.matmul %111, %112, %cst_49 {dimension_numbers = #tpu.dot_dimension_numbers<[1], [1], [0], [0], [0, 0, 1, 0], [], []>} : vector<32x16xbf16>, vector<32x16xbf16>, vector<32x32xf32> -> vector<32x32xf32>
    %115 = arith.addf %114, %5 : vector<32x32xf32>
    %cst_50 = arith.constant dense<0xFF800000> : vector<32xf32>
    %116 = vector.multi_reduction <maximumf>, %115, %cst_50 [1] : vector<32x32xf32> to vector<32xf32>
    %117 = vector.shape_cast %116 : vector<32xf32> to vector<32x1xf32>
    %118 = vector.broadcast %117 : vector<32x1xf32> to vector<32x32xf32>
    %119 = arith.subf %115, %118 : vector<32x32xf32>
    %120 = math.exp %119 : vector<32x32xf32>
    %cst_51 = arith.constant dense<0.000000e+00> : vector<32xf32>
    %121 = vector.multi_reduction <add>, %120, %cst_51 [1] : vector<32x32xf32> to vector<32xf32>
    %122 = vector.shape_cast %121 : vector<32xf32> to vector<32x1xf32>
    %123 = tpu.reciprocal %122 {approx = true} : vector<32x1xf32> -> vector<32x1xf32>
    %124 = vector.broadcast %123 : vector<32x1xf32> to vector<32x32xf32>
    %125 = arith.mulf %120, %124 : vector<32x32xf32>
    %126 = arith.truncf %125 : vector<32x32xf32> to vector<32x32xbf16>
    %cst_52 = arith.constant dense<0.000000e+00> : vector<32x16xf32>
    %127 = tpu.matmul %126, %113, %cst_52 {dimension_numbers = #tpu.dot_dimension_numbers<[1], [0], [0], [1], [0, 0, 1, 1], [], []>} : vector<32x32xbf16>, vector<32x16xbf16>, vector<32x16xf32> -> vector<32x16xf32>
    %128 = arith.truncf %127 : vector<32x16xf32> to vector<32x16xbf16>
    %129 = vector.extract_strided_slice %46 {offsets = [48, 0], sizes = [16, 64], strides = [1, 1]} : vector<64x64xbf16> to vector<16x64xbf16>
    %cst_53 = arith.constant dense<0.000000e+00> : vector<32x64xf32>
    %130 = tpu.matmul %128, %129, %cst_53 {dimension_numbers = #tpu.dot_dimension_numbers<[1], [0], [0], [1], [0, 0, 1, 1], [], []>} : vector<32x16xbf16>, vector<16x64xbf16>, vector<32x64xf32> -> vector<32x64xf32>
    %131 = arith.addf %110, %130 : vector<32x64xf32>
    %cst_54 = arith.constant 0.000000e+00 : f32
    %132 = vector.broadcast %cst_54 : f32 to vector<32x64xf32>
    %133 = vector.extract_strided_slice %36 {offsets = [32, 0], sizes = [32, 16], strides = [1, 1]} : vector<64x64xbf16> to vector<32x16xbf16>
    %134 = vector.extract_strided_slice %40 {offsets = [32, 0], sizes = [32, 16], strides = [1, 1]} : vector<64x64xbf16> to vector<32x16xbf16>
    %135 = vector.extract_strided_slice %44 {offsets = [32, 0], sizes = [32, 16], strides = [1, 1]} : vector<64x64xbf16> to vector<32x16xbf16>
    %cst_55 = arith.constant dense<0.000000e+00> : vector<32x32xf32>
    %136 = tpu.matmul %133, %134, %cst_55 {dimension_numbers = #tpu.dot_dimension_numbers<[1], [1], [0], [0], [0, 0, 1, 0], [], []>} : vector<32x16xbf16>, vector<32x16xbf16>, vector<32x32xf32> -> vector<32x32xf32>
    %137 = arith.addf %136, %5 : vector<32x32xf32>
    %cst_56 = arith.constant dense<0xFF800000> : vector<32xf32>
    %138 = vector.multi_reduction <maximumf>, %137, %cst_56 [1] : vector<32x32xf32> to vector<32xf32>
    %139 = vector.shape_cast %138 : vector<32xf32> to vector<32x1xf32>
    %140 = vector.broadcast %139 : vector<32x1xf32> to vector<32x32xf32>
    %141 = arith.subf %137, %140 : vector<32x32xf32>
    %142 = math.exp %141 : vector<32x32xf32>
    %cst_57 = arith.constant dense<0.000000e+00> : vector<32xf32>
    %143 = vector.multi_reduction <add>, %142, %cst_57 [1] : vector<32x32xf32> to vector<32xf32>
    %144 = vector.shape_cast %143 : vector<32xf32> to vector<32x1xf32>
    %145 = tpu.reciprocal %144 {approx = true} : vector<32x1xf32> -> vector<32x1xf32>
    %146 = vector.broadcast %145 : vector<32x1xf32> to vector<32x32xf32>
    %147 = arith.mulf %142, %146 : vector<32x32xf32>
    %148 = arith.truncf %147 : vector<32x32xf32> to vector<32x32xbf16>
    %cst_58 = arith.constant dense<0.000000e+00> : vector<32x16xf32>
    %149 = tpu.matmul %148, %135, %cst_58 {dimension_numbers = #tpu.dot_dimension_numbers<[1], [0], [0], [1], [0, 0, 1, 1], [], []>} : vector<32x32xbf16>, vector<32x16xbf16>, vector<32x16xf32> -> vector<32x16xf32>
    %150 = arith.truncf %149 : vector<32x16xf32> to vector<32x16xbf16>
    %151 = vector.extract_strided_slice %46 {offsets = [0, 0], sizes = [16, 64], strides = [1, 1]} : vector<64x64xbf16> to vector<16x64xbf16>
    %cst_59 = arith.constant dense<0.000000e+00> : vector<32x64xf32>
    %152 = tpu.matmul %150, %151, %cst_59 {dimension_numbers = #tpu.dot_dimension_numbers<[1], [0], [0], [1], [0, 0, 1, 1], [], []>} : vector<32x16xbf16>, vector<16x64xbf16>, vector<32x64xf32> -> vector<32x64xf32>
    %153 = arith.addf %132, %152 : vector<32x64xf32>
    %154 = vector.extract_strided_slice %36 {offsets = [32, 16], sizes = [32, 16], strides = [1, 1]} : vector<64x64xbf16> to vector<32x16xbf16>
    %155 = vector.extract_strided_slice %40 {offsets = [32, 16], sizes = [32, 16], strides = [1, 1]} : vector<64x64xbf16> to vector<32x16xbf16>
    %156 = vector.extract_strided_slice %44 {offsets = [32, 16], sizes = [32, 16], strides = [1, 1]} : vector<64x64xbf16> to vector<32x16xbf16>
    %cst_60 = arith.constant dense<0.000000e+00> : vector<32x32xf32>
    %157 = tpu.matmul %154, %155, %cst_60 {dimension_numbers = #tpu.dot_dimension_numbers<[1], [1], [0], [0], [0, 0, 1, 0], [], []>} : vector<32x16xbf16>, vector<32x16xbf16>, vector<32x32xf32> -> vector<32x32xf32>
    %158 = arith.addf %157, %5 : vector<32x32xf32>
    %cst_61 = arith.constant dense<0xFF800000> : vector<32xf32>
    %159 = vector.multi_reduction <maximumf>, %158, %cst_61 [1] : vector<32x32xf32> to vector<32xf32>
    %160 = vector.shape_cast %159 : vector<32xf32> to vector<32x1xf32>
    %161 = vector.broadcast %160 : vector<32x1xf32> to vector<32x32xf32>
    %162 = arith.subf %158, %161 : vector<32x32xf32>
    %163 = math.exp %162 : vector<32x32xf32>
    %cst_62 = arith.constant dense<0.000000e+00> : vector<32xf32>
    %164 = vector.multi_reduction <add>, %163, %cst_62 [1] : vector<32x32xf32> to vector<32xf32>
    %165 = vector.shape_cast %164 : vector<32xf32> to vector<32x1xf32>
    %166 = tpu.reciprocal %165 {approx = true} : vector<32x1xf32> -> vector<32x1xf32>
    %167 = vector.broadcast %166 : vector<32x1xf32> to vector<32x32xf32>
    %168 = arith.mulf %163, %167 : vector<32x32xf32>
    %169 = arith.truncf %168 : vector<32x32xf32> to vector<32x32xbf16>
    %cst_63 = arith.constant dense<0.000000e+00> : vector<32x16xf32>
    %170 = tpu.matmul %169, %156, %cst_63 {dimension_numbers = #tpu.dot_dimension_numbers<[1], [0], [0], [1], [0, 0, 1, 1], [], []>} : vector<32x32xbf16>, vector<32x16xbf16>, vector<32x16xf32> -> vector<32x16xf32>
    %171 = arith.truncf %170 : vector<32x16xf32> to vector<32x16xbf16>
    %172 = vector.extract_strided_slice %46 {offsets = [16, 0], sizes = [16, 64], strides = [1, 1]} : vector<64x64xbf16> to vector<16x64xbf16>
    %cst_64 = arith.constant dense<0.000000e+00> : vector<32x64xf32>
    %173 = tpu.matmul %171, %172, %cst_64 {dimension_numbers = #tpu.dot_dimension_numbers<[1], [0], [0], [1], [0, 0, 1, 1], [], []>} : vector<32x16xbf16>, vector<16x64xbf16>, vector<32x64xf32> -> vector<32x64xf32>
    %174 = arith.addf %153, %173 : vector<32x64xf32>
    %175 = vector.extract_strided_slice %36 {offsets = [32, 32], sizes = [32, 16], strides = [1, 1]} : vector<64x64xbf16> to vector<32x16xbf16>
    %176 = vector.extract_strided_slice %40 {offsets = [32, 32], sizes = [32, 16], strides = [1, 1]} : vector<64x64xbf16> to vector<32x16xbf16>
    %177 = vector.extract_strided_slice %44 {offsets = [32, 32], sizes = [32, 16], strides = [1, 1]} : vector<64x64xbf16> to vector<32x16xbf16>
    %cst_65 = arith.constant dense<0.000000e+00> : vector<32x32xf32>
    %178 = tpu.matmul %175, %176, %cst_65 {dimension_numbers = #tpu.dot_dimension_numbers<[1], [1], [0], [0], [0, 0, 1, 0], [], []>} : vector<32x16xbf16>, vector<32x16xbf16>, vector<32x32xf32> -> vector<32x32xf32>
    %179 = arith.addf %178, %5 : vector<32x32xf32>
    %cst_66 = arith.constant dense<0xFF800000> : vector<32xf32>
    %180 = vector.multi_reduction <maximumf>, %179, %cst_66 [1] : vector<32x32xf32> to vector<32xf32>
    %181 = vector.shape_cast %180 : vector<32xf32> to vector<32x1xf32>
    %182 = vector.broadcast %181 : vector<32x1xf32> to vector<32x32xf32>
    %183 = arith.subf %179, %182 : vector<32x32xf32>
    %184 = math.exp %183 : vector<32x32xf32>
    %cst_67 = arith.constant dense<0.000000e+00> : vector<32xf32>
    %185 = vector.multi_reduction <add>, %184, %cst_67 [1] : vector<32x32xf32> to vector<32xf32>
    %186 = vector.shape_cast %185 : vector<32xf32> to vector<32x1xf32>
    %187 = tpu.reciprocal %186 {approx = true} : vector<32x1xf32> -> vector<32x1xf32>
    %188 = vector.broadcast %187 : vector<32x1xf32> to vector<32x32xf32>
    %189 = arith.mulf %184, %188 : vector<32x32xf32>
    %190 = arith.truncf %189 : vector<32x32xf32> to vector<32x32xbf16>
    %cst_68 = arith.constant dense<0.000000e+00> : vector<32x16xf32>
    %191 = tpu.matmul %190, %177, %cst_68 {dimension_numbers = #tpu.dot_dimension_numbers<[1], [0], [0], [1], [0, 0, 1, 1], [], []>} : vector<32x32xbf16>, vector<32x16xbf16>, vector<32x16xf32> -> vector<32x16xf32>
    %192 = arith.truncf %191 : vector<32x16xf32> to vector<32x16xbf16>
    %193 = vector.extract_strided_slice %46 {offsets = [32, 0], sizes = [16, 64], strides = [1, 1]} : vector<64x64xbf16> to vector<16x64xbf16>
    %cst_69 = arith.constant dense<0.000000e+00> : vector<32x64xf32>
    %194 = tpu.matmul %192, %193, %cst_69 {dimension_numbers = #tpu.dot_dimension_numbers<[1], [0], [0], [1], [0, 0, 1, 1], [], []>} : vector<32x16xbf16>, vector<16x64xbf16>, vector<32x64xf32> -> vector<32x64xf32>
    %195 = arith.addf %174, %194 : vector<32x64xf32>
    %196 = vector.extract_strided_slice %36 {offsets = [32, 48], sizes = [32, 16], strides = [1, 1]} : vector<64x64xbf16> to vector<32x16xbf16>
    %197 = vector.extract_strided_slice %40 {offsets = [32, 48], sizes = [32, 16], strides = [1, 1]} : vector<64x64xbf16> to vector<32x16xbf16>
    %198 = vector.extract_strided_slice %44 {offsets = [32, 48], sizes = [32, 16], strides = [1, 1]} : vector<64x64xbf16> to vector<32x16xbf16>
    %cst_70 = arith.constant dense<0.000000e+00> : vector<32x32xf32>
    %199 = tpu.matmul %196, %197, %cst_70 {dimension_numbers = #tpu.dot_dimension_numbers<[1], [1], [0], [0], [0, 0, 1, 0], [], []>} : vector<32x16xbf16>, vector<32x16xbf16>, vector<32x32xf32> -> vector<32x32xf32>
    %200 = arith.addf %199, %5 : vector<32x32xf32>
    %cst_71 = arith.constant dense<0xFF800000> : vector<32xf32>
    %201 = vector.multi_reduction <maximumf>, %200, %cst_71 [1] : vector<32x32xf32> to vector<32xf32>
    %202 = vector.shape_cast %201 : vector<32xf32> to vector<32x1xf32>
    %203 = vector.broadcast %202 : vector<32x1xf32> to vector<32x32xf32>
    %204 = arith.subf %200, %203 : vector<32x32xf32>
    %205 = math.exp %204 : vector<32x32xf32>
    %cst_72 = arith.constant dense<0.000000e+00> : vector<32xf32>
    %206 = vector.multi_reduction <add>, %205, %cst_72 [1] : vector<32x32xf32> to vector<32xf32>
    %207 = vector.shape_cast %206 : vector<32xf32> to vector<32x1xf32>
    %208 = tpu.reciprocal %207 {approx = true} : vector<32x1xf32> -> vector<32x1xf32>
    %209 = vector.broadcast %208 : vector<32x1xf32> to vector<32x32xf32>
    %210 = arith.mulf %205, %209 : vector<32x32xf32>
    %211 = arith.truncf %210 : vector<32x32xf32> to vector<32x32xbf16>
    %cst_73 = arith.constant dense<0.000000e+00> : vector<32x16xf32>
    %212 = tpu.matmul %211, %198, %cst_73 {dimension_numbers = #tpu.dot_dimension_numbers<[1], [0], [0], [1], [0, 0, 1, 1], [], []>} : vector<32x32xbf16>, vector<32x16xbf16>, vector<32x16xf32> -> vector<32x16xf32>
    %213 = arith.truncf %212 : vector<32x16xf32> to vector<32x16xbf16>
    %214 = vector.extract_strided_slice %46 {offsets = [48, 0], sizes = [16, 64], strides = [1, 1]} : vector<64x64xbf16> to vector<16x64xbf16>
    %cst_74 = arith.constant dense<0.000000e+00> : vector<32x64xf32>
    %215 = tpu.matmul %213, %214, %cst_74 {dimension_numbers = #tpu.dot_dimension_numbers<[1], [0], [0], [1], [0, 0, 1, 1], [], []>} : vector<32x16xbf16>, vector<16x64xbf16>, vector<32x64xf32> -> vector<32x64xf32>
    %216 = arith.addf %195, %215 : vector<32x64xf32>
    %217 = tpu.concatenate %131, %216 in 0 : vector<32x64xf32>, vector<32x64xf32> -> vector<64x64xf32>
    %218 = arith.addf %4, %217 : vector<64x64xf32>
    %c0_75 = arith.constant 0 : index
    %c0_76 = arith.constant 0 : index
    %c0_77 = arith.constant 0 : index
    %219 = vector.load %arg11[%c0_75, %c0_76, %c0_77] : memref<2x1x64xf32, #tpu.memory_space<vmem>>, vector<1x1x64xf32>
    %220 = vector.shape_cast %219 : vector<1x1x64xf32> to vector<1x64xf32>
    %221 = vector.broadcast %220 : vector<1x64xf32> to vector<64x64xf32>
    %222 = arith.addf %218, %221 : vector<64x64xf32>
    %c0_78 = arith.constant 0 : index
    %c0_79 = arith.constant 0 : index
    %c0_80 = arith.constant 0 : index
    %223 = vector.load %arg12[%c0_78, %c0_79, %c0_80] : memref<2x1x64xf32, #tpu.memory_space<vmem>>, vector<1x1x64xf32>
    %224 = vector.shape_cast %223 : vector<1x1x64xf32> to vector<1x64xf32>
    %c0_81 = arith.constant 0 : index
    %c0_82 = arith.constant 0 : index
    %c0_83 = arith.constant 0 : index
    %225 = vector.load %arg13[%c0_81, %c0_82, %c0_83] : memref<2x1x64xf32, #tpu.memory_space<vmem>>, vector<1x1x64xf32>
    %226 = vector.shape_cast %225 : vector<1x1x64xf32> to vector<1x64xf32>
    %cst_84 = arith.constant dense<0.000000e+00> : vector<64xf32>
    %227 = vector.multi_reduction <add>, %222, %cst_84 [1] : vector<64x64xf32> to vector<64xf32>
    %228 = vector.shape_cast %227 : vector<64xf32> to vector<64x1xf32>
    %cst_85 = arith.constant 6.400000e+01 : f32
    %229 = vector.broadcast %cst_85 : f32 to vector<64x1xf32>
    %230 = arith.divf %228, %229 : vector<64x1xf32>
    %231 = vector.broadcast %230 : vector<64x1xf32> to vector<64x64xf32>
    %232 = arith.subf %222, %231 : vector<64x64xf32>
    %233 = arith.mulf %232, %232 : vector<64x64xf32>
    %cst_86 = arith.constant dense<0.000000e+00> : vector<64xf32>
    %234 = vector.multi_reduction <add>, %233, %cst_86 [1] : vector<64x64xf32> to vector<64xf32>
    %235 = vector.shape_cast %234 : vector<64xf32> to vector<64x1xf32>
    %cst_87 = arith.constant 6.400000e+01 : f32
    %236 = vector.broadcast %cst_87 : f32 to vector<64x1xf32>
    %237 = arith.divf %235, %236 : vector<64x1xf32>
    %238 = vector.broadcast %230 : vector<64x1xf32> to vector<64x64xf32>
    %239 = arith.subf %222, %238 : vector<64x64xf32>
    %cst_88 = arith.constant 9.99999974E-6 : f32
    %240 = vector.broadcast %cst_88 : f32 to vector<64x1xf32>
    %241 = arith.addf %237, %240 : vector<64x1xf32>
    %242 = math.rsqrt %241 : vector<64x1xf32>
    %243 = vector.broadcast %242 : vector<64x1xf32> to vector<64x64xf32>
    %244 = arith.mulf %239, %243 : vector<64x64xf32>
    %245 = vector.broadcast %224 : vector<1x64xf32> to vector<64x64xf32>
    %246 = arith.mulf %244, %245 : vector<64x64xf32>
    %247 = vector.broadcast %226 : vector<1x64xf32> to vector<64x64xf32>
    %248 = arith.addf %246, %247 : vector<64x64xf32>
    %249 = arith.truncf %248 : vector<64x64xf32> to vector<64x64xbf16>
    %c0_89 = arith.constant 0 : index
    %c0_90 = arith.constant 0 : index
    %c0_91 = arith.constant 0 : index
    %250 = vector.load %arg14[%c0_89, %c0_90, %c0_91] : memref<2x64x128xbf16, #tpu.memory_space<vmem>>, vector<1x64x128xbf16>
    %251 = vector.shape_cast %250 : vector<1x64x128xbf16> to vector<64x128xbf16>
    %cst_92 = arith.constant dense<0.000000e+00> : vector<64x128xf32>
    %252 = tpu.matmul %249, %251, %cst_92 {dimension_numbers = #tpu.dot_dimension_numbers<[1], [0], [0], [1], [0, 0, 1, 1], [], []>} : vector<64x64xbf16>, vector<64x128xbf16>, vector<64x128xf32> -> vector<64x128xf32>
    %c0_93 = arith.constant 0 : index
    %c0_94 = arith.constant 0 : index
    %c0_95 = arith.constant 0 : index
    %253 = vector.load %arg15[%c0_93, %c0_94, %c0_95] : memref<2x1x128xf32, #tpu.memory_space<vmem>>, vector<1x1x128xf32>
    %254 = vector.shape_cast %253 : vector<1x1x128xf32> to vector<1x128xf32>
    %255 = vector.broadcast %254 : vector<1x128xf32> to vector<64x128xf32>
    %256 = arith.addf %252, %255 : vector<64x128xf32>
    %cst_96 = arith.constant 5.000000e-01 : f32
    %257 = vector.broadcast %cst_96 : f32 to vector<64x128xf32>
    %258 = arith.mulf %257, %256 : vector<64x128xf32>
    %cst_97 = arith.constant 0.707106769 : f32
    %259 = vector.broadcast %cst_97 : f32 to vector<64x128xf32>
    %260 = arith.mulf %256, %259 : vector<64x128xf32>
    %261 = math.erf %260 : vector<64x128xf32>
    %cst_98 = arith.constant 1.000000e+00 : f32
    %262 = vector.broadcast %cst_98 : f32 to vector<64x128xf32>
    %263 = arith.addf %262, %261 : vector<64x128xf32>
    %264 = arith.mulf %258, %263 : vector<64x128xf32>
    %265 = arith.truncf %264 : vector<64x128xf32> to vector<64x128xbf16>
    %c0_99 = arith.constant 0 : index
    %c0_100 = arith.constant 0 : index
    %c0_101 = arith.constant 0 : index
    %266 = vector.load %arg16[%c0_99, %c0_100, %c0_101] : memref<2x128x64xbf16, #tpu.memory_space<vmem>>, vector<1x128x64xbf16>
    %267 = vector.shape_cast %266 : vector<1x128x64xbf16> to vector<128x64xbf16>
    %cst_102 = arith.constant dense<0.000000e+00> : vector<64x64xf32>
    %268 = tpu.matmul %265, %267, %cst_102 {dimension_numbers = #tpu.dot_dimension_numbers<[1], [0], [0], [1], [0, 0, 1, 1], [], []>} : vector<64x128xbf16>, vector<128x64xbf16>, vector<64x64xf32> -> vector<64x64xf32>
    %c0_103 = arith.constant 0 : index
    %c0_104 = arith.constant 0 : index
    %c0_105 = arith.constant 0 : index
    %269 = vector.load %arg17[%c0_103, %c0_104, %c0_105] : memref<2x1x64xf32, #tpu.memory_space<vmem>>, vector<1x1x64xf32>
    %270 = vector.shape_cast %269 : vector<1x1x64xf32> to vector<1x64xf32>
    %271 = vector.broadcast %270 : vector<1x64xf32> to vector<64x64xf32>
    %272 = arith.addf %268, %271 : vector<64x64xf32>
    %273 = arith.addf %222, %272 : vector<64x64xf32>
    %c1 = arith.constant 1 : index
    %c0_106 = arith.constant 0 : index
    %c0_107 = arith.constant 0 : index
    %274 = vector.load %arg5[%c1, %c0_106, %c0_107] : memref<2x1x64xf32, #tpu.memory_space<vmem>>, vector<1x1x64xf32>
    %275 = vector.shape_cast %274 : vector<1x1x64xf32> to vector<1x64xf32>
    %c1_108 = arith.constant 1 : index
    %c0_109 = arith.constant 0 : index
    %c0_110 = arith.constant 0 : index
    %276 = vector.load %arg6[%c1_108, %c0_109, %c0_110] : memref<2x1x64xf32, #tpu.memory_space<vmem>>, vector<1x1x64xf32>
    %277 = vector.shape_cast %276 : vector<1x1x64xf32> to vector<1x64xf32>
    %cst_111 = arith.constant dense<0.000000e+00> : vector<64xf32>
    %278 = vector.multi_reduction <add>, %273, %cst_111 [1] : vector<64x64xf32> to vector<64xf32>
    %279 = vector.shape_cast %278 : vector<64xf32> to vector<64x1xf32>
    %cst_112 = arith.constant 6.400000e+01 : f32
    %280 = vector.broadcast %cst_112 : f32 to vector<64x1xf32>
    %281 = arith.divf %279, %280 : vector<64x1xf32>
    %282 = vector.broadcast %281 : vector<64x1xf32> to vector<64x64xf32>
    %283 = arith.subf %273, %282 : vector<64x64xf32>
    %284 = arith.mulf %283, %283 : vector<64x64xf32>
    %cst_113 = arith.constant dense<0.000000e+00> : vector<64xf32>
    %285 = vector.multi_reduction <add>, %284, %cst_113 [1] : vector<64x64xf32> to vector<64xf32>
    %286 = vector.shape_cast %285 : vector<64xf32> to vector<64x1xf32>
    %cst_114 = arith.constant 6.400000e+01 : f32
    %287 = vector.broadcast %cst_114 : f32 to vector<64x1xf32>
    %288 = arith.divf %286, %287 : vector<64x1xf32>
    %289 = vector.broadcast %281 : vector<64x1xf32> to vector<64x64xf32>
    %290 = arith.subf %273, %289 : vector<64x64xf32>
    %cst_115 = arith.constant 9.99999974E-6 : f32
    %291 = vector.broadcast %cst_115 : f32 to vector<64x1xf32>
    %292 = arith.addf %288, %291 : vector<64x1xf32>
    %293 = math.rsqrt %292 : vector<64x1xf32>
    %294 = vector.broadcast %293 : vector<64x1xf32> to vector<64x64xf32>
    %295 = arith.mulf %290, %294 : vector<64x64xf32>
    %296 = vector.broadcast %275 : vector<1x64xf32> to vector<64x64xf32>
    %297 = arith.mulf %295, %296 : vector<64x64xf32>
    %298 = vector.broadcast %277 : vector<1x64xf32> to vector<64x64xf32>
    %299 = arith.addf %297, %298 : vector<64x64xf32>
    %300 = arith.truncf %299 : vector<64x64xf32> to vector<64x64xbf16>
    %c1_116 = arith.constant 1 : index
    %c0_117 = arith.constant 0 : index
    %c0_118 = arith.constant 0 : index
    %301 = vector.load %arg7[%c1_116, %c0_117, %c0_118] : memref<2x64x64xbf16, #tpu.memory_space<vmem>>, vector<1x64x64xbf16>
    %302 = vector.shape_cast %301 : vector<1x64x64xbf16> to vector<64x64xbf16>
    %cst_119 = arith.constant dense<0.000000e+00> : vector<64x64xf32>
    %303 = tpu.matmul %300, %302, %cst_119 {dimension_numbers = #tpu.dot_dimension_numbers<[1], [0], [0], [1], [0, 0, 1, 1], [], []>} : vector<64x64xbf16>, vector<64x64xbf16>, vector<64x64xf32> -> vector<64x64xf32>
    %304 = arith.truncf %303 : vector<64x64xf32> to vector<64x64xbf16>
    %c1_120 = arith.constant 1 : index
    %c0_121 = arith.constant 0 : index
    %c0_122 = arith.constant 0 : index
    %305 = vector.load %arg8[%c1_120, %c0_121, %c0_122] : memref<2x64x64xbf16, #tpu.memory_space<vmem>>, vector<1x64x64xbf16>
    %306 = vector.shape_cast %305 : vector<1x64x64xbf16> to vector<64x64xbf16>
    %cst_123 = arith.constant dense<0.000000e+00> : vector<64x64xf32>
    %307 = tpu.matmul %300, %306, %cst_123 {dimension_numbers = #tpu.dot_dimension_numbers<[1], [0], [0], [1], [0, 0, 1, 1], [], []>} : vector<64x64xbf16>, vector<64x64xbf16>, vector<64x64xf32> -> vector<64x64xf32>
    %308 = arith.truncf %307 : vector<64x64xf32> to vector<64x64xbf16>
    %c1_124 = arith.constant 1 : index
    %c0_125 = arith.constant 0 : index
    %c0_126 = arith.constant 0 : index
    %309 = vector.load %arg9[%c1_124, %c0_125, %c0_126] : memref<2x64x64xbf16, #tpu.memory_space<vmem>>, vector<1x64x64xbf16>
    %310 = vector.shape_cast %309 : vector<1x64x64xbf16> to vector<64x64xbf16>
    %cst_127 = arith.constant dense<0.000000e+00> : vector<64x64xf32>
    %311 = tpu.matmul %300, %310, %cst_127 {dimension_numbers = #tpu.dot_dimension_numbers<[1], [0], [0], [1], [0, 0, 1, 1], [], []>} : vector<64x64xbf16>, vector<64x64xbf16>, vector<64x64xf32> -> vector<64x64xf32>
    %312 = arith.truncf %311 : vector<64x64xf32> to vector<64x64xbf16>
    %c1_128 = arith.constant 1 : index
    %c0_129 = arith.constant 0 : index
    %c0_130 = arith.constant 0 : index
    %313 = vector.load %arg10[%c1_128, %c0_129, %c0_130] : memref<2x64x64xbf16, #tpu.memory_space<vmem>>, vector<1x64x64xbf16>
    %314 = vector.shape_cast %313 : vector<1x64x64xbf16> to vector<64x64xbf16>
    %cst_131 = arith.constant 0.000000e+00 : f32
    %315 = vector.broadcast %cst_131 : f32 to vector<32x64xf32>
    %316 = vector.extract_strided_slice %304 {offsets = [0, 0], sizes = [32, 16], strides = [1, 1]} : vector<64x64xbf16> to vector<32x16xbf16>
    %317 = vector.extract_strided_slice %308 {offsets = [0, 0], sizes = [32, 16], strides = [1, 1]} : vector<64x64xbf16> to vector<32x16xbf16>
    %318 = vector.extract_strided_slice %312 {offsets = [0, 0], sizes = [32, 16], strides = [1, 1]} : vector<64x64xbf16> to vector<32x16xbf16>
    %cst_132 = arith.constant dense<0.000000e+00> : vector<32x32xf32>
    %319 = tpu.matmul %316, %317, %cst_132 {dimension_numbers = #tpu.dot_dimension_numbers<[1], [1], [0], [0], [0, 0, 1, 0], [], []>} : vector<32x16xbf16>, vector<32x16xbf16>, vector<32x32xf32> -> vector<32x32xf32>
    %320 = arith.addf %319, %5 : vector<32x32xf32>
    %cst_133 = arith.constant dense<0xFF800000> : vector<32xf32>
    %321 = vector.multi_reduction <maximumf>, %320, %cst_133 [1] : vector<32x32xf32> to vector<32xf32>
    %322 = vector.shape_cast %321 : vector<32xf32> to vector<32x1xf32>
    %323 = vector.broadcast %322 : vector<32x1xf32> to vector<32x32xf32>
    %324 = arith.subf %320, %323 : vector<32x32xf32>
    %325 = math.exp %324 : vector<32x32xf32>
    %cst_134 = arith.constant dense<0.000000e+00> : vector<32xf32>
    %326 = vector.multi_reduction <add>, %325, %cst_134 [1] : vector<32x32xf32> to vector<32xf32>
    %327 = vector.shape_cast %326 : vector<32xf32> to vector<32x1xf32>
    %328 = tpu.reciprocal %327 {approx = true} : vector<32x1xf32> -> vector<32x1xf32>
    %329 = vector.broadcast %328 : vector<32x1xf32> to vector<32x32xf32>
    %330 = arith.mulf %325, %329 : vector<32x32xf32>
    %331 = arith.truncf %330 : vector<32x32xf32> to vector<32x32xbf16>
    %cst_135 = arith.constant dense<0.000000e+00> : vector<32x16xf32>
    %332 = tpu.matmul %331, %318, %cst_135 {dimension_numbers = #tpu.dot_dimension_numbers<[1], [0], [0], [1], [0, 0, 1, 1], [], []>} : vector<32x32xbf16>, vector<32x16xbf16>, vector<32x16xf32> -> vector<32x16xf32>
    %333 = arith.truncf %332 : vector<32x16xf32> to vector<32x16xbf16>
    %334 = vector.extract_strided_slice %314 {offsets = [0, 0], sizes = [16, 64], strides = [1, 1]} : vector<64x64xbf16> to vector<16x64xbf16>
    %cst_136 = arith.constant dense<0.000000e+00> : vector<32x64xf32>
    %335 = tpu.matmul %333, %334, %cst_136 {dimension_numbers = #tpu.dot_dimension_numbers<[1], [0], [0], [1], [0, 0, 1, 1], [], []>} : vector<32x16xbf16>, vector<16x64xbf16>, vector<32x64xf32> -> vector<32x64xf32>
    %336 = arith.addf %315, %335 : vector<32x64xf32>
    %337 = vector.extract_strided_slice %304 {offsets = [0, 16], sizes = [32, 16], strides = [1, 1]} : vector<64x64xbf16> to vector<32x16xbf16>
    %338 = vector.extract_strided_slice %308 {offsets = [0, 16], sizes = [32, 16], strides = [1, 1]} : vector<64x64xbf16> to vector<32x16xbf16>
    %339 = vector.extract_strided_slice %312 {offsets = [0, 16], sizes = [32, 16], strides = [1, 1]} : vector<64x64xbf16> to vector<32x16xbf16>
    %cst_137 = arith.constant dense<0.000000e+00> : vector<32x32xf32>
    %340 = tpu.matmul %337, %338, %cst_137 {dimension_numbers = #tpu.dot_dimension_numbers<[1], [1], [0], [0], [0, 0, 1, 0], [], []>} : vector<32x16xbf16>, vector<32x16xbf16>, vector<32x32xf32> -> vector<32x32xf32>
    %341 = arith.addf %340, %5 : vector<32x32xf32>
    %cst_138 = arith.constant dense<0xFF800000> : vector<32xf32>
    %342 = vector.multi_reduction <maximumf>, %341, %cst_138 [1] : vector<32x32xf32> to vector<32xf32>
    %343 = vector.shape_cast %342 : vector<32xf32> to vector<32x1xf32>
    %344 = vector.broadcast %343 : vector<32x1xf32> to vector<32x32xf32>
    %345 = arith.subf %341, %344 : vector<32x32xf32>
    %346 = math.exp %345 : vector<32x32xf32>
    %cst_139 = arith.constant dense<0.000000e+00> : vector<32xf32>
    %347 = vector.multi_reduction <add>, %346, %cst_139 [1] : vector<32x32xf32> to vector<32xf32>
    %348 = vector.shape_cast %347 : vector<32xf32> to vector<32x1xf32>
    %349 = tpu.reciprocal %348 {approx = true} : vector<32x1xf32> -> vector<32x1xf32>
    %350 = vector.broadcast %349 : vector<32x1xf32> to vector<32x32xf32>
    %351 = arith.mulf %346, %350 : vector<32x32xf32>
    %352 = arith.truncf %351 : vector<32x32xf32> to vector<32x32xbf16>
    %cst_140 = arith.constant dense<0.000000e+00> : vector<32x16xf32>
    %353 = tpu.matmul %352, %339, %cst_140 {dimension_numbers = #tpu.dot_dimension_numbers<[1], [0], [0], [1], [0, 0, 1, 1], [], []>} : vector<32x32xbf16>, vector<32x16xbf16>, vector<32x16xf32> -> vector<32x16xf32>
    %354 = arith.truncf %353 : vector<32x16xf32> to vector<32x16xbf16>
    %355 = vector.extract_strided_slice %314 {offsets = [16, 0], sizes = [16, 64], strides = [1, 1]} : vector<64x64xbf16> to vector<16x64xbf16>
    %cst_141 = arith.constant dense<0.000000e+00> : vector<32x64xf32>
    %356 = tpu.matmul %354, %355, %cst_141 {dimension_numbers = #tpu.dot_dimension_numbers<[1], [0], [0], [1], [0, 0, 1, 1], [], []>} : vector<32x16xbf16>, vector<16x64xbf16>, vector<32x64xf32> -> vector<32x64xf32>
    %357 = arith.addf %336, %356 : vector<32x64xf32>
    %358 = vector.extract_strided_slice %304 {offsets = [0, 32], sizes = [32, 16], strides = [1, 1]} : vector<64x64xbf16> to vector<32x16xbf16>
    %359 = vector.extract_strided_slice %308 {offsets = [0, 32], sizes = [32, 16], strides = [1, 1]} : vector<64x64xbf16> to vector<32x16xbf16>
    %360 = vector.extract_strided_slice %312 {offsets = [0, 32], sizes = [32, 16], strides = [1, 1]} : vector<64x64xbf16> to vector<32x16xbf16>
    %cst_142 = arith.constant dense<0.000000e+00> : vector<32x32xf32>
    %361 = tpu.matmul %358, %359, %cst_142 {dimension_numbers = #tpu.dot_dimension_numbers<[1], [1], [0], [0], [0, 0, 1, 0], [], []>} : vector<32x16xbf16>, vector<32x16xbf16>, vector<32x32xf32> -> vector<32x32xf32>
    %362 = arith.addf %361, %5 : vector<32x32xf32>
    %cst_143 = arith.constant dense<0xFF800000> : vector<32xf32>
    %363 = vector.multi_reduction <maximumf>, %362, %cst_143 [1] : vector<32x32xf32> to vector<32xf32>
    %364 = vector.shape_cast %363 : vector<32xf32> to vector<32x1xf32>
    %365 = vector.broadcast %364 : vector<32x1xf32> to vector<32x32xf32>
    %366 = arith.subf %362, %365 : vector<32x32xf32>
    %367 = math.exp %366 : vector<32x32xf32>
    %cst_144 = arith.constant dense<0.000000e+00> : vector<32xf32>
    %368 = vector.multi_reduction <add>, %367, %cst_144 [1] : vector<32x32xf32> to vector<32xf32>
    %369 = vector.shape_cast %368 : vector<32xf32> to vector<32x1xf32>
    %370 = tpu.reciprocal %369 {approx = true} : vector<32x1xf32> -> vector<32x1xf32>
    %371 = vector.broadcast %370 : vector<32x1xf32> to vector<32x32xf32>
    %372 = arith.mulf %367, %371 : vector<32x32xf32>
    %373 = arith.truncf %372 : vector<32x32xf32> to vector<32x32xbf16>
    %cst_145 = arith.constant dense<0.000000e+00> : vector<32x16xf32>
    %374 = tpu.matmul %373, %360, %cst_145 {dimension_numbers = #tpu.dot_dimension_numbers<[1], [0], [0], [1], [0, 0, 1, 1], [], []>} : vector<32x32xbf16>, vector<32x16xbf16>, vector<32x16xf32> -> vector<32x16xf32>
    %375 = arith.truncf %374 : vector<32x16xf32> to vector<32x16xbf16>
    %376 = vector.extract_strided_slice %314 {offsets = [32, 0], sizes = [16, 64], strides = [1, 1]} : vector<64x64xbf16> to vector<16x64xbf16>
    %cst_146 = arith.constant dense<0.000000e+00> : vector<32x64xf32>
    %377 = tpu.matmul %375, %376, %cst_146 {dimension_numbers = #tpu.dot_dimension_numbers<[1], [0], [0], [1], [0, 0, 1, 1], [], []>} : vector<32x16xbf16>, vector<16x64xbf16>, vector<32x64xf32> -> vector<32x64xf32>
    %378 = arith.addf %357, %377 : vector<32x64xf32>
    %379 = vector.extract_strided_slice %304 {offsets = [0, 48], sizes = [32, 16], strides = [1, 1]} : vector<64x64xbf16> to vector<32x16xbf16>
    %380 = vector.extract_strided_slice %308 {offsets = [0, 48], sizes = [32, 16], strides = [1, 1]} : vector<64x64xbf16> to vector<32x16xbf16>
    %381 = vector.extract_strided_slice %312 {offsets = [0, 48], sizes = [32, 16], strides = [1, 1]} : vector<64x64xbf16> to vector<32x16xbf16>
    %cst_147 = arith.constant dense<0.000000e+00> : vector<32x32xf32>
    %382 = tpu.matmul %379, %380, %cst_147 {dimension_numbers = #tpu.dot_dimension_numbers<[1], [1], [0], [0], [0, 0, 1, 0], [], []>} : vector<32x16xbf16>, vector<32x16xbf16>, vector<32x32xf32> -> vector<32x32xf32>
    %383 = arith.addf %382, %5 : vector<32x32xf32>
    %cst_148 = arith.constant dense<0xFF800000> : vector<32xf32>
    %384 = vector.multi_reduction <maximumf>, %383, %cst_148 [1] : vector<32x32xf32> to vector<32xf32>
    %385 = vector.shape_cast %384 : vector<32xf32> to vector<32x1xf32>
    %386 = vector.broadcast %385 : vector<32x1xf32> to vector<32x32xf32>
    %387 = arith.subf %383, %386 : vector<32x32xf32>
    %388 = math.exp %387 : vector<32x32xf32>
    %cst_149 = arith.constant dense<0.000000e+00> : vector<32xf32>
    %389 = vector.multi_reduction <add>, %388, %cst_149 [1] : vector<32x32xf32> to vector<32xf32>
    %390 = vector.shape_cast %389 : vector<32xf32> to vector<32x1xf32>
    %391 = tpu.reciprocal %390 {approx = true} : vector<32x1xf32> -> vector<32x1xf32>
    %392 = vector.broadcast %391 : vector<32x1xf32> to vector<32x32xf32>
    %393 = arith.mulf %388, %392 : vector<32x32xf32>
    %394 = arith.truncf %393 : vector<32x32xf32> to vector<32x32xbf16>
    %cst_150 = arith.constant dense<0.000000e+00> : vector<32x16xf32>
    %395 = tpu.matmul %394, %381, %cst_150 {dimension_numbers = #tpu.dot_dimension_numbers<[1], [0], [0], [1], [0, 0, 1, 1], [], []>} : vector<32x32xbf16>, vector<32x16xbf16>, vector<32x16xf32> -> vector<32x16xf32>
    %396 = arith.truncf %395 : vector<32x16xf32> to vector<32x16xbf16>
    %397 = vector.extract_strided_slice %314 {offsets = [48, 0], sizes = [16, 64], strides = [1, 1]} : vector<64x64xbf16> to vector<16x64xbf16>
    %cst_151 = arith.constant dense<0.000000e+00> : vector<32x64xf32>
    %398 = tpu.matmul %396, %397, %cst_151 {dimension_numbers = #tpu.dot_dimension_numbers<[1], [0], [0], [1], [0, 0, 1, 1], [], []>} : vector<32x16xbf16>, vector<16x64xbf16>, vector<32x64xf32> -> vector<32x64xf32>
    %399 = arith.addf %378, %398 : vector<32x64xf32>
    %cst_152 = arith.constant 0.000000e+00 : f32
    %400 = vector.broadcast %cst_152 : f32 to vector<32x64xf32>
    %401 = vector.extract_strided_slice %304 {offsets = [32, 0], sizes = [32, 16], strides = [1, 1]} : vector<64x64xbf16> to vector<32x16xbf16>
    %402 = vector.extract_strided_slice %308 {offsets = [32, 0], sizes = [32, 16], strides = [1, 1]} : vector<64x64xbf16> to vector<32x16xbf16>
    %403 = vector.extract_strided_slice %312 {offsets = [32, 0], sizes = [32, 16], strides = [1, 1]} : vector<64x64xbf16> to vector<32x16xbf16>
    %cst_153 = arith.constant dense<0.000000e+00> : vector<32x32xf32>
    %404 = tpu.matmul %401, %402, %cst_153 {dimension_numbers = #tpu.dot_dimension_numbers<[1], [1], [0], [0], [0, 0, 1, 0], [], []>} : vector<32x16xbf16>, vector<32x16xbf16>, vector<32x32xf32> -> vector<32x32xf32>
    %405 = arith.addf %404, %5 : vector<32x32xf32>
    %cst_154 = arith.constant dense<0xFF800000> : vector<32xf32>
    %406 = vector.multi_reduction <maximumf>, %405, %cst_154 [1] : vector<32x32xf32> to vector<32xf32>
    %407 = vector.shape_cast %406 : vector<32xf32> to vector<32x1xf32>
    %408 = vector.broadcast %407 : vector<32x1xf32> to vector<32x32xf32>
    %409 = arith.subf %405, %408 : vector<32x32xf32>
    %410 = math.exp %409 : vector<32x32xf32>
    %cst_155 = arith.constant dense<0.000000e+00> : vector<32xf32>
    %411 = vector.multi_reduction <add>, %410, %cst_155 [1] : vector<32x32xf32> to vector<32xf32>
    %412 = vector.shape_cast %411 : vector<32xf32> to vector<32x1xf32>
    %413 = tpu.reciprocal %412 {approx = true} : vector<32x1xf32> -> vector<32x1xf32>
    %414 = vector.broadcast %413 : vector<32x1xf32> to vector<32x32xf32>
    %415 = arith.mulf %410, %414 : vector<32x32xf32>
    %416 = arith.truncf %415 : vector<32x32xf32> to vector<32x32xbf16>
    %cst_156 = arith.constant dense<0.000000e+00> : vector<32x16xf32>
    %417 = tpu.matmul %416, %403, %cst_156 {dimension_numbers = #tpu.dot_dimension_numbers<[1], [0], [0], [1], [0, 0, 1, 1], [], []>} : vector<32x32xbf16>, vector<32x16xbf16>, vector<32x16xf32> -> vector<32x16xf32>
    %418 = arith.truncf %417 : vector<32x16xf32> to vector<32x16xbf16>
    %419 = vector.extract_strided_slice %314 {offsets = [0, 0], sizes = [16, 64], strides = [1, 1]} : vector<64x64xbf16> to vector<16x64xbf16>
    %cst_157 = arith.constant dense<0.000000e+00> : vector<32x64xf32>
    %420 = tpu.matmul %418, %419, %cst_157 {dimension_numbers = #tpu.dot_dimension_numbers<[1], [0], [0], [1], [0, 0, 1, 1], [], []>} : vector<32x16xbf16>, vector<16x64xbf16>, vector<32x64xf32> -> vector<32x64xf32>
    %421 = arith.addf %400, %420 : vector<32x64xf32>
    %422 = vector.extract_strided_slice %304 {offsets = [32, 16], sizes = [32, 16], strides = [1, 1]} : vector<64x64xbf16> to vector<32x16xbf16>
    %423 = vector.extract_strided_slice %308 {offsets = [32, 16], sizes = [32, 16], strides = [1, 1]} : vector<64x64xbf16> to vector<32x16xbf16>
    %424 = vector.extract_strided_slice %312 {offsets = [32, 16], sizes = [32, 16], strides = [1, 1]} : vector<64x64xbf16> to vector<32x16xbf16>
    %cst_158 = arith.constant dense<0.000000e+00> : vector<32x32xf32>
    %425 = tpu.matmul %422, %423, %cst_158 {dimension_numbers = #tpu.dot_dimension_numbers<[1], [1], [0], [0], [0, 0, 1, 0], [], []>} : vector<32x16xbf16>, vector<32x16xbf16>, vector<32x32xf32> -> vector<32x32xf32>
    %426 = arith.addf %425, %5 : vector<32x32xf32>
    %cst_159 = arith.constant dense<0xFF800000> : vector<32xf32>
    %427 = vector.multi_reduction <maximumf>, %426, %cst_159 [1] : vector<32x32xf32> to vector<32xf32>
    %428 = vector.shape_cast %427 : vector<32xf32> to vector<32x1xf32>
    %429 = vector.broadcast %428 : vector<32x1xf32> to vector<32x32xf32>
    %430 = arith.subf %426, %429 : vector<32x32xf32>
    %431 = math.exp %430 : vector<32x32xf32>
    %cst_160 = arith.constant dense<0.000000e+00> : vector<32xf32>
    %432 = vector.multi_reduction <add>, %431, %cst_160 [1] : vector<32x32xf32> to vector<32xf32>
    %433 = vector.shape_cast %432 : vector<32xf32> to vector<32x1xf32>
    %434 = tpu.reciprocal %433 {approx = true} : vector<32x1xf32> -> vector<32x1xf32>
    %435 = vector.broadcast %434 : vector<32x1xf32> to vector<32x32xf32>
    %436 = arith.mulf %431, %435 : vector<32x32xf32>
    %437 = arith.truncf %436 : vector<32x32xf32> to vector<32x32xbf16>
    %cst_161 = arith.constant dense<0.000000e+00> : vector<32x16xf32>
    %438 = tpu.matmul %437, %424, %cst_161 {dimension_numbers = #tpu.dot_dimension_numbers<[1], [0], [0], [1], [0, 0, 1, 1], [], []>} : vector<32x32xbf16>, vector<32x16xbf16>, vector<32x16xf32> -> vector<32x16xf32>
    %439 = arith.truncf %438 : vector<32x16xf32> to vector<32x16xbf16>
    %440 = vector.extract_strided_slice %314 {offsets = [16, 0], sizes = [16, 64], strides = [1, 1]} : vector<64x64xbf16> to vector<16x64xbf16>
    %cst_162 = arith.constant dense<0.000000e+00> : vector<32x64xf32>
    %441 = tpu.matmul %439, %440, %cst_162 {dimension_numbers = #tpu.dot_dimension_numbers<[1], [0], [0], [1], [0, 0, 1, 1], [], []>} : vector<32x16xbf16>, vector<16x64xbf16>, vector<32x64xf32> -> vector<32x64xf32>
    %442 = arith.addf %421, %441 : vector<32x64xf32>
    %443 = vector.extract_strided_slice %304 {offsets = [32, 32], sizes = [32, 16], strides = [1, 1]} : vector<64x64xbf16> to vector<32x16xbf16>
    %444 = vector.extract_strided_slice %308 {offsets = [32, 32], sizes = [32, 16], strides = [1, 1]} : vector<64x64xbf16> to vector<32x16xbf16>
    %445 = vector.extract_strided_slice %312 {offsets = [32, 32], sizes = [32, 16], strides = [1, 1]} : vector<64x64xbf16> to vector<32x16xbf16>
    %cst_163 = arith.constant dense<0.000000e+00> : vector<32x32xf32>
    %446 = tpu.matmul %443, %444, %cst_163 {dimension_numbers = #tpu.dot_dimension_numbers<[1], [1], [0], [0], [0, 0, 1, 0], [], []>} : vector<32x16xbf16>, vector<32x16xbf16>, vector<32x32xf32> -> vector<32x32xf32>
    %447 = arith.addf %446, %5 : vector<32x32xf32>
    %cst_164 = arith.constant dense<0xFF800000> : vector<32xf32>
    %448 = vector.multi_reduction <maximumf>, %447, %cst_164 [1] : vector<32x32xf32> to vector<32xf32>
    %449 = vector.shape_cast %448 : vector<32xf32> to vector<32x1xf32>
    %450 = vector.broadcast %449 : vector<32x1xf32> to vector<32x32xf32>
    %451 = arith.subf %447, %450 : vector<32x32xf32>
    %452 = math.exp %451 : vector<32x32xf32>
    %cst_165 = arith.constant dense<0.000000e+00> : vector<32xf32>
    %453 = vector.multi_reduction <add>, %452, %cst_165 [1] : vector<32x32xf32> to vector<32xf32>
    %454 = vector.shape_cast %453 : vector<32xf32> to vector<32x1xf32>
    %455 = tpu.reciprocal %454 {approx = true} : vector<32x1xf32> -> vector<32x1xf32>
    %456 = vector.broadcast %455 : vector<32x1xf32> to vector<32x32xf32>
    %457 = arith.mulf %452, %456 : vector<32x32xf32>
    %458 = arith.truncf %457 : vector<32x32xf32> to vector<32x32xbf16>
    %cst_166 = arith.constant dense<0.000000e+00> : vector<32x16xf32>
    %459 = tpu.matmul %458, %445, %cst_166 {dimension_numbers = #tpu.dot_dimension_numbers<[1], [0], [0], [1], [0, 0, 1, 1], [], []>} : vector<32x32xbf16>, vector<32x16xbf16>, vector<32x16xf32> -> vector<32x16xf32>
    %460 = arith.truncf %459 : vector<32x16xf32> to vector<32x16xbf16>
    %461 = vector.extract_strided_slice %314 {offsets = [32, 0], sizes = [16, 64], strides = [1, 1]} : vector<64x64xbf16> to vector<16x64xbf16>
    %cst_167 = arith.constant dense<0.000000e+00> : vector<32x64xf32>
    %462 = tpu.matmul %460, %461, %cst_167 {dimension_numbers = #tpu.dot_dimension_numbers<[1], [0], [0], [1], [0, 0, 1, 1], [], []>} : vector<32x16xbf16>, vector<16x64xbf16>, vector<32x64xf32> -> vector<32x64xf32>
    %463 = arith.addf %442, %462 : vector<32x64xf32>
    %464 = vector.extract_strided_slice %304 {offsets = [32, 48], sizes = [32, 16], strides = [1, 1]} : vector<64x64xbf16> to vector<32x16xbf16>
    %465 = vector.extract_strided_slice %308 {offsets = [32, 48], sizes = [32, 16], strides = [1, 1]} : vector<64x64xbf16> to vector<32x16xbf16>
    %466 = vector.extract_strided_slice %312 {offsets = [32, 48], sizes = [32, 16], strides = [1, 1]} : vector<64x64xbf16> to vector<32x16xbf16>
    %cst_168 = arith.constant dense<0.000000e+00> : vector<32x32xf32>
    %467 = tpu.matmul %464, %465, %cst_168 {dimension_numbers = #tpu.dot_dimension_numbers<[1], [1], [0], [0], [0, 0, 1, 0], [], []>} : vector<32x16xbf16>, vector<32x16xbf16>, vector<32x32xf32> -> vector<32x32xf32>
    %468 = arith.addf %467, %5 : vector<32x32xf32>
    %cst_169 = arith.constant dense<0xFF800000> : vector<32xf32>
    %469 = vector.multi_reduction <maximumf>, %468, %cst_169 [1] : vector<32x32xf32> to vector<32xf32>
    %470 = vector.shape_cast %469 : vector<32xf32> to vector<32x1xf32>
    %471 = vector.broadcast %470 : vector<32x1xf32> to vector<32x32xf32>
    %472 = arith.subf %468, %471 : vector<32x32xf32>
    %473 = math.exp %472 : vector<32x32xf32>
    %cst_170 = arith.constant dense<0.000000e+00> : vector<32xf32>
    %474 = vector.multi_reduction <add>, %473, %cst_170 [1] : vector<32x32xf32> to vector<32xf32>
    %475 = vector.shape_cast %474 : vector<32xf32> to vector<32x1xf32>
    %476 = tpu.reciprocal %475 {approx = true} : vector<32x1xf32> -> vector<32x1xf32>
    %477 = vector.broadcast %476 : vector<32x1xf32> to vector<32x32xf32>
    %478 = arith.mulf %473, %477 : vector<32x32xf32>
    %479 = arith.truncf %478 : vector<32x32xf32> to vector<32x32xbf16>
    %cst_171 = arith.constant dense<0.000000e+00> : vector<32x16xf32>
    %480 = tpu.matmul %479, %466, %cst_171 {dimension_numbers = #tpu.dot_dimension_numbers<[1], [0], [0], [1], [0, 0, 1, 1], [], []>} : vector<32x32xbf16>, vector<32x16xbf16>, vector<32x16xf32> -> vector<32x16xf32>
    %481 = arith.truncf %480 : vector<32x16xf32> to vector<32x16xbf16>
    %482 = vector.extract_strided_slice %314 {offsets = [48, 0], sizes = [16, 64], strides = [1, 1]} : vector<64x64xbf16> to vector<16x64xbf16>
    %cst_172 = arith.constant dense<0.000000e+00> : vector<32x64xf32>
    %483 = tpu.matmul %481, %482, %cst_172 {dimension_numbers = #tpu.dot_dimension_numbers<[1], [0], [0], [1], [0, 0, 1, 1], [], []>} : vector<32x16xbf16>, vector<16x64xbf16>, vector<32x64xf32> -> vector<32x64xf32>
    %484 = arith.addf %463, %483 : vector<32x64xf32>
    %485 = tpu.concatenate %399, %484 in 0 : vector<32x64xf32>, vector<32x64xf32> -> vector<64x64xf32>
    %486 = arith.addf %273, %485 : vector<64x64xf32>
    %c1_173 = arith.constant 1 : index
    %c0_174 = arith.constant 0 : index
    %c0_175 = arith.constant 0 : index
    %487 = vector.load %arg11[%c1_173, %c0_174, %c0_175] : memref<2x1x64xf32, #tpu.memory_space<vmem>>, vector<1x1x64xf32>
    %488 = vector.shape_cast %487 : vector<1x1x64xf32> to vector<1x64xf32>
    %489 = vector.broadcast %488 : vector<1x64xf32> to vector<64x64xf32>
    %490 = arith.addf %486, %489 : vector<64x64xf32>
    %c1_176 = arith.constant 1 : index
    %c0_177 = arith.constant 0 : index
    %c0_178 = arith.constant 0 : index
    %491 = vector.load %arg12[%c1_176, %c0_177, %c0_178] : memref<2x1x64xf32, #tpu.memory_space<vmem>>, vector<1x1x64xf32>
    %492 = vector.shape_cast %491 : vector<1x1x64xf32> to vector<1x64xf32>
    %c1_179 = arith.constant 1 : index
    %c0_180 = arith.constant 0 : index
    %c0_181 = arith.constant 0 : index
    %493 = vector.load %arg13[%c1_179, %c0_180, %c0_181] : memref<2x1x64xf32, #tpu.memory_space<vmem>>, vector<1x1x64xf32>
    %494 = vector.shape_cast %493 : vector<1x1x64xf32> to vector<1x64xf32>
    %cst_182 = arith.constant dense<0.000000e+00> : vector<64xf32>
    %495 = vector.multi_reduction <add>, %490, %cst_182 [1] : vector<64x64xf32> to vector<64xf32>
    %496 = vector.shape_cast %495 : vector<64xf32> to vector<64x1xf32>
    %cst_183 = arith.constant 6.400000e+01 : f32
    %497 = vector.broadcast %cst_183 : f32 to vector<64x1xf32>
    %498 = arith.divf %496, %497 : vector<64x1xf32>
    %499 = vector.broadcast %498 : vector<64x1xf32> to vector<64x64xf32>
    %500 = arith.subf %490, %499 : vector<64x64xf32>
    %501 = arith.mulf %500, %500 : vector<64x64xf32>
    %cst_184 = arith.constant dense<0.000000e+00> : vector<64xf32>
    %502 = vector.multi_reduction <add>, %501, %cst_184 [1] : vector<64x64xf32> to vector<64xf32>
    %503 = vector.shape_cast %502 : vector<64xf32> to vector<64x1xf32>
    %cst_185 = arith.constant 6.400000e+01 : f32
    %504 = vector.broadcast %cst_185 : f32 to vector<64x1xf32>
    %505 = arith.divf %503, %504 : vector<64x1xf32>
    %506 = vector.broadcast %498 : vector<64x1xf32> to vector<64x64xf32>
    %507 = arith.subf %490, %506 : vector<64x64xf32>
    %cst_186 = arith.constant 9.99999974E-6 : f32
    %508 = vector.broadcast %cst_186 : f32 to vector<64x1xf32>
    %509 = arith.addf %505, %508 : vector<64x1xf32>
    %510 = math.rsqrt %509 : vector<64x1xf32>
    %511 = vector.broadcast %510 : vector<64x1xf32> to vector<64x64xf32>
    %512 = arith.mulf %507, %511 : vector<64x64xf32>
    %513 = vector.broadcast %492 : vector<1x64xf32> to vector<64x64xf32>
    %514 = arith.mulf %512, %513 : vector<64x64xf32>
    %515 = vector.broadcast %494 : vector<1x64xf32> to vector<64x64xf32>
    %516 = arith.addf %514, %515 : vector<64x64xf32>
    %517 = arith.truncf %516 : vector<64x64xf32> to vector<64x64xbf16>
    %c1_187 = arith.constant 1 : index
    %c0_188 = arith.constant 0 : index
    %c0_189 = arith.constant 0 : index
    %518 = vector.load %arg14[%c1_187, %c0_188, %c0_189] : memref<2x64x128xbf16, #tpu.memory_space<vmem>>, vector<1x64x128xbf16>
    %519 = vector.shape_cast %518 : vector<1x64x128xbf16> to vector<64x128xbf16>
    %cst_190 = arith.constant dense<0.000000e+00> : vector<64x128xf32>
    %520 = tpu.matmul %517, %519, %cst_190 {dimension_numbers = #tpu.dot_dimension_numbers<[1], [0], [0], [1], [0, 0, 1, 1], [], []>} : vector<64x64xbf16>, vector<64x128xbf16>, vector<64x128xf32> -> vector<64x128xf32>
    %c1_191 = arith.constant 1 : index
    %c0_192 = arith.constant 0 : index
    %c0_193 = arith.constant 0 : index
    %521 = vector.load %arg15[%c1_191, %c0_192, %c0_193] : memref<2x1x128xf32, #tpu.memory_space<vmem>>, vector<1x1x128xf32>
    %522 = vector.shape_cast %521 : vector<1x1x128xf32> to vector<1x128xf32>
    %523 = vector.broadcast %522 : vector<1x128xf32> to vector<64x128xf32>
    %524 = arith.addf %520, %523 : vector<64x128xf32>
    %cst_194 = arith.constant 5.000000e-01 : f32
    %525 = vector.broadcast %cst_194 : f32 to vector<64x128xf32>
    %526 = arith.mulf %525, %524 : vector<64x128xf32>
    %cst_195 = arith.constant 0.707106769 : f32
    %527 = vector.broadcast %cst_195 : f32 to vector<64x128xf32>
    %528 = arith.mulf %524, %527 : vector<64x128xf32>
    %529 = math.erf %528 : vector<64x128xf32>
    %cst_196 = arith.constant 1.000000e+00 : f32
    %530 = vector.broadcast %cst_196 : f32 to vector<64x128xf32>
    %531 = arith.addf %530, %529 : vector<64x128xf32>
    %532 = arith.mulf %526, %531 : vector<64x128xf32>
    %533 = arith.truncf %532 : vector<64x128xf32> to vector<64x128xbf16>
    %c1_197 = arith.constant 1 : index
    %c0_198 = arith.constant 0 : index
    %c0_199 = arith.constant 0 : index
    %534 = vector.load %arg16[%c1_197, %c0_198, %c0_199] : memref<2x128x64xbf16, #tpu.memory_space<vmem>>, vector<1x128x64xbf16>
    %535 = vector.shape_cast %534 : vector<1x128x64xbf16> to vector<128x64xbf16>
    %cst_200 = arith.constant dense<0.000000e+00> : vector<64x64xf32>
    %536 = tpu.matmul %533, %535, %cst_200 {dimension_numbers = #tpu.dot_dimension_numbers<[1], [0], [0], [1], [0, 0, 1, 1], [], []>} : vector<64x128xbf16>, vector<128x64xbf16>, vector<64x64xf32> -> vector<64x64xf32>
    %c1_201 = arith.constant 1 : index
    %c0_202 = arith.constant 0 : index
    %c0_203 = arith.constant 0 : index
    %537 = vector.load %arg17[%c1_201, %c0_202, %c0_203] : memref<2x1x64xf32, #tpu.memory_space<vmem>>, vector<1x1x64xf32>
    %538 = vector.shape_cast %537 : vector<1x1x64xf32> to vector<1x64xf32>
    %539 = vector.broadcast %538 : vector<1x64xf32> to vector<64x64xf32>
    %540 = arith.addf %536, %539 : vector<64x64xf32>
    %541 = arith.addf %490, %540 : vector<64x64xf32>
    %542 = vector.extract_strided_slice %541 {offsets = [0, 0], sizes = [1, 64], strides = [1, 1]} : vector<64x64xf32> to vector<1x64xf32>
    %543 = vector.extract_strided_slice %541 {offsets = [32, 0], sizes = [1, 64], strides = [1, 1]} : vector<64x64xf32> to vector<1x64xf32>
    %544 = tpu.concatenate %542, %543 in 0 : vector<1x64xf32>, vector<1x64xf32> -> vector<2x64xf32>
    %c0_204 = arith.constant 0 : index
    %c0_205 = arith.constant 0 : index
    %545 = vector.load %arg18[%c0_204, %c0_205] : memref<1x64xf32, #tpu.memory_space<vmem>>, vector<1x64xf32>
    %c0_206 = arith.constant 0 : index
    %c0_207 = arith.constant 0 : index
    %546 = vector.load %arg19[%c0_206, %c0_207] : memref<1x64xf32, #tpu.memory_space<vmem>>, vector<1x64xf32>
    %cst_208 = arith.constant dense<0.000000e+00> : vector<2xf32>
    %547 = vector.multi_reduction <add>, %544, %cst_208 [1] : vector<2x64xf32> to vector<2xf32>
    %548 = vector.shape_cast %547 : vector<2xf32> to vector<2x1xf32>
    %cst_209 = arith.constant 6.400000e+01 : f32
    %549 = vector.broadcast %cst_209 : f32 to vector<2x1xf32>
    %550 = arith.divf %548, %549 : vector<2x1xf32>
    %551 = vector.broadcast %550 : vector<2x1xf32> to vector<2x64xf32>
    %552 = arith.subf %544, %551 : vector<2x64xf32>
    %553 = arith.mulf %552, %552 : vector<2x64xf32>
    %cst_210 = arith.constant dense<0.000000e+00> : vector<2xf32>
    %554 = vector.multi_reduction <add>, %553, %cst_210 [1] : vector<2x64xf32> to vector<2xf32>
    %555 = vector.shape_cast %554 : vector<2xf32> to vector<2x1xf32>
    %cst_211 = arith.constant 6.400000e+01 : f32
    %556 = vector.broadcast %cst_211 : f32 to vector<2x1xf32>
    %557 = arith.divf %555, %556 : vector<2x1xf32>
    %558 = vector.broadcast %550 : vector<2x1xf32> to vector<2x64xf32>
    %559 = arith.subf %544, %558 : vector<2x64xf32>
    %cst_212 = arith.constant 9.99999974E-6 : f32
    %560 = vector.broadcast %cst_212 : f32 to vector<2x1xf32>
    %561 = arith.addf %557, %560 : vector<2x1xf32>
    %562 = math.rsqrt %561 : vector<2x1xf32>
    %563 = vector.broadcast %562 : vector<2x1xf32> to vector<2x64xf32>
    %564 = arith.mulf %559, %563 : vector<2x64xf32>
    %565 = vector.broadcast %545 : vector<1x64xf32> to vector<2x64xf32>
    %566 = arith.mulf %564, %565 : vector<2x64xf32>
    %567 = vector.broadcast %546 : vector<1x64xf32> to vector<2x64xf32>
    %568 = arith.addf %566, %567 : vector<2x64xf32>
    %c0_213 = arith.constant 0 : index
    %c0_214 = arith.constant 0 : index
    %c0_215 = arith.constant 0 : index
    %569 = vector.load %arg20[%c0_213, %c0_214, %c0_215] : memref<1x2x64xf32, #tpu.memory_space<vmem>>, vector<1x2x64xf32>
    %570 = vector.shape_cast %569 : vector<1x2x64xf32> to vector<2x64xf32>
    %571 = vector.shape_cast %568 : vector<2x64xf32> to vector<1x2x64xf32>
    tpu.vector_store %arg20[%c0_213, %c0_214, %c0_215], %571 {strides = array<i32>} : memref<1x2x64xf32, #tpu.memory_space<vmem>>, vector<1x2x64xf32>,
    return
  }
  func.func @transform_0(%arg0: i32) -> (i32, i32) {
    %c0_i32 = arith.constant 0 : i32
    %c0_i32_0 = arith.constant 0 : i32
    return %arg0, %c0_i32 : i32, i32
  }
  func.func @transform_1(%arg0: i32) -> (i32, i32) {
    %c0_i32 = arith.constant 0 : i32
    %c0_i32_0 = arith.constant 0 : i32
    return %arg0, %c0_i32 : i32, i32
  }
  func.func @transform_2(%arg0: i32) -> (i32, i32) {
    %c0_i32 = arith.constant 0 : i32
    %c0_i32_0 = arith.constant 0 : i32
    %c0_i32_1 = arith.constant 0 : i32
    return %c0_i32, %c0_i32_0 : i32, i32
  }
  func.func @transform_3(%arg0: i32) -> (i32, i32) {
    %c0_i32 = arith.constant 0 : i32
    %c0_i32_0 = arith.constant 0 : i32
    %c0_i32_1 = arith.constant 0 : i32
    return %c0_i32, %c0_i32_0 : i32, i32
  }
  func.func @transform_4(%arg0: i32) -> (i32, i32, i32) {
    %c0_i32 = arith.constant 0 : i32
    %c0_i32_0 = arith.constant 0 : i32
    %c0_i32_1 = arith.constant 0 : i32
    %c0_i32_2 = arith.constant 0 : i32
    return %c0_i32, %c0_i32_0, %c0_i32_1 : i32, i32, i32
  }
  func.func @transform_5(%arg0: i32) -> (i32, i32, i32) {
    %c0_i32 = arith.constant 0 : i32
    %c0_i32_0 = arith.constant 0 : i32
    %c0_i32_1 = arith.constant 0 : i32
    %c0_i32_2 = arith.constant 0 : i32
    return %c0_i32, %c0_i32_0, %c0_i32_1 : i32, i32, i32
  }
  func.func @transform_6(%arg0: i32) -> (i32, i32, i32) {
    %c0_i32 = arith.constant 0 : i32
    %c0_i32_0 = arith.constant 0 : i32
    %c0_i32_1 = arith.constant 0 : i32
    %c0_i32_2 = arith.constant 0 : i32
    return %c0_i32, %c0_i32_0, %c0_i32_1 : i32, i32, i32
  }
  func.func @transform_7(%arg0: i32) -> (i32, i32, i32) {
    %c0_i32 = arith.constant 0 : i32
    %c0_i32_0 = arith.constant 0 : i32
    %c0_i32_1 = arith.constant 0 : i32
    %c0_i32_2 = arith.constant 0 : i32
    return %c0_i32, %c0_i32_0, %c0_i32_1 : i32, i32, i32
  }
  func.func @transform_8(%arg0: i32) -> (i32, i32, i32) {
    %c0_i32 = arith.constant 0 : i32
    %c0_i32_0 = arith.constant 0 : i32
    %c0_i32_1 = arith.constant 0 : i32
    %c0_i32_2 = arith.constant 0 : i32
    return %c0_i32, %c0_i32_0, %c0_i32_1 : i32, i32, i32
  }
  func.func @transform_9(%arg0: i32) -> (i32, i32, i32) {
    %c0_i32 = arith.constant 0 : i32
    %c0_i32_0 = arith.constant 0 : i32
    %c0_i32_1 = arith.constant 0 : i32
    %c0_i32_2 = arith.constant 0 : i32
    return %c0_i32, %c0_i32_0, %c0_i32_1 : i32, i32, i32
  }
  func.func @transform_10(%arg0: i32) -> (i32, i32, i32) {
    %c0_i32 = arith.constant 0 : i32
    %c0_i32_0 = arith.constant 0 : i32
    %c0_i32_1 = arith.constant 0 : i32
    %c0_i32_2 = arith.constant 0 : i32
    return %c0_i32, %c0_i32_0, %c0_i32_1 : i32, i32, i32
  }
  func.func @transform_11(%arg0: i32) -> (i32, i32, i32) {
    %c0_i32 = arith.constant 0 : i32
    %c0_i32_0 = arith.constant 0 : i32
    %c0_i32_1 = arith.constant 0 : i32
    %c0_i32_2 = arith.constant 0 : i32
    return %c0_i32, %c0_i32_0, %c0_i32_1 : i32, i32, i32
  }
  func.func @transform_12(%arg0: i32) -> (i32, i32, i32) {
    %c0_i32 = arith.constant 0 : i32
    %c0_i32_0 = arith.constant 0 : i32
    %c0_i32_1 = arith.constant 0 : i32
    %c0_i32_2 = arith.constant 0 : i32
    return %c0_i32, %c0_i32_0, %c0_i32_1 : i32, i32, i32
  }
  func.func @transform_13(%arg0: i32) -> (i32, i32, i32) {
    %c0_i32 = arith.constant 0 : i32
    %c0_i32_0 = arith.constant 0 : i32
    %c0_i32_1 = arith.constant 0 : i32
    %c0_i32_2 = arith.constant 0 : i32
    return %c0_i32, %c0_i32_0, %c0_i32_1 : i32, i32, i32
  }
  func.func @transform_14(%arg0: i32) -> (i32, i32, i32) {
    %c0_i32 = arith.constant 0 : i32
    %c0_i32_0 = arith.constant 0 : i32
    %c0_i32_1 = arith.constant 0 : i32
    %c0_i32_2 = arith.constant 0 : i32
    return %c0_i32, %c0_i32_0, %c0_i32_1 : i32, i32, i32
  }
  func.func @transform_15(%arg0: i32) -> (i32, i32, i32) {
    %c0_i32 = arith.constant 0 : i32
    %c0_i32_0 = arith.constant 0 : i32
    %c0_i32_1 = arith.constant 0 : i32
    %c0_i32_2 = arith.constant 0 : i32
    return %c0_i32, %c0_i32_0, %c0_i32_1 : i32, i32, i32
  }
  func.func @transform_16(%arg0: i32) -> (i32, i32, i32) {
    %c0_i32 = arith.constant 0 : i32
    %c0_i32_0 = arith.constant 0 : i32
    %c0_i32_1 = arith.constant 0 : i32
    %c0_i32_2 = arith.constant 0 : i32
    return %c0_i32, %c0_i32_0, %c0_i32_1 : i32, i32, i32
  }
  func.func @transform_17(%arg0: i32) -> (i32, i32) {
    %c0_i32 = arith.constant 0 : i32
    %c0_i32_0 = arith.constant 0 : i32
    %c0_i32_1 = arith.constant 0 : i32
    return %c0_i32, %c0_i32_0 : i32, i32
  }
  func.func @transform_18(%arg0: i32) -> (i32, i32) {
    %c0_i32 = arith.constant 0 : i32
    %c0_i32_0 = arith.constant 0 : i32
    %c0_i32_1 = arith.constant 0 : i32
    return %c0_i32, %c0_i32_0 : i32, i32
  }
  func.func @transform_19(%arg0: i32) -> (i32, i32, i32) {
    %c0_i32 = arith.constant 0 : i32
    %c0_i32_0 = arith.constant 0 : i32
    %c0_i32_1 = arith.constant 0 : i32
    return %arg0, %c0_i32, %c0_i32_0 : i32, i32, i32
  }
}

</mosaic_0001>

<bundles_post_ra>
// kernel: vit_face_forward.1
= control target key start
LH: loop header
LB: loop body
LE: loop exit
PB: predicated region body
PF: predicated region fallthrough
CT: control target
= control target key end

     0   :  { %s9812_s0 = inlined_call_operand.vmem [shape: bf16[64,512], index: 0, kind: input, shape index: {}]   ;;  %s9813_s1 = inlined_call_operand.vmem [shape: f32[64,64], index: 1, kind: input, shape index: {}]   ;;  %s9814_s2 = inlined_call_operand.vmem [shape: f32[32,32], index: 2, kind: input, shape index: {}]   ;;  %s9815_s3 = inlined_call_operand.vmem [shape: bf16[512,64], index: 3, kind: input, shape index: {}]   ;;  %s9816_s4 = inlined_call_operand.vmem [shape: f32[2,1,64], index: 4, kind: input, shape index: {}]   ;;  %s9817_s5 = inlined_call_operand.vmem [shape: f32[2,1,64], index: 5, kind: input, shape index: {}]   ;;  %s9818_s6 = inlined_call_operand.vmem [shape: bf16[2,64,64], index: 6, kind: input, shape index: {}]   ;;  %s9819_s7 = inlined_call_operand.vmem [shape: bf16[2,64,64], index: 7, kind: input, shape index: {}]   ;;  %s9820_s8 = inlined_call_operand.vmem [shape: bf16[2,64,64], index: 8, kind: input, shape index: {}]   ;;  %s9821_s9 = inlined_call_operand.vmem [shape: bf16[2,64,64], index: 9, kind: input, shape index: {}]   ;;  %s9822_s10 = inlined_call_operand.vmem [shape: f32[2,1,64], index: 10, kind: input, shape index: {}]   ;;  %s9823_s11 = inlined_call_operand.vmem [shape: f32[2,1,64], index: 11, kind: input, shape index: {}]   ;;  %s9824_s12 = inlined_call_operand.vmem [shape: f32[2,1,64], index: 12, kind: input, shape index: {}]   ;;  %s9825_s13 = inlined_call_operand.vmem [shape: bf16[2,64,128], index: 13, kind: input, shape index: {}]   ;;  %s9826_s14 = inlined_call_operand.vmem [shape: f32[2,1,128], index: 14, kind: input, shape index: {}]   ;;  %s9827_s15 = inlined_call_operand.vmem [shape: bf16[2,128,64], index: 15, kind: input, shape index: {}]   ;;  %s9828_s16 = inlined_call_operand.vmem [shape: f32[2,1,64], index: 16, kind: input, shape index: {}]   ;;  %s9829_s17 = inlined_call_operand.vmem [shape: f32[1,64], index: 17, kind: input, shape index: {}]   ;;  %s9830_s18 = inlined_call_operand.vmem [shape: f32[1,64], index: 18, kind: input, shape index: {}]   ;;  %s9831_s19 = inlined_call_operand.hbm [shape: f32[1,2,64], index: 19, kind: output, shape index: {}]  }
   0x1   :  { %9836 = sst [smem:[#allocation5_spill]] %s9812_s0 }
   0x2   :  { %9837 = sst [smem:[#allocation6_spill]] %s9813_s1 }
   0x3   :  { %9838 = sst [smem:[#allocation7_spill]] %s9814_s2 }
   0x4   :  { %9839 = sst [smem:[#allocation8_spill]] %s9815_s3 }
   0x5   :  { %s9840_s20 = sld [smem:[#allocation8_spill]] }
   0x6   :  { %s9841_s26 = sld [smem:[#allocation5_spill]] }
   0xb   :  { %v7460_v0 = vld [vmem:[%s9840_s20 + $0x78] sm:$0xff]   ;;  %v7464_v4 = vld [vmem:[%s9840_s20 + $0x70] sm:$0xff]   ;;  %v7468_v8 = vld [vmem:[%s9840_s20 + $0x68] sm:$0xff]  }
   0xc   :  { %v7461_v1 = vld [vmem:[%s9840_s20 + $0xf8] sm:$0xff]   ;;  %6552 = vmatprep.subr.bf16.mxu0 %v7460_v0  ;;  %v7465_v5 = vld [vmem:[%s9840_s20 + $0xf0] sm:$0xff]   ;;  %v7469_v9 = vld [vmem:[%s9840_s20 + $0xe8] sm:$0xff]  }
   0xd   :  { %v7462_v2 = vld [vmem:[%s9840_s20 + $0x38] sm:$0xff]   ;;  %6592 = vmatprep.subr.bf16.mxu1 %v7461_v1  ;;  %v7466_v6 = vld [vmem:[%s9840_s20 + $0x30] sm:$0xff]   ;;  %v7470_v10 = vld [vmem:[%s9840_s20 + $0x28] sm:$0xff]  }
   0xe   :  { %v7463_v3 = vld [vmem:[%s9840_s20 + $0xb8] sm:$0xff]   ;;  %6553 = vmatpush3.bf16.msra.mxu0 %v7462_v2  ;;  %v7467_v7 = vld [vmem:[%s9840_s20 + $0xb0] sm:$0xff]   ;;  %v7471_v11 = vld [vmem:[%s9840_s20 + $0xa8] sm:$0xff]  }
   0xf   :  { %6593 = vmatpush3.bf16.msra.mxu1 %v7463_v3  ;;  %6554 = vmatprep.subr.bf16.mxu0 %v7464_v4  ;;  %v7472_v12 = vld [vmem:[%s9840_s20 + $0x60] sm:$0xff]   ;;  %v7476_v16 = vld [vmem:[%s9840_s20 + $0x58] sm:$0xff]   ;;  %v7480_v20 = vld [vmem:[%s9840_s20 + $0x50] sm:$0xff]  }
  0x10   :  { %6594 = vmatprep.subr.bf16.mxu1 %v7465_v5  ;;  %v7473_v13 = vld [vmem:[%s9840_s20 + $0xe0] sm:$0xff]   ;;  %v7477_v17 = vld [vmem:[%s9840_s20 + $0xd8] sm:$0xff]   ;;  %v7481_v21 = vld [vmem:[%s9840_s20 + $0xd0] sm:$0xff]  }
  0x11   :  { %v7474_v14 = vld [vmem:[%s9840_s20 + $0x20] sm:$0xff]   ;;  %v7478_v18 = vld [vmem:[%s9840_s20 + $0x18] sm:$0xff]   ;;  %v7482_v22 = vld [vmem:[%s9840_s20 + $0x10] sm:$0xff]  }
  0x12   :  { %6555 = vmatpush3.bf16.msra.mxu0 %v7466_v6  ;;  %v7475_v15 = vld [vmem:[%s9840_s20 + $0xa0] sm:$0xff]   ;;  %v7479_v19 = vld [vmem:[%s9840_s20 + $0x98] sm:$0xff]   ;;  %v7483_v23 = vld [vmem:[%s9840_s20 + $0x90] sm:$0xff]  }
  0x13   :  { %6595 = vmatpush3.bf16.msra.mxu1 %v7467_v7  ;;  %6556 = vmatprep.subr.bf16.mxu0 %v7468_v8  ;;  %v7484_v24 = vld [vmem:[%s9840_s20 + $0x48] sm:$0xff]   ;;  %v7488_v28 = vld [vmem:[%s9840_s20 + $0x40] sm:$0xff]  }
  0x14   :  { %6596 = vmatprep.subr.bf16.mxu1 %v7469_v9  ;;  %v7485_v25 = vld [vmem:[%s9840_s20 + $0xc8] sm:$0xff]   ;;  %v7489_v29 = vld [vmem:[%s9840_s20 + $0xc0] sm:$0xff]  }
  0x15   :  { %v7486_v26 = vld [vmem:[%s9840_s20 + $0x8] sm:$0xff]   ;;  %v7490_v30 = vld [vmem:[%s9840_s20] sm:$0xff]  }
  0x16   :  { %6557 = vmatpush3.bf16.msra.mxu0 %v7470_v10  ;;  %v7487_v27 = vld [vmem:[%s9840_s20 + $0x88] sm:$0xff]   ;;  %v7491_v31 = vld [vmem:[%s9840_s20 + $0x80] sm:$0xff]  }
  0x17   :  { %6597 = vmatpush3.bf16.msra.mxu1 %v7471_v11  ;;  %6558 = vmatprep.subr.bf16.mxu0 %v7472_v12  ;;  %v7492_v32 = vld [vmem:[%s9841_s26] ss:$16 sps:$4 sm:$0xff]   ;;  %v7494_v33 = vld [vmem:[%s9841_s26 + $0x4] ss:$16 sps:$4 sm:$0xff]   ;;  %v7495_v34 = vld [vmem:[%s9841_s26 + $0x8] ss:$16 sps:$4 sm:$0xff]  }
  0x18   :  { %6598 = vmatprep.subr.bf16.mxu1 %v7473_v13  ;;  %v7497_v35 = vld [vmem:[%s9841_s26 + $0xc] ss:$16 sps:$4 sm:$0xff]   ;;  %456 = vmatprep.mubr.bf16.mxu0 %v7494_v33  ;;  %v7498_v36 = vld [vmem:[%s9841_s26 + $0x24] ss:$16 sps:$4 sm:$0xff]   ;;  %v7502_v38 = vld [vmem:[%s9841_s26 + $0x20] ss:$16 sps:$4 sm:$0xff]  }
  0x19   :  { %521 = vmatprep.mubr.bf16.mxu1 %v7497_v35  ;;  %v7500_v37 = vld [vmem:[%s9841_s26 + $0x2c] ss:$16 sps:$4 sm:$0xff]   ;;  %v7503_v39 = vld [vmem:[%s9841_s26 + $0x28] ss:$16 sps:$4 sm:$0xff]   ;;  %v7504_v40 = vld [vmem:[%s9841_s26 + $0x44] ss:$16 sps:$4 sm:$0xff]  }
  0x1a   :  { %6559 = vmatpush3.bf16.msra.mxu0 %v7474_v14  ;;  %v7507_v41 = vld [vmem:[%s9841_s26 + $0x4c] ss:$16 sps:$4 sm:$0xff]   ;;  %v7506_v42 = vld [vmem:[%s9841_s26 + $0x40] ss:$16 sps:$4 sm:$0xff]   ;;  %v7509_v43 = vld [vmem:[%s9841_s26 + $0x48] ss:$16 sps:$4 sm:$0xff]  }
  0x1b   :  { %6599 = vmatpush3.bf16.msra.mxu1 %v7475_v15  ;;  %6560 = vmatprep.subr.bf16.mxu0 %v7476_v16  ;;  %v7510_v44 = vld [vmem:[%s9841_s26 + $0x64] ss:$16 sps:$4 sm:$0xff]   ;;  %v7513_v45 = vld [vmem:[%s9841_s26 + $0x6c] ss:$16 sps:$4 sm:$0xff]   ;;  %v7512_v46 = vld [vmem:[%s9841_s26 + $0x60] ss:$16 sps:$4 sm:$0xff]  }
  0x1c   :  { %6600 = vmatprep.subr.bf16.mxu1 %v7477_v17  ;;  %v7515_v47 = vld [vmem:[%s9841_s26 + $0x68] ss:$16 sps:$4 sm:$0xff]  }
  0x1e   :  { %6561 = vmatpush3.bf16.msra.mxu0 %v7478_v18 }
  0x1f   :  { %6601 = vmatpush3.bf16.msra.mxu1 %v7479_v19  ;;  %6562 = vmatprep.subr.bf16.mxu0 %v7480_v20 }
  0x20   :  { %6602 = vmatprep.subr.bf16.mxu1 %v7481_v21 }
  0x22   :  { %6563 = vmatpush3.bf16.msra.mxu0 %v7482_v22 }
  0x23   :  { %6603 = vmatpush3.bf16.msra.mxu1 %v7483_v23  ;;  %6564 = vmatprep.subr.bf16.mxu0 %v7484_v24 }
  0x24   :  { %6604 = vmatprep.subr.bf16.mxu1 %v7485_v25 }
  0x26   :  { %6565 = vmatpush3.bf16.msra.mxu0 %v7486_v26 }
  0x27   :  { %6605 = vmatpush3.bf16.msra.mxu1 %v7487_v27  ;;  %6566 = vmatprep.subr.bf16.mxu0 %v7488_v28 }
  0x28   :  { %6606 = vmatprep.subr.bf16.mxu1 %v7489_v29 }
  0x2a   :  { %6567 = vmatpush3.bf16.msra.mxu0 %v7490_v30 }
  0x2b   :  { %6607 = vmatpush3.bf16.msra.mxu1 %v7491_v31 }
  0x2d   :  { %457 = vmatmul.mubr.bf16.vlgmr.msra.gmra.mxu0 %v7492_v32 }
  0x2e   :  { %522 = vmatmul.mubr.bf16.vlgmr.msra.gmra.mxu1 %v7495_v34  ;;  %464 = vmatprep.mubr.bf16.mxu0 %v7498_v36 }
  0x2f   :  { %529 = vmatprep.mubr.bf16.mxu1 %v7500_v37 }
  0x35   :  { %465 = vmatmul.mubr.bf16.gmra.mxu0 %v7502_v38 }
  0x36   :  { %530 = vmatmul.mubr.bf16.gmra.mxu1 %v7503_v39  ;;  %472 = vmatprep.mubr.bf16.mxu0 %v7504_v40 }
  0x37   :  { %537 = vmatprep.mubr.bf16.mxu1 %v7507_v41 }
  0x3d   :  { %473 = vmatmul.mubr.bf16.gmra.mxu0 %v7506_v42 }
  0x3e   :  { %538 = vmatmul.mubr.bf16.gmra.mxu1 %v7509_v43  ;;  %480 = vmatprep.mubr.bf16.mxu0 %v7510_v44 }
  0x3f   :  { %545 = vmatprep.mubr.bf16.mxu1 %v7513_v45 }
  0x45   :  { %481 = vmatmul.mubr.bf16.gmra.mxu0 %v7512_v46 }
  0x46   :  { %546 = vmatmul.mubr.bf16.gmra.mxu1 %v7515_v47 }
  0x47   :  { %24 = vsyncpa [#allocation3], 0  ;;  %s9842_s30 = sld [smem:[#allocation6_spill]]  ;;  %vm560_vm0 = vcmask 523264   ;;  %vm1021_vm1 = vcmask 130048   ;;  %s7960_s29 = smov 112  }
  0x48   :  { %s9843_s21 = sld [smem:[#allocation7_spill]]  ;;  %vm1083_vm2 = vcmask 261120   ;;  %s7961_s3 = smov 96   ;;  %vm6194_vm3 = vcmask 1040384   ;;  %vm6198_vm4 = vcmask 517120  }
  0x49   :  { %s7962_s27 = smov 80  }
  0x4d   :  { %v144_v50 = vld [vmem:[%s9842_s30] sm:$0xff]  ;;  %v145_v58 = vld [vmem:[%s9842_s30 + $0x8] sm:$0xff]  ;;  %v146_v4 = vld [vmem:[%s9842_s30 + $0x10] sm:$0xff] }
  0x4e   :  { %v147_v14 = vld [vmem:[%s9842_s30 + $0x18] sm:$0xff]  ;;  %v148_v41 = vld [vmem:[%s9842_s30 + $0x20] sm:$0xff] }
  0xed   :  { %v6568_v48 = vpop.f32.mrf.mxu0 }
  0xee   :  { %v6608_v49 = vpop.f32.mrf.mxu1 }
  0xef   :  { %v6569_v51 = vpop.f32.mrf.mxu0 }
  0xf0   :  { %v6570_v52 = vadd.f32 %v6569_v51, %v6568_v48  ;;  %v6609_v53 = vpop.f32.mrf.mxu1 }
  0xf1   :  { %v6571_v54 = vpop.f32.mrf.mxu0  ;;  %v6610_v56 = vadd.f32 %v6609_v53, %v6608_v49  ;;  %v149_v53 = vld [vmem:[%s9842_s30 + $0x28] sm:$0xff] }
  0xf2   :  { %v459_v55 = vadd.f32 %v6570_v52, %v144_v50  ;;  %v6611_v57 = vpop.f32.mrf.mxu1 }
  0xf3   :  { %v6572_v59 = vpop.f32.mrf.mxu0 }
  0xf4   :  { %v8214_v60 = vadd.f32 %v6610_v56, %v459_v55  ;;  %v6573_v61 = vadd.f32 %v6572_v59, %v6571_v54  ;;  %v6612_v62 = vpop.f32.mrf.mxu1  ;;  %v150_v55 = vld [vmem:[%s9842_s30 + $0x30] sm:$0xff] }
  0xf5   :  { %v6574_v63 = vpop.f32.mrf.mxu0  ;;  %v6613_v1 = vadd.f32 %v6612_v62, %v6611_v57 }
  0xf6   :  { %v462_v0 = vadd.f32 %v6573_v61, %v145_v58  ;;  %v6614_v2 = vpop.f32.mrf.mxu1  ;;  %v561_v3 = vsel %vm560_vm0, %v8214_v60, 0.0 }
  0xf7   :  { %v6575_v5 = vpop.f32.mrf.mxu0  ;;  %562 = vadd.xlane.f32.xlu0 %v561_v3 }
  0xf8   :  { %v8221_v6 = vadd.f32 %v6613_v1, %v462_v0  ;;  %v6576_v7 = vadd.f32 %v6575_v5, %v6574_v63  ;;  %v6615_v8 = vpop.f32.mrf.mxu1 }
  0xf9   :  { %v6577_v9 = vpop.f32.mrf.mxu0  ;;  %v6616_v11 = vadd.f32 %v6615_v8, %v6614_v2 }
  0xfa   :  { %v467_v10 = vadd.f32 %v6576_v7, %v146_v4  ;;  %v6617_v12 = vpop.f32.mrf.mxu1  ;;  %v564_v13 = vsel %vm560_vm0, %v8221_v6, 0.0  ;;  %v151_v7 = vld [vmem:[%s9842_s30 + $0x38] sm:$0xff] }
  0xfb   :  { %v6578_v15 = vpop.f32.mrf.mxu0  ;;  %565 = vadd.xlane.f32.xlu0 %v564_v13 }
  0xfc   :  { %v8228_v16 = vadd.f32 %v6616_v11, %v467_v10  ;;  %v6579_v17 = vadd.f32 %v6578_v15, %v6577_v9  ;;  %v6618_v18 = vpop.f32.mrf.mxu1 }
  0xfd   :  { %v6619_v20 = vadd.f32 %v6618_v18, %v6617_v12  ;;  %v6580_v24 = vpop.f32.mrf.mxu0 }
  0xfe   :  { %v470_v19 = vadd.f32 %v6579_v17, %v147_v14  ;;  %v567_v21 = vsel %vm560_vm0, %v8228_v16, 0.0  ;;  %v6620_v26 = vpop.f32.mrf.mxu1 }
  0xff   :  { %568 = vadd.xlane.f32.xlu1 %v567_v21  ;;  %v6581_v25 = vpop.f32.mrf.mxu0 }
 0x100   :  { %v8232_v22 = vadd.f32 %v6619_v20, %v470_v19  ;;  %v6621_v28 = vpop.f32.mrf.mxu1  ;;  %v6582_v39 = vadd.f32 %v6581_v25, %v6580_v24  ;;  %v7516_v24 = vld [vmem:[%s9819_s7 + $0x18] sm:$0xff]  }
 0x101   :  { %v6583_v27 = vpop.f32.mrf.mxu0  ;;  %v6622_v49 = vadd.f32 %v6621_v28, %v6620_v26  ;;  %6912 = vmatprep.subr.bf16.mxu1 %v7516_v24  ;;  %v7518_v25 = vld [vmem:[%s9818_s6 + $0x18] sm:$0xff]   ;;  %v7517_v26 = vld [vmem:[%s9819_s7 + $0x10] sm:$0xff]   ;;  %v7519_v28 = vld [vmem:[%s9819_s7 + $0x8] sm:$0xff]  }
 0x102   :  { %v570_v23 = vsel %vm560_vm0, %v8232_v22, 0.0  ;;  %v6623_v30 = vpop.f32.mrf.mxu1  ;;  %v475_v47 = vadd.f32 %v6582_v39, %v148_v41  ;;  %6913 = vmatpush3.bf16.msra.mxu1 %v7516_v24  ;;  %6896 = vmatprep.subr.bf16.mxu0 %v7518_v25 }
 0x103   :  { %571 = vadd.xlane.f32.xlu1 %v570_v23  ;;  %v6584_v29 = vpop.f32.mrf.mxu0  ;;  %6897 = vmatpush3.bf16.msra.mxu0 %v7518_v25 }
 0x104   :  { %v6624_v32 = vpop.f32.mrf.mxu1  ;;  %v6585_v50 = vadd.f32 %v6584_v29, %v6583_v27  ;;  %v8260_v61 = vadd.f32 %v6622_v49, %v475_v47  ;;  %v7520_v27 = vld [vmem:[%s9818_s6 + $0x10] sm:$0xff]   ;;  %6914 = vmatprep.subr.bf16.mxu1 %v7517_v26  ;;  %v7521_v29 = vld [vmem:[%s9818_s6 + $0x8] sm:$0xff]  }
 0x105   :  { %v6586_v31 = vpop.f32.mrf.mxu0  ;;  %v6625_v0 = vadd.f32 %v6624_v32, %v6623_v30  ;;  %6898 = vmatprep.subr.bf16.mxu0 %v7520_v27  ;;  %v7522_v30 = vld [vmem:[%s9819_s7] sm:$0xff]  }
 0x106   :  { %v6626_v36 = vpop.f32.mrf.mxu1  ;;  %v478_v62 = vadd.f32 %v6585_v50, %v149_v53  ;;  %v573_v12 = vsel %vm560_vm0, %v8260_v61, 0.0  ;;  %6915 = vmatpush3.bf16.msra.mxu1 %v7517_v26 }
 0x107   :  { %v6587_v35 = vpop.f32.mrf.mxu0  ;;  %6899 = vmatpush3.bf16.msra.mxu0 %v7520_v27  ;;  %6916 = vmatprep.subr.bf16.mxu1 %v7519_v28 }
 0x108   :  { %v6627_v44 = vpop.f32.mrf.mxu1  ;;  %v6588_v51 = vadd.f32 %v6587_v35, %v6586_v31  ;;  %v8271_v11 = vadd.f32 %v6625_v0, %v478_v62  ;;  %6900 = vmatprep.subr.bf16.mxu0 %v7521_v29  ;;  %v7523_v31 = vld [vmem:[%s9818_s6] sm:$0xff]  }
 0x109   :  { %v6589_v43 = vpop.f32.mrf.mxu0  ;;  %v6628_v4 = vadd.f32 %v6627_v44, %v6626_v36 }
 0x10a   :  { %v6629_v57 = vpop.f32.mrf.mxu1  ;;  %v483_v1 = vadd.f32 %v6588_v51, %v150_v55  ;;  %v576_v21 = vsel %vm560_vm0, %v8271_v11, 0.0  ;;  %6917 = vmatpush3.bf16.msra.mxu1 %v7519_v28  ;;  %v8320_v55 = vld [vmem:[%s9816_s4] ss:$0 sm:$0xff] }
 0x10b   :  { %v6590_v56 = vpop.f32.mrf.mxu0  ;;  %6901 = vmatpush3.bf16.msra.mxu0 %v7521_v29  ;;  %6918 = vmatprep.subr.bf16.mxu1 %v7522_v30  ;;  %v7524_v29 = vld [vmem:[%s9820_s8 + $0x18] sm:$0xff]  }
 0x10c   :  { %v6591_v5 = vadd.f32 %v6590_v56, %v6589_v43  ;;  %v6630_v8 = vpop.f32.mrf.mxu1  ;;  %v8275_v13 = vadd.f32 %v6628_v4, %v483_v1  ;;  %6902 = vmatprep.subr.bf16.mxu0 %v7523_v31 }
 0x10d   :  { %v6631_v17 = vadd.f32 %v6630_v8, %v6629_v57 }
 0x10e   :  { %v486_v14 = vadd.f32 %v6591_v5, %v151_v7  ;;  %v579_v20 = vsel %vm560_vm0, %v8275_v13, 0.0  ;;  %6919 = vmatpush3.bf16.msra.mxu1 %v7522_v30  ;;  %v7526_v30 = vld [vmem:[%s9820_s8 + $0x8] sm:$0xff]  }
 0x10f   :  { %6903 = vmatpush3.bf16.msra.mxu0 %v7523_v31  ;;  %v7527_v31 = vld [vmem:[%s9820_s8] sm:$0xff]  }
 0x110   :  { %v8280_v19 = vadd.f32 %v6631_v17, %v486_v14  ;;  %6928 = vmatprep.subr.bf16.mxu0 %v7524_v29 }
 0x112   :  { %v582_v23 = vsel %vm560_vm0, %v8280_v19, 0.0 }
 0x180   :  { %v563_v33 = vpop.xlane.xlu0 %562 }
 0x181   :  { %v586_v34 = vmul.f32 0.015625, %v563_v33 }
 0x183   :  { %v8237_v37 = vsub.f32 %v8214_v60, %v586_v34 }
 0x184   :  { %v566_v38 = vpop.xlane.xlu0 %565 }
 0x185   :  { %v587_v40 = vmul.f32 0.015625, %v566_v38  ;;  %v602_v42 = vmul.f32 %v8237_v37, %v8237_v37 }
 0x187   :  { %v8245_v45 = vsub.f32 %v8221_v6, %v587_v40  ;;  %v610_v46 = vsel %vm560_vm0, %v602_v42, 0.0 }
 0x188   :  { %v569_v48 = vpop.xlane.xlu1 %568  ;;  %611 = vadd.xlane.f32.xlu0 %v610_v46 }
 0x189   :  { %v588_v52 = vmul.f32 0.015625, %v569_v48  ;;  %v603_v54 = vmul.f32 %v8245_v45, %v8245_v45 }
 0x18b   :  { %v8257_v58 = vsub.f32 %v8228_v16, %v588_v52  ;;  %v613_v59 = vsel %vm560_vm0, %v603_v54, 0.0 }
 0x18c   :  { %v572_v63 = vpop.xlane.xlu1 %571  ;;  %614 = vadd.xlane.f32.xlu1 %v613_v59 }
 0x18d   :  { %v589_v2 = vmul.f32 0.015625, %v572_v63  ;;  %v604_v3 = vmul.f32 %v8257_v58, %v8257_v58 }
 0x18f   :  { %v8268_v9 = vsub.f32 %v8232_v22, %v589_v2  ;;  %v616_v10 = vsel %vm560_vm0, %v604_v3, 0.0 }
 0x190   :  { %617 = vadd.xlane.f32.xlu0 %v616_v10  ;;  %v8344_v10 = vld [vmem:[%s9817_s5] ss:$0 sm:$0xff] }
 0x191   :  { %v605_v15 = vmul.f32 %v8268_v9, %v8268_v9 }
 0x193   :  { %v619_v18 = vsel %vm560_vm0, %v605_v15, 0.0 }
 0x194   :  { %574 = vadd.xlane.f32.xlu0 %v573_v12  ;;  %620 = vadd.xlane.f32.xlu1 %v619_v18 }
 0x198   :  { %580 = vadd.xlane.f32.xlu0 %v579_v20  ;;  %577 = vadd.xlane.f32.xlu1 %v576_v21 }
 0x19c   :  { %583 = vadd.xlane.f32.xlu1 %v582_v23 }
 0x211   :  { %v612_v32 = vpop.xlane.xlu0 %611 }
 0x212   :  { %v634_v33 = vmul.f32 0.015625, %v612_v32 }
 0x214   :  { %v642_v34 = vadd.f32 1e-05, %v634_v33 }
 0x215   :  { %v615_v35 = vpop.xlane.xlu1 %614 }
 0x216   :  { %7572 = vrsqrt.f32 %v642_v34  ;;  %v635_v36 = vmul.f32 0.015625, %v615_v35 }
 0x218   :  { %v643_v38 = vadd.f32 1e-05, %v635_v36 }
 0x219   :  { %v618_v39 = vpop.xlane.xlu0 %617 }
 0x21a   :  { %7574 = vrsqrt.f32 %v643_v38  ;;  %v636_v40 = vmul.f32 0.015625, %v618_v39 }
 0x21c   :  { %v644_v41 = vadd.f32 1e-05, %v636_v40 }
 0x21d   :  { %v621_v42 = vpop.xlane.xlu1 %620  ;;  %v575_v43 = vpop.xlane.xlu0 %574 }
 0x21e   :  { %7576 = vrsqrt.f32 %v644_v41  ;;  %v637_v44 = vmul.f32 0.015625, %v621_v42  ;;  %v590_v46 = vmul.f32 0.015625, %v575_v43 }
 0x220   :  { %v645_v47 = vadd.f32 1e-05, %v637_v44  ;;  %v8313_v48 = vsub.f32 %v8260_v61, %v590_v46 }
 0x221   :  { %v578_v49 = vpop.xlane.xlu1 %577  ;;  %v581_v50 = vpop.xlane.xlu0 %580 }
 0x222   :  { %7578 = vrsqrt.f32 %v645_v47  ;;  %v591_v51 = vmul.f32 0.015625, %v578_v49  ;;  %v592_v52 = vmul.f32 0.015625, %v581_v50  ;;  %v606_v53 = vmul.f32 %v8313_v48, %v8313_v48 }
 0x223   :  { %v7573_v54 = vpop.eup %7572 }
 0x224   :  { %v8323_v56 = vsub.f32 %v8271_v11, %v591_v51  ;;  %v8326_v57 = vsub.f32 %v8275_v13, %v592_v52  ;;  %v622_v59 = vsel %vm560_vm0, %v606_v53, 0.0  ;;  %v658_v62 = vmul.f32 %v7573_v54, %v8237_v37 }
 0x225   :  { %v584_v63 = vpop.xlane.xlu1 %583  ;;  %623 = vadd.xlane.f32.xlu0 %v622_v59 }
 0x226   :  { %v593_v0 = vmul.f32 0.015625, %v584_v63  ;;  %v607_v1 = vmul.f32 %v8323_v56, %v8323_v56  ;;  %v608_v2 = vmul.f32 %v8326_v57, %v8326_v57  ;;  %v672_v4 = vmul.f32 %v8320_v55, %v658_v62 }
 0x227   :  { %v7575_v3 = vpop.eup %7574 }
 0x228   :  { %v8336_v5 = vsub.f32 %v8280_v19, %v593_v0  ;;  %v625_v7 = vsel %vm560_vm0, %v607_v1, 0.0  ;;  %v628_v8 = vsel %vm560_vm0, %v608_v2, 0.0  ;;  %v659_v37 = vmul.f32 %v7575_v3, %v8245_v45 }
 0x229   :  { %626 = vadd.xlane.f32.xlu1 %v625_v7  ;;  %629 = vadd.xlane.f32.xlu0 %v628_v8  ;;  %v686_v20 = vadd.f32 %v8344_v10, %v672_v4 }
 0x22a   :  { %v609_v12 = vmul.f32 %v8336_v5, %v8336_v5  ;;  %v673_v14 = vmul.f32 %v8320_v55, %v659_v37 }
 0x22b   :  { %v7577_v15 = vpop.eup %7576 }
 0x22c   :  { %v660_v17 = vmul.f32 %v7577_v15, %v8257_v58  ;;  %v631_v18 = vsel %vm560_vm0, %v609_v12, 0.0  ;;  %v687_v45 = vadd.f32 %v8344_v10, %v673_v14 }
 0x22d   :  { %632 = vadd.xlane.f32.xlu1 %v631_v18 }
 0x22e   :  { %v694_v21 = vpack.c.bf16 %v687_v45, %v686_v20  ;;  %v674_v24 = vmul.f32 %v8320_v55, %v660_v17 }
 0x22f   :  { %v7579_v23 = vpop.eup %7578 }
 0x230   :  { %v661_v25 = vmul.f32 %v7579_v23, %v8268_v9  ;;  %6904 = vmatprep.mubr.msk.bf16.mxu0 %vm560_vm0, %v694_v21  ;;  %6920 = vmatprep.mubr.msk.bf16.mxu1 %vm560_vm0, %v694_v21  ;;  %v688_v58 = vadd.f32 %v8344_v10, %v674_v24  ;;  %v7525_v9 = vld [vmem:[%s9820_s8 + $0x10] sm:$0xff]  }
 0x232   :  { %v675_v26 = vmul.f32 %v8320_v55, %v661_v25 }
 0x234   :  { %v689_v27 = vadd.f32 %v8344_v10, %v675_v26 }
 0x236   :  { %v695_v28 = vpack.c.bf16 %v689_v27, %v688_v58 }
 0x238   :  { %6905 = vmatmul.mubr.msk.bf16.vlgmr.msra.gmra.mxu0 %vm560_vm0, %v695_v28  ;;  %6921 = vmatmul.mubr.msk.bf16.vlgmr.msra.gmra.mxu1 %vm560_vm0, %v695_v28 }
 0x239   :  { %6929 = vmatpush3.bf16.msra.mxu0 %v7524_v29 }
 0x23a   :  { %6930 = vmatprep.subr.bf16.mxu0 %v7525_v9 }
 0x23d   :  { %6931 = vmatpush3.bf16.msra.mxu0 %v7525_v9 }
 0x23e   :  { %6932 = vmatprep.subr.bf16.mxu0 %v7526_v30 }
 0x241   :  { %6933 = vmatpush3.bf16.msra.mxu0 %v7526_v30 }
 0x242   :  { %6934 = vmatprep.subr.bf16.mxu0 %v7527_v31 }
 0x245   :  { %6935 = vmatpush3.bf16.msra.mxu0 %v7527_v31 }
 0x2ae   :  { %v624_v32 = vpop.xlane.xlu0 %623 }
 0x2af   :  { %v638_v33 = vmul.f32 0.015625, %v624_v32 }
 0x2b1   :  { %v646_v34 = vadd.f32 1e-05, %v638_v33 }
 0x2b2   :  { %v627_v35 = vpop.xlane.xlu1 %626  ;;  %v630_v36 = vpop.xlane.xlu0 %629 }
 0x2b3   :  { %7580 = vrsqrt.f32 %v646_v34  ;;  %v639_v38 = vmul.f32 0.015625, %v627_v35  ;;  %v640_v39 = vmul.f32 0.015625, %v630_v36 }
 0x2b5   :  { %v647_v40 = vadd.f32 1e-05, %v639_v38  ;;  %v648_v41 = vadd.f32 1e-05, %v640_v39 }
 0x2b6   :  { %v633_v42 = vpop.xlane.xlu1 %632 }
 0x2b7   :  { %7582 = vrsqrt.f32 %v647_v40  ;;  %v641_v43 = vmul.f32 0.015625, %v633_v42 }
 0x2b8   :  { %7584 = vrsqrt.f32 %v648_v41 }
 0x2b9   :  { %v649_v44 = vadd.f32 1e-05, %v641_v43 }
 0x2bb   :  { %7586 = vrsqrt.f32 %v649_v44 }
 0x2c0   :  { %v7581_v46 = vpop.eup %7580 }
 0x2c1   :  { %v662_v47 = vmul.f32 %v7581_v46, %v8313_v48 }
 0x2c3   :  { %v676_v52 = vmul.f32 %v8320_v55, %v662_v47 }
 0x2c4   :  { %v7583_v49 = vpop.eup %7582 }
 0x2c5   :  { %v7585_v50 = vpop.eup %7584  ;;  %v663_v51 = vmul.f32 %v7583_v49, %v8323_v56  ;;  %v690_v62 = vadd.f32 %v8344_v10, %v676_v52 }
 0x2c6   :  { %v664_v53 = vmul.f32 %v7585_v50, %v8326_v57  ;;  %v8455_v50 = vld [vmem:[%s9843_s21] sm:$0xff] }
 0x2c7   :  { %v677_v54 = vmul.f32 %v8320_v55, %v663_v51  ;;  %v8460_v51 = vld [vmem:[%s9843_s21 + $0x10] sm:$0xff] }
 0x2c8   :  { %v7587_v59 = vpop.eup %7586  ;;  %v678_v1 = vmul.f32 %v8320_v55, %v664_v53 }
 0x2c9   :  { %v691_v63 = vadd.f32 %v8344_v10, %v677_v54  ;;  %v665_v0 = vmul.f32 %v7587_v59, %v8336_v5  ;;  %v8466_v59 = vld [vmem:[%s9843_s21 + $0x8] sm:$0xff] }
 0x2ca   :  { %v692_v56 = vadd.f32 %v8344_v10, %v678_v1 }
 0x2cb   :  { %v696_v48 = vpack.c.bf16 %v691_v63, %v690_v62  ;;  %v679_v2 = vmul.f32 %v8320_v55, %v665_v0  ;;  %v8473_v0 = vld [vmem:[%s9843_s21 + $0x18] sm:$0xff] }
 0x2cd   :  { %6908 = vmatprep.mubr.msk.bf16.mxu0 %vm560_vm0, %v696_v48  ;;  %6924 = vmatprep.mubr.msk.bf16.mxu1 %vm560_vm0, %v696_v48  ;;  %v693_v57 = vadd.f32 %v8344_v10, %v679_v2 }
 0x2cf   :  { %v697_v3 = vpack.c.bf16 %v693_v57, %v692_v56 }
 0x2d1   :  { %6909 = vmatmul.mubr.msk.bf16.gmra.mxu0 %vm560_vm0, %v697_v3  ;;  %6925 = vmatmul.mubr.msk.bf16.gmra.mxu1 %vm560_vm0, %v697_v3 }
 0x2d2   :  { %6936 = vmatprep.mubr.msk.bf16.mxu0 %vm560_vm0, %v694_v21 }
 0x2d9   :  { %6937 = vmatmul.mubr.msk.bf16.vlgmr.msra.gmra.mxu0 %vm560_vm0, %v695_v28 }
 0x2da   :  { %6940 = vmatprep.mubr.msk.bf16.mxu0 %vm560_vm0, %v696_v48 }
 0x2e1   :  { %6941 = vmatmul.mubr.msk.bf16.gmra.mxu0 %vm560_vm0, %v697_v3 }
 0x2f8   :  { %v6906_v55 = vpop.f32.mrf.mxu0  ;;  %v6922_v4 = vpop.f32.mrf.mxu1 }
 0x2fa   :  { %v776_v5 = vpop.f32.mrf.mxu0  ;;  %v877_v7 = vpop.f32.mrf.mxu1 }
 0x2fc   :  { %v6907_v8 = vpop.f32.mrf.mxu0  ;;  %v6923_v37 = vpop.f32.mrf.mxu1 }
 0x2fd   :  { %v8394_v10 = vpack.c.bf16 %v6923_v37, %v6922_v4  ;;  %v8414_v20 = vpack.c.bf16 %v6907_v8, %v6906_v55 }
 0x2fe   :  { %v779_v12 = vpop.f32.mrf.mxu0  ;;  %v880_v14 = vpop.f32.mrf.mxu1 }
 0x2ff   :  { %v8396_v15 = vpack.c.bf16 %v779_v12, %v776_v5  ;;  %v8398_v17 = vpack.c.bf16 %v880_v14, %v877_v7  ;;  %7424 = vmatprep.subr.msk.bf16.mxu1 %vm1021_vm1, %v8394_v10  ;;  %1197 = vrot.lane.b32.xlu0 %v8394_v10, %s7960_s29  ;;  %v1032_v18 = vsel %vm1021_vm1, %v8394_v10, 0 }
 0x300   :  { %6945 = vmatpush3.bf16.xpose.msra.mxu1 %v1032_v18 }
 0x301   :  { %1195 = vrot.lane.b32.xlu1 %v8398_v17, %s7960_s29  ;;  %7425 = vmatprep.subr.msk.bf16.mxu1 %vm1021_vm1, %v8398_v17  ;;  %v1029_v45 = vsel %vm1021_vm1, %v8398_v17, 0 }
 0x302   :  { %6948 = vmatprep.mubr.msk.bf16.mxu1 %vm1021_vm1, %v8396_v15 }
 0x305   :  { %1189 = vrot.lane.b32.xlu1 %v8396_v15, %s7960_s29 }
 0x308   :  { %6947 = vmatpush3.bf16.xpose.msra.mxu1 %v1029_v45 }
 0x309   :  { %1191 = vrot.lane.b32.xlu1 %v8414_v20, %s7960_s29 }
 0x30f   :  { %6949 = vmatmul.mubr.msk.bf16.vlgmr.msra.gmra.mxu1 %vm1021_vm1, %v8414_v20 }
 0x371   :  { %v1198_v21 = vpop.permute.xlu0 %1197 }
 0x372   :  { %7426 = vmatprep.subr.msk.bf16.mxu0 %vm1021_vm1, %v1198_v21  ;;  %v1209_v23 = vsel %vm1021_vm1, %v1198_v21, 0 }
 0x373   :  { %v1196_v24 = vpop.permute.xlu1 %1195  ;;  %6961 = vmatpush3.bf16.xpose.msra.mxu0 %v1209_v23 }
 0x374   :  { %7427 = vmatprep.subr.msk.bf16.mxu0 %vm1021_vm1, %v1196_v24  ;;  %v1206_v26 = vsel %vm1021_vm1, %v1196_v24, 0 }
 0x377   :  { %v1190_v25 = vpop.permute.xlu1 %1189 }
 0x378   :  { %6964 = vmatprep.mubr.msk.bf16.mxu0 %vm1021_vm1, %v1190_v25 }
 0x37b   :  { %6963 = vmatpush3.bf16.xpose.msra.mxu0 %v1206_v26  ;;  %v1192_v58 = vpop.permute.xlu1 %1191 }
 0x382   :  { %6965 = vmatmul.mubr.msk.bf16.vlgmr.msra.gmra.mxu0 %vm1021_vm1, %v1192_v58 }
 0x391   :  { %v6910_v27 = vpop.f32.mrf.mxu0  ;;  %v6926_v28 = vpop.f32.mrf.mxu1 }
 0x393   :  { %v8428_v29 = vpop.f32.mrf.mxu0  ;;  %v8430_v9 = vpop.f32.mrf.mxu1 }
 0x395   :  { %v6911_v30 = vpop.f32.mrf.mxu0  ;;  %v6927_v31 = vpop.f32.mrf.mxu1 }
 0x396   :  { %v8432_v32 = vpack.c.bf16 %v6911_v30, %v6910_v27  ;;  %v8434_v33 = vpack.c.bf16 %v6927_v31, %v6926_v28 }
 0x397   :  { %v8436_v34 = vpop.f32.mrf.mxu0  ;;  %v8450_v47 = vpop.f32.mrf.mxu1 }
 0x399   :  { %v6938_v35 = vpop.f32.mrf.mxu0 }
 0x39b   :  { %v978_v36 = vpop.f32.mrf.mxu0 }
 0x39d   :  { %v6939_v38 = vpop.f32.mrf.mxu0 }
 0x39e   :  { %v8438_v39 = vpack.c.bf16 %v6939_v38, %v6938_v35 }
 0x39f   :  { %v981_v40 = vpop.f32.mrf.mxu0 }
 0x3a0   :  { %v8440_v41 = vpack.c.bf16 %v981_v40, %v978_v36  ;;  %6952 = vmatprep.subr.bf16.mxu1 %v8438_v39 }
 0x3a1   :  { %v6942_v42 = vpop.f32.mrf.mxu0  ;;  %6953 = vmatpush3.bf16.msra.mxu1 %v8438_v39 }
 0x3a2   :  { %6954 = vmatprep.subr.bf16.mxu1 %v8440_v41 }
 0x3a3   :  { %v8445_v43 = vpop.f32.mrf.mxu0 }
 0x3a5   :  { %v6943_v44 = vpop.f32.mrf.mxu0  ;;  %6955 = vmatpush3.bf16.msra.mxu1 %v8440_v41 }
 0x3a6   :  { %v8448_v46 = vpack.c.bf16 %v6943_v44, %v6942_v42 }
 0x3a7   :  { %v8480_v55 = vpop.f32.mrf.mxu0 }
 0x3cf   :  { %v6950_v49 = vpop.f32.mrf.mxu1 }
 0x3d0   :  { %v1077_v62 = vadd.f32 %v6950_v49, %v8460_v51 }
 0x3d1   :  { %v1068_v52 = vpop.f32.mrf.mxu1 }
 0x3d2   :  { %v1069_v53 = vadd.f32 %v1068_v52, %v8455_v50  ;;  %v1090_v57 = vsel %vm1083_vm2, %v1077_v62, -inf }
 0x3d3   :  { %v6951_v54 = vpop.f32.mrf.mxu1 }
 0x3d4   :  { %v1084_v63 = vsel %vm1083_vm2, %v1069_v53, -inf  ;;  %v1080_v2 = vadd.f32 %v6951_v54, %v8473_v0 }
 0x3d5   :  { %v1071_v1 = vpop.f32.mrf.mxu1  ;;  %1085 = vmax.xlane.f32.xlu0 %v1084_v63 }
 0x3d6   :  { %v1072_v48 = vadd.f32 %v1071_v1, %v8466_v59  ;;  %v1093_v3 = vsel %vm1083_vm2, %v1080_v2, -inf }
 0x3d8   :  { %v1087_v56 = vsel %vm1083_vm2, %v1072_v48, -inf }
 0x3d9   :  { %1088 = vmax.xlane.f32.xlu1 %v1087_v56  ;;  %1091 = vmax.xlane.f32.xlu0 %v1090_v57 }
 0x3dd   :  { %1094 = vmax.xlane.f32.xlu0 %v1093_v3 }
 0x442   :  { %v6966_v4 = vpop.f32.mrf.mxu0 }
 0x443   :  { %v1254_v37 = vadd.f32 %v6966_v4, %v8460_v51 }
 0x444   :  { %v1245_v5 = vpop.f32.mrf.mxu0 }
 0x445   :  { %v1246_v7 = vadd.f32 %v1245_v5, %v8455_v50  ;;  %v1266_v23 = vsel %vm1083_vm2, %v1254_v37, -inf }
 0x446   :  { %v6967_v8 = vpop.f32.mrf.mxu0 }
 0x447   :  { %v1260_v12 = vsel %vm1083_vm2, %v1246_v7, -inf  ;;  %v1257_v45 = vadd.f32 %v6967_v8, %v8473_v0 }
 0x448   :  { %v1248_v14 = vpop.f32.mrf.mxu0  ;;  %1261 = vmax.xlane.f32.xlu0 %v1260_v12 }
 0x449   :  { %v1249_v18 = vadd.f32 %v1248_v14, %v8466_v59  ;;  %v1269_v24 = vsel %vm1083_vm2, %v1257_v45, -inf }
 0x44b   :  { %v1263_v21 = vsel %vm1083_vm2, %v1249_v18, -inf }
 0x44c   :  { %1264 = vmax.xlane.f32.xlu1 %v1263_v21  ;;  %1267 = vmax.xlane.f32.xlu0 %v1266_v23 }
 0x450   :  { %1270 = vmax.xlane.f32.xlu1 %v1269_v24 }
 0x45e   :  { %v1086_v25 = vpop.xlane.xlu0 %1085 }
 0x45f   :  { %v1096_v26 = vsub.f32 %v1069_v53, %v1086_v25 }
 0x461   :  { %v1100_v35 = vmul.f32 1.442695, %v1096_v26 }
 0x462   :  { %v1089_v58 = vpop.xlane.xlu1 %1088  ;;  %v1092_v27 = vpop.xlane.xlu0 %1091 }
 0x463   :  { %v1098_v28 = vsub.f32 %v1077_v62, %v1092_v27  ;;  %v1097_v30 = vsub.f32 %v1072_v48, %v1089_v58 }
 0x465   :  { %v1104_v31 = vmul.f32 1.442695, %v1098_v28  ;;  %v1102_v40 = vmul.f32 1.442695, %v1097_v30  ;;  %v8522_v28 = vld [vmem:[%s9821_s9 + $0x8] sm:$0xff]  }
 0x466   :  { %v1095_v36 = vpop.xlane.xlu0 %1094  ;;  %6976 = vmatprep.subr.bf16.mxu0 %v8522_v28 }
 0x467   :  { %v1099_v38 = vsub.f32 %v1080_v2, %v1095_v36  ;;  %7588 = vpow2.f32 %v1104_v31  ;;  %6977 = vmatpush3.bf16.msra.mxu0 %v8522_v28 }
 0x468   :  { %7590 = vpow2.f32 %v1100_v35 }
 0x469   :  { %v1106_v42 = vmul.f32 1.442695, %v1099_v38 }
 0x46b   :  { %7592 = vpow2.f32 %v1106_v42 }
 0x46c   :  { %7594 = vpow2.f32 %v1102_v40 }
 0x474   :  { %v8490_v44 = vpop.eup %7588 }
 0x475   :  { %v1114_v49 = vsel %vm1083_vm2, %v8490_v44, 0.0  ;;  %v8494_v52 = vpop.eup %7590 }
 0x476   :  { %1115 = vadd.xlane.f32.xlu0 %v1114_v49  ;;  %v1108_v63 = vsel %vm1083_vm2, %v8494_v52, 0.0 }
 0x478   :  { %v7593_v53 = vpop.eup %7592 }
 0x479   :  { %v1117_v54 = vsel %vm1083_vm2, %v7593_v53, 0.0  ;;  %v8497_v62 = vpop.eup %7594 }
 0x47a   :  { %1118 = vadd.xlane.f32.xlu1 %v1117_v54  ;;  %1109 = vadd.xlane.f32.xlu0 %v1108_v63  ;;  %v1111_v1 = vsel %vm1083_vm2, %v8497_v62, 0.0 }
 0x47e   :  { %1112 = vadd.xlane.f32.xlu1 %v1111_v1 }
 0x4d1   :  { %v1262_v48 = vpop.xlane.xlu0 %1261 }
 0x4d2   :  { %v1272_v2 = vsub.f32 %v1246_v7, %v1262_v48 }
 0x4d4   :  { %v1276_v8 = vmul.f32 1.442695, %v1272_v2 }
 0x4d5   :  { %v1265_v56 = vpop.xlane.xlu1 %1264  ;;  %v1268_v57 = vpop.xlane.xlu0 %1267 }
 0x4d6   :  { %v1274_v3 = vsub.f32 %v1254_v37, %v1268_v57  ;;  %v1273_v4 = vsub.f32 %v1249_v18, %v1265_v56 }
 0x4d8   :  { %v1280_v5 = vmul.f32 1.442695, %v1274_v3  ;;  %v1278_v21 = vmul.f32 1.442695, %v1273_v4 }
 0x4d9   :  { %v1271_v12 = vpop.xlane.xlu1 %1270 }
 0x4da   :  { %v1275_v14 = vsub.f32 %v1257_v45, %v1271_v12  ;;  %7596 = vpow2.f32 %v1280_v5 }
 0x4db   :  { %7598 = vpow2.f32 %v1276_v8 }
 0x4dc   :  { %v1282_v23 = vmul.f32 1.442695, %v1275_v14 }
 0x4de   :  { %7600 = vpow2.f32 %v1282_v23 }
 0x4df   :  { %7602 = vpow2.f32 %v1278_v21 }
 0x4e7   :  { %v8503_v24 = vpop.eup %7596 }
 0x4e8   :  { %v1290_v25 = vsel %vm1083_vm2, %v8503_v24, 0.0  ;;  %v8507_v7 = vpop.eup %7598 }
 0x4e9   :  { %1291 = vadd.xlane.f32.xlu0 %v1290_v25  ;;  %v1284_v26 = vsel %vm1083_vm2, %v8507_v7, 0.0 }
 0x4eb   :  { %v8509_v37 = vpop.eup %7600 }
 0x4ec   :  { %v1293_v18 = vsel %vm1083_vm2, %v8509_v37, 0.0  ;;  %v8513_v45 = vpop.eup %7602 }
 0x4ed   :  { %1294 = vadd.xlane.f32.xlu1 %v1293_v18  ;;  %1285 = vadd.xlane.f32.xlu0 %v1284_v26  ;;  %v1287_v58 = vsel %vm1083_vm2, %v8513_v45, 0.0 }
 0x4f1   :  { %1288 = vadd.xlane.f32.xlu1 %v1287_v58 }
 0x4ff   :  { %v1116_v27 = vpop.xlane.xlu0 %1115 }
 0x502   :  { %1308 = vrot.lane.b32.xlu1 %v8440_v41, %s7960_s29 }
 0x503   :  { %v1119_v30 = vpop.xlane.xlu1 %1118  ;;  %1310 = vrot.lane.b32.xlu0 %v8438_v39, %s7960_s29  ;;  %v1110_v31 = vpop.xlane.xlu0 %1109 }
 0x504   :  { %7604 = vrcp.f32 %v1119_v30 }
 0x505   :  { %7606 = vrcp.f32 %v1110_v31 }
 0x506   :  { %1499 = vrot.lane.b32.xlu1 %v8394_v10, %s7961_s3  ;;  %7608 = vrcp.f32 %v1116_v27 }
 0x507   :  { %v1113_v35 = vpop.xlane.xlu1 %1112  ;;  %1493 = vrot.lane.b32.xlu0 %v8396_v15, %s7961_s3 }
 0x508   :  { %7610 = vrcp.f32 %v1113_v35 }
 0x50a   :  { %1497 = vrot.lane.b32.xlu1 %v8398_v17, %s7961_s3 }
 0x50b   :  { %1742 = vrot.lane.b32.xlu0 %v8394_v10, %s7962_s27 }
 0x50e   :  { %1495 = vrot.lane.b32.xlu1 %v8414_v20, %s7961_s3 }
 0x50f   :  { %1736 = vrot.lane.b32.xlu0 %v8396_v15, %s7962_s27 }
 0x511   :  { %v7605_v36 = vpop.eup %7604 }
 0x512   :  { %1740 = vrot.lane.b32.xlu1 %v8398_v17, %s7962_s27  ;;  %v7607_v38 = vpop.eup %7606  ;;  %v1127_v49 = vmul.f32 %v7605_v36, %v7593_v53 }
 0x513   :  { %v7609_v40 = vpop.eup %7608  ;;  %v1124_v54 = vmul.f32 %v7607_v38, %v8494_v52 }
 0x514   :  { %v1126_v63 = vmul.f32 %v7609_v40, %v8490_v44  ;;  %v8554_v44 = vld [vmem:[%s9821_s9] sm:$0xff]  }
 0x515   :  { %v7611_v42 = vpop.eup %7610 }
 0x516   :  { %1738 = vrot.lane.b32.xlu1 %v8414_v20, %s7962_s27  ;;  %v1125_v10 = vmul.f32 %v7611_v42, %v8497_v62  ;;  %v1129_v48 = vpack.c.bf16 %v1127_v49, %v1126_v63 }
 0x518   :  { %v1128_v1 = vpack.c.bf16 %v1125_v10, %v1124_v54 }
 0x51a   :  { %6956 = vmatprep.mubr.msk.bf16.mxu1 %vm1083_vm2, %v1128_v1 }
 0x51b   :  { %6957 = vmatmul.mubr.msk.bf16.vlgmr.msra.gmra.mxu1 %vm1083_vm2, %v1129_v48 }
 0x572   :  { %v1292_v15 = vpop.xlane.xlu0 %1291 }
 0x576   :  { %v1295_v17 = vpop.xlane.xlu1 %1294  ;;  %v1286_v2 = vpop.xlane.xlu0 %1285 }
 0x577   :  { %7612 = vrcp.f32 %v1295_v17 }
 0x578   :  { %7614 = vrcp.f32 %v1286_v2  ;;  %v8587_v2 = vpack.c.bf16 %v8450_v47, %v8430_v9 }
 0x579   :  { %7616 = vrcp.f32 %v1292_v15  ;;  %v8583_v15 = vpack.c.bf16 %v8436_v34, %v8428_v29 }
 0x57a   :  { %v1289_v53 = vpop.xlane.xlu1 %1288  ;;  %v1311_v20 = vpop.permute.xlu0 %1310  ;;  %v1986_v29 = vsel %vm1021_vm1, %v8587_v2, 0 }
 0x57b   :  { %7618 = vrcp.f32 %v1289_v53  ;;  %6968 = vmatprep.subr.bf16.mxu1 %v1311_v20  ;;  %v1989_v53 = vsel %vm1021_vm1, %v8434_v33, 0 }
 0x57c   :  { %6969 = vmatpush3.bf16.msra.mxu1 %v1311_v20 }
 0x57e   :  { %v1309_v52 = vpop.permute.xlu1 %1308  ;;  %v1494_v36 = vpop.permute.xlu0 %1493 }
 0x57f   :  { %6970 = vmatprep.subr.bf16.mxu1 %v1309_v52 }
 0x580   :  { %6971 = vmatpush3.bf16.msra.mxu1 %v1309_v52 }
 0x581   :  { %6982 = vmatprep.subr.bf16.mxu1 %v8554_v44 }
 0x582   :  { %v1500_v62 = vpop.permute.xlu1 %1499  ;;  %v1743_v49 = vpop.permute.xlu0 %1742 }
 0x583   :  { %7428 = vmatprep.subr.msk.bf16.mxu0 %vm1021_vm1, %v1500_v62  ;;  %v1511_v38 = vsel %vm1021_vm1, %v1500_v62, 0  ;;  %v1754_v63 = vsel %vm1021_vm1, %v1743_v49, 0 }
 0x584   :  { %v7613_v56 = vpop.eup %7612 }
 0x585   :  { %v7615_v57 = vpop.eup %7614  ;;  %v1303_v5 = vmul.f32 %v7613_v56, %v8509_v37 }
 0x586   :  { %v7617_v3 = vpop.eup %7616  ;;  %v1300_v8 = vmul.f32 %v7615_v57, %v8507_v7  ;;  %v1498_v40 = vpop.permute.xlu1 %1497 }
 0x587   :  { %v1302_v14 = vmul.f32 %v7617_v3, %v8503_v24  ;;  %v1508_v42 = vsel %vm1021_vm1, %v1498_v40, 0  ;;  %v1737_v10 = vpop.permute.xlu0 %1736 }
 0x588   :  { %v7619_v4 = vpop.eup %7618 }
 0x589   :  { %v1301_v12 = vmul.f32 %v7619_v4, %v8513_v45  ;;  %v1305_v23 = vpack.c.bf16 %v1303_v5, %v1302_v14 }
 0x58a   :  { %v1496_v54 = vpop.permute.xlu1 %1495 }
 0x58b   :  { %v1304_v21 = vpack.c.bf16 %v1301_v12, %v1300_v8 }
 0x58d   :  { %6972 = vmatprep.mubr.msk.bf16.mxu1 %vm1083_vm2, %v1304_v21 }
 0x58e   :  { %6973 = vmatmul.mubr.msk.bf16.vlgmr.msra.gmra.mxu1 %vm1083_vm2, %v1305_v23  ;;  %v1741_v1 = vpop.permute.xlu1 %1740 }
 0x58f   :  { %6983 = vmatpush3.bf16.msra.mxu1 %v8554_v44  ;;  %v1751_v48 = vsel %vm1021_vm1, %v1741_v1, 0 }
 0x592   :  { %v1739_v17 = vpop.permute.xlu1 %1738 }
 0x5db   :  { %v6958_v25 = vpop.f32.mrf.mxu1 }
 0x5dd   :  { %v1170_v18 = vpop.f32.mrf.mxu1 }
 0x5df   :  { %v6959_v26 = vpop.f32.mrf.mxu1 }
 0x5e0   :  { %v1186_v37 = vpack.c.bf16 %v6959_v26, %v6958_v25 }
 0x5e1   :  { %v1173_v58 = vpop.f32.mrf.mxu1 }
 0x5e2   :  { %v1185_v27 = vpack.c.bf16 %v1173_v58, %v1170_v18 }
 0x5e4   :  { %6984 = vmatprep.mubr.msk.bf16.mxu1 %vm1021_vm1, %v1185_v27 }
 0x5e5   :  { %6985 = vmatmul.mubr.msk.bf16.vlgmr.msra.gmra.mxu1 %vm1021_vm1, %v1186_v37 }
 0x64e   :  { %v6974_v7 = vpop.f32.mrf.mxu1 }
 0x650   :  { %v1354_v24 = vpop.f32.mrf.mxu1 }
 0x652   :  { %v6975_v45 = vpop.f32.mrf.mxu1 }
 0x653   :  { %v1370_v35 = vpack.c.bf16 %v6975_v45, %v6974_v7 }
 0x654   :  { %v1357_v30 = vpop.f32.mrf.mxu1 }
 0x655   :  { %v1369_v31 = vpack.c.bf16 %v1357_v30, %v1354_v24 }
 0x657   :  { %6978 = vmatprep.mubr.msk.bf16.mxu0 %vm1021_vm1, %v1369_v31 }
 0x658   :  { %6979 = vmatmul.mubr.msk.bf16.vlgmr.msra.gmra.mxu0 %vm1021_vm1, %v1370_v35 }
 0x659   :  { %6989 = vmatpush3.bf16.xpose.msra.mxu0 %v1511_v38  ;;  %6992 = vmatprep.mubr.msk.bf16.mxu0 %vm1021_vm1, %v1494_v36 }
 0x65a   :  { %7429 = vmatprep.subr.msk.bf16.mxu0 %vm1021_vm1, %v1498_v40 }
 0x661   :  { %6991 = vmatpush3.bf16.xpose.msra.mxu0 %v1508_v42 }
 0x662   :  { %7430 = vmatprep.subr.msk.bf16.mxu0 %vm1021_vm1, %v1743_v49 }
 0x668   :  { %6993 = vmatmul.mubr.msk.bf16.vlgmr.msra.gmra.mxu0 %vm1021_vm1, %v1496_v54 }
 0x669   :  { %7011 = vmatpush3.bf16.xpose.msra.mxu0 %v1754_v63  ;;  %7014 = vmatprep.mubr.msk.bf16.mxu0 %vm1021_vm1, %v1737_v10 }
 0x66a   :  { %7431 = vmatprep.subr.msk.bf16.mxu0 %vm1021_vm1, %v1741_v1 }
 0x671   :  { %7013 = vmatpush3.bf16.xpose.msra.mxu0 %v1751_v48 }
 0x672   :  { %7432 = vmatprep.subr.msk.bf16.mxu0 %vm1021_vm1, %v8434_v33 }
 0x678   :  { %7015 = vmatmul.mubr.msk.bf16.vlgmr.msra.gmra.mxu0 %vm1021_vm1, %v1739_v17 }
 0x679   :  { %7033 = vmatpush3.bf16.xpose.msra.mxu0 %v1989_v53  ;;  %7036 = vmatprep.mubr.msk.bf16.mxu0 %vm1021_vm1, %v8583_v15 }
 0x67a   :  { %7433 = vmatprep.subr.msk.bf16.mxu0 %vm1021_vm1, %v8587_v2 }
 0x681   :  { %7035 = vmatpush3.bf16.xpose.msra.mxu0 %v1986_v29 }
 0x688   :  { %7037 = vmatmul.mubr.msk.bf16.vlgmr.msra.gmra.mxu0 %vm1021_vm1, %v8432_v32 }
 0x718   :  { %v8600_v9 = vpop.f32.mrf.mxu0 }
 0x71a   :  { %v8602_v34 = vpop.f32.mrf.mxu0 }
 0x71c   :  { %v8604_v47 = vpop.f32.mrf.mxu0 }
 0x71e   :  { %v8606_v20 = vpop.f32.mrf.mxu0 }
 0x728   :  { %v6994_v52 = vpop.f32.mrf.mxu0 }
 0x729   :  { %v1556_v3 = vadd.f32 %v6994_v52, %v8460_v51 }
 0x72a   :  { %v1547_v62 = vpop.f32.mrf.mxu0 }
 0x72b   :  { %v1548_v56 = vadd.f32 %v1547_v62, %v8455_v50  ;;  %v1568_v21 = vsel %vm1083_vm2, %v1556_v3, -inf }
 0x72c   :  { %v6995_v57 = vpop.f32.mrf.mxu0 }
 0x72d   :  { %v1562_v4 = vsel %vm1083_vm2, %v1548_v56, -inf  ;;  %v1559_v12 = vadd.f32 %v6995_v57, %v8473_v0 }
 0x72e   :  { %v1550_v5 = vpop.f32.mrf.mxu0  ;;  %1563 = vmax.xlane.f32.xlu0 %v1562_v4 }
 0x72f   :  { %v1551_v8 = vadd.f32 %v1550_v5, %v8466_v59  ;;  %v1571_v23 = vsel %vm1083_vm2, %v1559_v12, -inf }
 0x731   :  { %v1565_v14 = vsel %vm1083_vm2, %v1551_v8, -inf }
 0x732   :  { %1566 = vmax.xlane.f32.xlu1 %v1565_v14  ;;  %1569 = vmax.xlane.f32.xlu0 %v1568_v21 }
 0x736   :  { %1572 = vmax.xlane.f32.xlu0 %v1571_v23 }
 0x738   :  { %v7016_v1 = vpop.f32.mrf.mxu0 }
 0x739   :  { %v1799_v62 = vadd.f32 %v7016_v1, %v8460_v51 }
 0x73a   :  { %v1790_v48 = vpop.f32.mrf.mxu0 }
 0x73b   :  { %v1791_v52 = vadd.f32 %v1790_v48, %v8455_v50  ;;  %v1811_v4 = vsel %vm1083_vm2, %v1799_v62, -inf }
 0x73c   :  { %v7017_v17 = vpop.f32.mrf.mxu0 }
 0x73d   :  { %v1802_v57 = vadd.f32 %v7017_v17, %v8473_v0 }
 0x73e   :  { %v1793_v53 = vpop.f32.mrf.mxu0 }
 0x73f   :  { %v1794_v29 = vadd.f32 %v1793_v53, %v8466_v59  ;;  %v1814_v5 = vsel %vm1083_vm2, %v1802_v57, -inf }
 0x7b7   :  { %v1564_v25 = vpop.xlane.xlu0 %1563 }
 0x7b8   :  { %v1574_v18 = vsub.f32 %v1548_v56, %v1564_v25  ;;  %v1808_v56 = vsel %vm1083_vm2, %v1794_v29, -inf }
 0x7ba   :  { %v1578_v24 = vmul.f32 1.442695, %v1574_v18 }
 0x7bb   :  { %v1567_v26 = vpop.xlane.xlu1 %1566  ;;  %v1570_v58 = vpop.xlane.xlu0 %1569 }
 0x7bc   :  { %v1576_v27 = vsub.f32 %v1556_v3, %v1570_v58  ;;  %v1575_v37 = vsub.f32 %v1551_v8, %v1567_v26  ;;  %v1805_v3 = vsel %vm1083_vm2, %v1791_v52, -inf }
 0x7be   :  { %v1582_v7 = vmul.f32 1.442695, %v1576_v27  ;;  %v1580_v31 = vmul.f32 1.442695, %v1575_v37 }
 0x7bf   :  { %v1573_v45 = vpop.xlane.xlu0 %1572 }
 0x7c0   :  { %v1577_v30 = vsub.f32 %v1559_v12, %v1573_v45  ;;  %7620 = vpow2.f32 %v1582_v7 }
 0x7c1   :  { %7622 = vpow2.f32 %v1578_v24 }
 0x7c2   :  { %v1584_v35 = vmul.f32 1.442695, %v1577_v30 }
 0x7c4   :  { %7624 = vpow2.f32 %v1584_v35 }
 0x7c5   :  { %7626 = vpow2.f32 %v1580_v31 }
 0x7cd   :  { %v7621_v36 = vpop.eup %7620 }
 0x7ce   :  { %v1592_v38 = vsel %vm1083_vm2, %v7621_v36, 0.0  ;;  %v7623_v40 = vpop.eup %7622 }
 0x7cf   :  { %1593 = vadd.xlane.f32.xlu0 %v1592_v38  ;;  %v1586_v10 = vsel %vm1083_vm2, %v7623_v40, 0.0 }
 0x7d1   :  { %v7625_v42 = vpop.eup %7624 }
 0x7d2   :  { %v1595_v49 = vsel %vm1083_vm2, %v7625_v42, 0.0  ;;  %v7627_v54 = vpop.eup %7626 }
 0x7d3   :  { %1596 = vadd.xlane.f32.xlu1 %v1595_v49  ;;  %1587 = vadd.xlane.f32.xlu0 %v1586_v10  ;;  %v1589_v63 = vsel %vm1083_vm2, %v7627_v54, 0.0 }
 0x7d7   :  { %1590 = vadd.xlane.f32.xlu1 %v1589_v63 }
 0x7e8   :  { %1608 = vrot.lane.b32.xlu1 %v8440_v41, %s7961_s3 }
 0x7e9   :  { %1610 = vrot.lane.b32.xlu0 %v8438_v39, %s7961_s3 }
 0x808   :  { %1809 = vmax.xlane.f32.xlu0 %v1808_v56 }
 0x80c   :  { %1806 = vmax.xlane.f32.xlu1 %v1805_v3  ;;  %1812 = vmax.xlane.f32.xlu0 %v1811_v4 }
 0x810   :  { %1815 = vmax.xlane.f32.xlu1 %v1814_v5  ;;  %v8647_v5 = vld [vmem:[%s9821_s9 + $0x10] sm:$0xff]  }
 0x858   :  { %v1594_v8 = vpop.xlane.xlu0 %1593 }
 0x85c   :  { %v1597_v12 = vpop.xlane.xlu1 %1596  ;;  %v1588_v14 = vpop.xlane.xlu0 %1587 }
 0x85d   :  { %7628 = vrcp.f32 %v1597_v12 }
 0x85e   :  { %7630 = vrcp.f32 %v1588_v14 }
 0x85f   :  { %7632 = vrcp.f32 %v1594_v8  ;;  %v7038_v8 = vpop.f32.mrf.mxu0 }
 0x860   :  { %v1591_v21 = vpop.xlane.xlu1 %1590  ;;  %v1611_v23 = vpop.permute.xlu0 %1610 }
 0x861   :  { %7634 = vrcp.f32 %v1591_v21  ;;  %6996 = vmatprep.subr.bf16.mxu1 %v1611_v23  ;;  %v2025_v12 = vpop.f32.mrf.mxu0 }
 0x862   :  { %6997 = vmatpush3.bf16.msra.mxu1 %v1611_v23 }
 0x863   :  { %v7039_v14 = vpop.f32.mrf.mxu0 }
 0x864   :  { %v1609_v25 = vpop.permute.xlu1 %1608 }
 0x865   :  { %6998 = vmatprep.subr.bf16.mxu1 %v1609_v25  ;;  %v2028_v21 = vpop.f32.mrf.mxu0 }
 0x866   :  { %6999 = vmatpush3.bf16.msra.mxu1 %v1609_v25  ;;  %v2029_v23 = vadd.f32 %v2028_v21, %v8466_v59  ;;  %v2026_v25 = vadd.f32 %v2025_v12, %v8455_v50 }
 0x867   :  { %7004 = vmatprep.subr.bf16.mxu1 %v8647_v5 }
 0x86a   :  { %v7629_v18 = vpop.eup %7628 }
 0x86b   :  { %v7631_v26 = vpop.eup %7630  ;;  %v1605_v37 = vmul.f32 %v7629_v18, %v7625_v42  ;;  %v2034_v18 = vadd.f32 %v7038_v8, %v8460_v51 }
 0x86c   :  { %v7633_v58 = vpop.eup %7632  ;;  %v1602_v7 = vmul.f32 %v7631_v26, %v7623_v40  ;;  %v2043_v26 = vsel %vm1083_vm2, %v2029_v23, -inf }
 0x86d   :  { %v1604_v45 = vmul.f32 %v7633_v58, %v7621_v36  ;;  %v2037_v58 = vadd.f32 %v7039_v14, %v8473_v0 }
 0x86e   :  { %v7635_v27 = vpop.eup %7634 }
 0x86f   :  { %v1603_v24 = vmul.f32 %v7635_v27, %v7627_v54  ;;  %v1607_v31 = vpack.c.bf16 %v1605_v37, %v1604_v45  ;;  %v2049_v27 = vsel %vm1083_vm2, %v2037_v58, -inf  ;;  %v8663_v37 = vpop.f32.mrf.mxu1 }
 0x871   :  { %v1606_v30 = vpack.c.bf16 %v1603_v24, %v1602_v7  ;;  %v8665_v7 = vpop.f32.mrf.mxu1 }
 0x873   :  { %7000 = vmatprep.mubr.msk.bf16.mxu1 %vm1083_vm2, %v1606_v30  ;;  %v8667_v24 = vpop.f32.mrf.mxu1 }
 0x874   :  { %7001 = vmatmul.mubr.msk.bf16.vlgmr.msra.gmra.mxu1 %vm1083_vm2, %v1607_v31 }
 0x875   :  { %7005 = vmatpush3.bf16.msra.mxu1 %v8647_v5  ;;  %v8669_v45 = vpop.f32.mrf.mxu1 }
 0x891   :  { %v1810_v35 = vpop.xlane.xlu0 %1809 }
 0x892   :  { %v1818_v1 = vsub.f32 %v1794_v29, %v1810_v35 }
 0x894   :  { %v1823_v40 = vmul.f32 1.442695, %v1818_v1 }
 0x895   :  { %v1807_v38 = vpop.xlane.xlu1 %1806  ;;  %v1813_v10 = vpop.xlane.xlu0 %1812 }
 0x896   :  { %v1817_v49 = vsub.f32 %v1791_v52, %v1807_v38  ;;  %v1819_v63 = vsub.f32 %v1799_v62, %v1813_v10 }
 0x898   :  { %v1821_v48 = vmul.f32 1.442695, %v1817_v49  ;;  %v1825_v17 = vmul.f32 1.442695, %v1819_v63 }
 0x899   :  { %v1816_v53 = vpop.xlane.xlu1 %1815 }
 0x89a   :  { %v1820_v56 = vsub.f32 %v1802_v57, %v1816_v53  ;;  %7636 = vpow2.f32 %v1825_v17 }
 0x89b   :  { %7638 = vpow2.f32 %v1821_v48 }
 0x89c   :  { %v1827_v42 = vmul.f32 1.442695, %v1820_v56 }
 0x89e   :  { %7640 = vpow2.f32 %v1827_v42 }
 0x89f   :  { %7642 = vpow2.f32 %v1823_v40  ;;  %v8676_v40 = vld [vmem:[%s9821_s9 + $0x18] sm:$0xff]  }
 0x8a7   :  { %v8634_v36 = vpop.eup %7636 }
 0x8a8   :  { %v1835_v54 = vsel %vm1083_vm2, %v8634_v36, 0.0  ;;  %v8638_v3 = vpop.eup %7638 }
 0x8a9   :  { %1836 = vadd.xlane.f32.xlu0 %v1835_v54  ;;  %v1829_v57 = vsel %vm1083_vm2, %v8638_v3, 0.0 }
 0x8ab   :  { %v7641_v52 = vpop.eup %7640 }
 0x8ac   :  { %v1838_v29 = vsel %vm1083_vm2, %v7641_v52, 0.0  ;;  %v7643_v62 = vpop.eup %7642 }
 0x8ad   :  { %1839 = vadd.xlane.f32.xlu1 %v1838_v29  ;;  %1830 = vadd.xlane.f32.xlu0 %v1829_v57  ;;  %v1832_v4 = vsel %vm1083_vm2, %v7643_v62, 0.0 }
 0x8b1   :  { %1833 = vadd.xlane.f32.xlu1 %v1832_v4 }
 0x8c2   :  { %1851 = vrot.lane.b32.xlu1 %v8440_v41, %s7962_s27  ;;  %v2040_v41 = vsel %vm1083_vm2, %v2026_v25, -inf }
 0x8c3   :  { %1853 = vrot.lane.b32.xlu0 %v8438_v39, %s7962_s27  ;;  %v2046_v39 = vsel %vm1083_vm2, %v2034_v18, -inf }
 0x8e2   :  { %2044 = vmax.xlane.f32.xlu0 %v2043_v26 }
 0x8e6   :  { %2041 = vmax.xlane.f32.xlu1 %v2040_v41  ;;  %2047 = vmax.xlane.f32.xlu0 %v2046_v39 }
 0x8ea   :  { %2050 = vmax.xlane.f32.xlu1 %v2049_v27 }
 0x932   :  { %v1837_v30 = vpop.xlane.xlu0 %1836 }
 0x934   :  { %v7002_v31 = vpop.f32.mrf.mxu1 }
 0x936   :  { %v1840_v35 = vpop.xlane.xlu1 %1839  ;;  %v1654_v38 = vpop.f32.mrf.mxu1 }
 0x937   :  { %v1831_v49 = vpop.xlane.xlu0 %1830  ;;  %7644 = vrcp.f32 %v1840_v35 }
 0x938   :  { %v7003_v10 = vpop.f32.mrf.mxu1  ;;  %7646 = vrcp.f32 %v1831_v49 }
 0x939   :  { %7648 = vrcp.f32 %v1837_v30  ;;  %v1670_v53 = vpack.c.bf16 %v7003_v10, %v7002_v31 }
 0x93a   :  { %v1657_v63 = vpop.f32.mrf.mxu1  ;;  %v1834_v1 = vpop.xlane.xlu1 %1833 }
 0x93b   :  { %v1669_v48 = vpack.c.bf16 %v1657_v63, %v1654_v38  ;;  %7650 = vrcp.f32 %v1834_v1  ;;  %v1854_v17 = vpop.permute.xlu0 %1853 }
 0x93c   :  { %7018 = vmatprep.subr.bf16.mxu1 %v1854_v17 }
 0x93d   :  { %7006 = vmatprep.mubr.msk.bf16.mxu1 %vm1021_vm1, %v1669_v48 }
 0x93e   :  { %7007 = vmatmul.mubr.msk.bf16.vlgmr.msra.gmra.mxu1 %vm1021_vm1, %v1670_v53  ;;  %v1852_v56 = vpop.permute.xlu1 %1851 }
 0x93f   :  { %7019 = vmatpush3.bf16.msra.mxu1 %v1854_v17 }
 0x940   :  { %7020 = vmatprep.subr.bf16.mxu1 %v1852_v56 }
 0x943   :  { %7021 = vmatpush3.bf16.msra.mxu1 %v1852_v56  ;;  %v1479_v56 = vadd.f32 %v8665_v7, %v8602_v34 }
 0x944   :  { %7026 = vmatprep.subr.bf16.mxu1 %v8676_v40  ;;  %v7645_v42 = vpop.eup %7644 }
 0x945   :  { %v7647_v54 = vpop.eup %7646  ;;  %v1848_v4 = vmul.f32 %v7645_v42, %v7641_v52 }
 0x946   :  { %v7649_v29 = vpop.eup %7648  ;;  %v1845_v8 = vmul.f32 %v7647_v54, %v8638_v3 }
 0x947   :  { %v1847_v14 = vmul.f32 %v7649_v29, %v8634_v36  ;;  %v1490_v29 = vadd.f32 %v8667_v24, %v8604_v47  ;;  %v8706_v47 = vpack.c.bf16 %v8480_v55, %v8445_v43 }
 0x948   :  { %v7651_v57 = vpop.eup %7650 }
 0x949   :  { %v1846_v12 = vmul.f32 %v7651_v57, %v7643_v62  ;;  %v1850_v26 = vpack.c.bf16 %v1848_v4, %v1847_v14 }
 0x94b   :  { %v1849_v21 = vpack.c.bf16 %v1846_v12, %v1845_v8 }
 0x94d   :  { %7022 = vmatprep.mubr.msk.bf16.mxu1 %vm1083_vm2, %v1849_v21 }
 0x94e   :  { %7023 = vmatmul.mubr.msk.bf16.vlgmr.msra.gmra.mxu1 %vm1083_vm2, %v1850_v26 }
 0x94f   :  { %7027 = vmatpush3.bf16.msra.mxu1 %v8676_v40 }
 0x950   :  { %7040 = vmatprep.subr.bf16.mxu1 %v8448_v46 }
 0x96b   :  { %v2045_v41 = vpop.xlane.xlu0 %2044 }
 0x96c   :  { %v2053_v39 = vsub.f32 %v2029_v23, %v2045_v41 }
 0x96e   :  { %v2058_v27 = vmul.f32 1.442695, %v2053_v39 }
 0x96f   :  { %v2042_v30 = vpop.xlane.xlu1 %2041  ;;  %v2048_v31 = vpop.xlane.xlu0 %2047 }
 0x970   :  { %v2052_v52 = vsub.f32 %v2026_v25, %v2042_v30  ;;  %7652 = vpow2.f32 %v2058_v27  ;;  %v2054_v3 = vsub.f32 %v2034_v18, %v2048_v31 }
 0x972   :  { %v2056_v62 = vmul.f32 1.442695, %v2052_v52  ;;  %v2060_v36 = vmul.f32 1.442695, %v2054_v3 }
 0x973   :  { %v2051_v35 = vpop.xlane.xlu1 %2050 }
 0x974   :  { %v2055_v38 = vsub.f32 %v2037_v58, %v2051_v35  ;;  %7654 = vpow2.f32 %v2060_v36  ;;  %v1487_v58 = vadd.f32 %v8663_v37, %v8600_v9 }
 0x975   :  { %7656 = vpow2.f32 %v2056_v62 }
 0x976   :  { %v2062_v49 = vmul.f32 1.442695, %v2055_v38 }
 0x978   :  { %7658 = vpow2.f32 %v2062_v49 }
 0x97d   :  { %v7653_v10 = vpop.eup %7652 }
 0x97e   :  { %v2067_v63 = vsel %vm1083_vm2, %v7653_v10, 0.0 }
 0x97f   :  { %2068 = vadd.xlane.f32.xlu1 %v2067_v63 }
 0x981   :  { %v7655_v1 = vpop.eup %7654 }
 0x982   :  { %v2070_v23 = vsel %vm1083_vm2, %v7655_v1, 0.0  ;;  %v7657_v48 = vpop.eup %7656 }
 0x983   :  { %2071 = vadd.xlane.f32.xlu0 %v2070_v23  ;;  %v2064_v17 = vsel %vm1083_vm2, %v7657_v48, 0.0 }
 0x985   :  { %v7659_v25 = vpop.eup %7658 }
 0x986   :  { %v2073_v18 = vsel %vm1083_vm2, %v7659_v25, 0.0 }
 0x987   :  { %2074 = vadd.xlane.f32.xlu1 %v2073_v18  ;;  %2065 = vadd.xlane.f32.xlu0 %v2064_v17  ;;  %v1482_v17 = vadd.f32 %v8669_v45, %v8606_v20 }
 0x998   :  { %2151 = vrot.lane.b32.xlu1 %v8587_v2, %s7960_s29 }
 0x99c   :  { %2145 = vrot.lane.b32.xlu1 %v8583_v15, %s7960_s29 }
 0x99d   :  { %2153 = vrot.lane.b32.xlu0 %v8434_v33, %s7960_s29 }
 0x9a0   :  { %2147 = vrot.lane.b32.xlu1 %v8432_v32, %s7960_s29 }
 0x9fe   :  { %v7008_v53 = vpop.f32.mrf.mxu1 }
 0x9ff   :  { %v1734_v42 = vadd.f32 %v7008_v53, %v1487_v58 }
 0xa00   :  { %v1717_v54 = vpop.f32.mrf.mxu1 }
 0xa01   :  { %v1732_v57 = vadd.f32 %v1717_v54, %v1479_v56 }
 0xa02   :  { %v7009_v4 = vpop.f32.mrf.mxu1 }
 0xa03   :  { %v1735_v8 = vadd.f32 %v7009_v4, %v1490_v29 }
 0xa04   :  { %v1720_v12 = vpop.f32.mrf.mxu1 }
 0xa05   :  { %v1733_v56 = vadd.f32 %v1720_v12, %v1482_v17 }
 0xa08   :  { %v2069_v14 = vpop.xlane.xlu1 %2068 }
 0xa0c   :  { %v2072_v21 = vpop.xlane.xlu0 %2071 }
 0xa0d   :  { %7660 = vrcp.f32 %v2072_v21 }
 0xa0e   :  { %v7024_v26 = vpop.f32.mrf.mxu1  ;;  %7662 = vrcp.f32 %v2069_v14 }
 0xa10   :  { %v1897_v41 = vpop.f32.mrf.mxu1  ;;  %v2075_v9 = vpop.xlane.xlu1 %2074 }
 0xa11   :  { %7664 = vrcp.f32 %v2075_v9  ;;  %v2066_v37 = vpop.xlane.xlu0 %2065 }
 0xa12   :  { %7666 = vrcp.f32 %v2066_v37  ;;  %v7025_v34 = vpop.f32.mrf.mxu1 }
 0xa13   :  { %v1913_v27 = vpack.c.bf16 %v7025_v34, %v7024_v26 }
 0xa14   :  { %v1900_v7 = vpop.f32.mrf.mxu1  ;;  %v2152_v62 = vpop.permute.xlu1 %2151 }
 0xa15   :  { %v1912_v39 = vpack.c.bf16 %v1900_v7, %v1897_v41  ;;  %v2154_v52 = vpop.permute.xlu0 %2153  ;;  %v2162_v18 = vsel %vm1021_vm1, %v2152_v62, 0 }
 0xa16   :  { %v2165_v23 = vsel %vm1021_vm1, %v2154_v52, 0 }
 0xa17   :  { %7028 = vmatprep.mubr.msk.bf16.mxu1 %vm1021_vm1, %v1912_v39 }
 0xa18   :  { %7029 = vmatmul.mubr.msk.bf16.vlgmr.msra.gmra.mxu1 %vm1021_vm1, %v1913_v27  ;;  %v2146_v63 = vpop.permute.xlu1 %2145 }
 0xa19   :  { %7041 = vmatpush3.bf16.msra.mxu1 %v8448_v46 }
 0xa1a   :  { %7042 = vmatprep.subr.bf16.mxu1 %v8706_v47  ;;  %v7661_v24 = vpop.eup %7660 }
 0xa1b   :  { %v7663_v30 = vpop.eup %7662  ;;  %v2082_v36 = vmul.f32 %v7661_v24, %v7655_v1 }
 0xa1c   :  { %v2081_v55 = vmul.f32 %v7663_v30, %v7653_v10  ;;  %v2148_v10 = vpop.permute.xlu1 %2147 }
 0xa1d   :  { %7043 = vmatpush3.bf16.msra.mxu1 %v8706_v47 }
 0xa1e   :  { %v7665_v31 = vpop.eup %7664  ;;  %7434 = vmatprep.subr.msk.bf16.mxu1 %vm1021_vm1, %v2154_v52 }
 0xa1f   :  { %v7667_v3 = vpop.eup %7666  ;;  %v2083_v35 = vmul.f32 %v7665_v31, %v7659_v25 }
 0xa20   :  { %v2080_v43 = vmul.f32 %v7667_v3, %v7657_v48 }
 0xa21   :  { %v2085_v38 = vpack.c.bf16 %v2083_v35, %v2082_v36 }
 0xa22   :  { %v2084_v49 = vpack.c.bf16 %v2081_v55, %v2080_v43 }
 0xa24   :  { %7044 = vmatprep.mubr.msk.bf16.mxu1 %vm1083_vm2, %v2084_v49 }
 0xa25   :  { %7045 = vmatmul.mubr.msk.bf16.vlgmr.msra.gmra.mxu1 %vm1083_vm2, %v2085_v38 }
 0xa26   :  { %7049 = vmatpush3.bf16.xpose.msra.mxu1 %v2165_v23  ;;  %7052 = vmatprep.mubr.msk.bf16.mxu1 %vm1021_vm1, %v2146_v63 }
 0xa27   :  { %7435 = vmatprep.subr.msk.bf16.mxu1 %vm1021_vm1, %v2152_v62 }
 0xa2e   :  { %7051 = vmatpush3.bf16.xpose.msra.mxu1 %v2162_v18 }
 0xa2f   :  { %7070 = vmatprep.subr.bf16.mxu1 %v8554_v44 }
 0xa35   :  { %7053 = vmatmul.mubr.msk.bf16.vlgmr.msra.gmra.mxu1 %vm1021_vm1, %v2148_v10 }
 0xa36   :  { %7071 = vmatpush3.bf16.msra.mxu1 %v8554_v44 }
 0xad8   :  { %v7030_v1 = vpop.f32.mrf.mxu1 }
 0xad9   :  { %v8722_v48 = vadd.f32 %v7030_v1, %v1734_v42 }
 0xada   :  { %v1960_v25 = vpop.f32.mrf.mxu1 }
 0xadb   :  { %v8726_v58 = vadd.f32 %v1960_v25, %v1732_v57 }
 0xadc   :  { %v7031_v53 = vpop.f32.mrf.mxu1 }
 0xadd   :  { %v8728_v54 = vadd.f32 %v7031_v53, %v1735_v8 }
 0xade   :  { %v1963_v29 = vpop.f32.mrf.mxu1 }
 0xadf   :  { %v8730_v4 = vadd.f32 %v1963_v29, %v1733_v56 }
 0xae5   :  { %v7046_v14 = vpop.f32.mrf.mxu1 }
 0xae7   :  { %v2126_v21 = vpop.f32.mrf.mxu1 }
 0xae9   :  { %v7047_v26 = vpop.f32.mrf.mxu1 }
 0xaea   :  { %v2142_v42 = vpack.c.bf16 %v7047_v26, %v7046_v14 }
 0xaeb   :  { %v2129_v44 = vpop.f32.mrf.mxu1 }
 0xaec   :  { %v2141_v41 = vpack.c.bf16 %v2129_v44, %v2126_v21 }
 0xaee   :  { %7072 = vmatprep.mubr.msk.bf16.mxu1 %vm1021_vm1, %v2141_v41 }
 0xaef   :  { %7073 = vmatmul.mubr.msk.bf16.vlgmr.msra.gmra.mxu1 %vm1021_vm1, %v2142_v42 }
 0xaf5   :  { %v7054_v20 = vpop.f32.mrf.mxu1 }
 0xaf6   :  { %v2210_v8 = vadd.f32 %v7054_v20, %v8460_v51 }
 0xaf7   :  { %v2201_v45 = vpop.f32.mrf.mxu1 }
 0xaf8   :  { %v2202_v57 = vadd.f32 %v2201_v45, %v8455_v50  ;;  %v2222_v27 = vsel %vm1083_vm2, %v2210_v8, -inf }
 0xaf9   :  { %v7055_v12 = vpop.f32.mrf.mxu1 }
 0xafa   :  { %v2216_v9 = vsel %vm1083_vm2, %v2202_v57, -inf  ;;  %v2213_v7 = vadd.f32 %v7055_v12, %v8473_v0 }
 0xafb   :  { %v2204_v37 = vpop.f32.mrf.mxu1  ;;  %2217 = vmax.xlane.f32.xlu0 %v2216_v9 }
 0xafc   :  { %v2205_v34 = vadd.f32 %v2204_v37, %v8466_v59  ;;  %v2225_v24 = vsel %vm1083_vm2, %v2213_v7, -inf }
 0xafe   :  { %v2219_v39 = vsel %vm1083_vm2, %v2205_v34, -inf }
 0xaff   :  { %2220 = vmax.xlane.f32.xlu1 %v2219_v39  ;;  %2223 = vmax.xlane.f32.xlu0 %v2222_v27 }
 0xb03   :  { %2226 = vmax.xlane.f32.xlu0 %v2225_v24 }
 0xb84   :  { %v2218_v50 = vpop.xlane.xlu0 %2217 }
 0xb85   :  { %v2228_v30 = vsub.f32 %v2202_v57, %v2218_v50 }
 0xb87   :  { %v2232_v36 = vmul.f32 1.442695, %v2228_v30 }
 0xb88   :  { %v2221_v51 = vpop.xlane.xlu1 %2220  ;;  %v2224_v52 = vpop.xlane.xlu0 %2223 }
 0xb89   :  { %v2230_v31 = vsub.f32 %v2210_v8, %v2224_v52  ;;  %v2229_v3 = vsub.f32 %v2205_v34, %v2221_v51 }
 0xb8b   :  { %v2236_v62 = vmul.f32 1.442695, %v2230_v31  ;;  %v2234_v0 = vmul.f32 1.442695, %v2229_v3 }
 0xb8c   :  { %v2227_v59 = vpop.xlane.xlu0 %2226 }
 0xb8d   :  { %v2231_v35 = vsub.f32 %v2213_v7, %v2227_v59  ;;  %7668 = vpow2.f32 %v2236_v62 }
 0xb8e   :  { %7670 = vpow2.f32 %v2232_v36 }
 0xb8f   :  { %v2238_v43 = vmul.f32 1.442695, %v2231_v35 }
 0xb91   :  { %7672 = vpow2.f32 %v2238_v43 }
 0xb92   :  { %7674 = vpow2.f32 %v2234_v0 }
 0xb9a   :  { %v7669_v55 = vpop.eup %7668 }
 0xb9b   :  { %v2246_v38 = vsel %vm1083_vm2, %v7669_v55, 0.0  ;;  %v7671_v49 = vpop.eup %7670 }
 0xb9c   :  { %2247 = vadd.xlane.f32.xlu0 %v2246_v38  ;;  %v2240_v10 = vsel %vm1083_vm2, %v7671_v49, 0.0 }
 0xb9e   :  { %v7673_v63 = vpop.eup %7672 }
 0xb9f   :  { %v2249_v23 = vsel %vm1083_vm2, %v7673_v63, 0.0  ;;  %v7675_v18 = vpop.eup %7674 }
 0xba0   :  { %2250 = vadd.xlane.f32.xlu1 %v2249_v23  ;;  %2241 = vadd.xlane.f32.xlu0 %v2240_v10  ;;  %v2243_v1 = vsel %vm1083_vm2, %v7675_v18, 0.0 }
 0xba4   :  { %2244 = vadd.xlane.f32.xlu1 %v2243_v1  ;;  %v7928_v1 = vld [vmem:[%s9843_s21 + $0x8] sm:$0xff] }
 0xbb5   :  { %2264 = vrot.lane.b32.xlu1 %v8706_v47, %s7960_s29 }
 0xbb6   :  { %2266 = vrot.lane.b32.xlu0 %v8448_v46, %s7960_s29 }
 0xbb9   :  { %2443 = vrot.lane.b32.xlu1 %v8434_v33, %s7961_s3 }
 0xbba   :  { %2437 = vrot.lane.b32.xlu0 %v8583_v15, %s7961_s3 }
 0xbbd   :  { %2441 = vrot.lane.b32.xlu1 %v8587_v2, %s7961_s3 }
 0xbbe   :  { %2680 = vrot.lane.b32.xlu0 %v8434_v33, %s7962_s27 }
 0xbc1   :  { %2439 = vrot.lane.b32.xlu1 %v8432_v32, %s7961_s3 }
 0xbc2   :  { %2674 = vrot.lane.b32.xlu0 %v8583_v15, %s7962_s27 }
 0xbc5   :  { %2678 = vrot.lane.b32.xlu1 %v8587_v2, %s7962_s27 }
 0xbc9   :  { %2676 = vrot.lane.b32.xlu1 %v8432_v32, %s7962_s27 }
 0xc25   :  { %v2248_v25 = vpop.xlane.xlu0 %2247 }
 0xc29   :  { %v2251_v17 = vpop.xlane.xlu1 %2250  ;;  %v2242_v53 = vpop.xlane.xlu0 %2241 }
 0xc2a   :  { %7676 = vrcp.f32 %v2251_v17  ;;  %v7929_v17 = vld [vmem:[%s9843_s21 + $0x18] sm:$0xff] }
 0xc2b   :  { %7678 = vrcp.f32 %v2242_v53 }
 0xc2c   :  { %7680 = vrcp.f32 %v2248_v25 }
 0xc2d   :  { %v2245_v56 = vpop.xlane.xlu1 %2244  ;;  %v2267_v33 = vpop.permute.xlu0 %2266 }
 0xc2e   :  { %7682 = vrcp.f32 %v2245_v56  ;;  %7056 = vmatprep.subr.bf16.mxu0 %v2267_v33 }
 0xc2f   :  { %7057 = vmatpush3.bf16.msra.mxu0 %v2267_v33 }
 0xc31   :  { %v2265_v29 = vpop.permute.xlu1 %2264  ;;  %v2438_v7 = vpop.permute.xlu0 %2437 }
 0xc32   :  { %7058 = vmatprep.subr.bf16.mxu0 %v2265_v29 }
 0xc33   :  { %7059 = vmatpush3.bf16.msra.mxu0 %v2265_v29 }
 0xc34   :  { %7064 = vmatprep.subr.bf16.mxu0 %v8522_v28 }
 0xc35   :  { %v2444_v45 = vpop.permute.xlu1 %2443  ;;  %v2681_v24 = vpop.permute.xlu0 %2680 }
 0xc36   :  { %v2455_v39 = vsel %vm1021_vm1, %v2444_v45, 0  ;;  %v2692_v51 = vsel %vm1021_vm1, %v2681_v24, 0 }
 0xc37   :  { %v7677_v15 = vpop.eup %7676 }
 0xc38   :  { %v7679_v2 = vpop.eup %7678  ;;  %v2259_v21 = vmul.f32 %v7677_v15, %v7673_v63  ;;  %v7927_v63 = vld [vmem:[%s9843_s21 + $0x10] sm:$0xff] }
 0xc39   :  { %v7681_v14 = vpop.eup %7680  ;;  %v2256_v26 = vmul.f32 %v7679_v2, %v7671_v49  ;;  %v2442_v27 = vpop.permute.xlu1 %2441 }
 0xc3a   :  { %v2258_v41 = vmul.f32 %v7681_v14, %v7669_v55  ;;  %v2675_v30 = vpop.permute.xlu0 %2674  ;;  %v7926_v55 = vld [vmem:[%s9843_s21] sm:$0xff] }
 0xc3b   :  { %v7683_v32 = vpop.eup %7682 }
 0xc3c   :  { %v2257_v44 = vmul.f32 %v7683_v32, %v7675_v18  ;;  %v2261_v20 = vpack.c.bf16 %v2259_v21, %v2258_v41 }
 0xc3d   :  { %v2440_v50 = vpop.permute.xlu1 %2439 }
 0xc3e   :  { %v2260_v42 = vpack.c.bf16 %v2257_v44, %v2256_v26 }
 0xc40   :  { %7060 = vmatprep.mubr.msk.bf16.mxu0 %vm1083_vm2, %v2260_v42 }
 0xc41   :  { %7061 = vmatmul.mubr.msk.bf16.vlgmr.msra.gmra.mxu0 %vm1083_vm2, %v2261_v20  ;;  %v2679_v52 = vpop.permute.xlu1 %2678 }
 0xc42   :  { %7065 = vmatpush3.bf16.msra.mxu0 %v8522_v28  ;;  %v2452_v28 = vsel %vm1021_vm1, %v2442_v27, 0  ;;  %v2689_v31 = vsel %vm1021_vm1, %v2679_v52, 0 }
 0xc43   :  { %7436 = vmatprep.subr.msk.bf16.mxu0 %vm1021_vm1, %v2444_v45 }
 0xc45   :  { %v2677_v3 = vpop.permute.xlu1 %2676 }
 0xd01   :  { %v7062_v57 = vpop.f32.mrf.mxu0 }
 0xd03   :  { %v2310_v12 = vpop.f32.mrf.mxu0 }
 0xd05   :  { %v7063_v8 = vpop.f32.mrf.mxu0 }
 0xd06   :  { %v2326_v34 = vpack.c.bf16 %v7063_v8, %v7062_v57 }
 0xd07   :  { %v2313_v9 = vpop.f32.mrf.mxu0 }
 0xd08   :  { %v2325_v37 = vpack.c.bf16 %v2313_v9, %v2310_v12 }
 0xd0a   :  { %7066 = vmatprep.mubr.msk.bf16.mxu0 %vm1021_vm1, %v2325_v37 }
 0xd0b   :  { %7067 = vmatmul.mubr.msk.bf16.vlgmr.msra.gmra.mxu0 %vm1021_vm1, %v2326_v34 }
 0xd0c   :  { %7077 = vmatpush3.bf16.xpose.msra.mxu0 %v2455_v39  ;;  %7080 = vmatprep.mubr.msk.bf16.mxu0 %vm1021_vm1, %v2438_v7 }
 0xd0d   :  { %7437 = vmatprep.subr.msk.bf16.mxu0 %vm1021_vm1, %v2442_v27 }
 0xd14   :  { %7079 = vmatpush3.bf16.xpose.msra.mxu0 %v2452_v28 }
 0xd15   :  { %7438 = vmatprep.subr.msk.bf16.mxu0 %vm1021_vm1, %v2681_v24 }
 0xd1b   :  { %7081 = vmatmul.mubr.msk.bf16.vlgmr.msra.gmra.mxu0 %vm1021_vm1, %v2440_v50 }
 0xd1c   :  { %7099 = vmatpush3.bf16.xpose.msra.mxu0 %v2692_v51  ;;  %7102 = vmatprep.mubr.msk.bf16.mxu0 %vm1021_vm1, %v2675_v30 }
 0xd1d   :  { %7439 = vmatprep.subr.msk.bf16.mxu0 %vm1021_vm1, %v2679_v52 }
 0xd24   :  { %7101 = vmatpush3.bf16.xpose.msra.mxu0 %v2689_v31 }
 0xd2b   :  { %7103 = vmatmul.mubr.msk.bf16.vlgmr.msra.gmra.mxu0 %vm1021_vm1, %v2677_v3 }
 0xdcb   :  { %v8784_v62 = vpop.f32.mrf.mxu0 }
 0xdcd   :  { %v8786_v36 = vpop.f32.mrf.mxu0 }
 0xdcf   :  { %v8788_v59 = vpop.f32.mrf.mxu0 }
 0xdd1   :  { %v8790_v35 = vpop.f32.mrf.mxu0 }
 0xddb   :  { %v7082_v0 = vpop.f32.mrf.mxu0 }
 0xddc   :  { %v2500_v23 = vadd.f32 %v7927_v63, %v7082_v0 }
 0xddd   :  { %v2491_v43 = vpop.f32.mrf.mxu0 }
 0xdde   :  { %v2492_v38 = vadd.f32 %v7926_v55, %v2491_v43  ;;  %v2512_v33 = vsel %vm1083_vm2, %v2500_v23, -inf }
 0xddf   :  { %v7083_v49 = vpop.f32.mrf.mxu0 }
 0xde0   :  { %v2506_v18 = vsel %vm1083_vm2, %v2492_v38, -inf  ;;  %v2503_v53 = vadd.f32 %v7929_v17, %v7083_v49 }
 0xde1   :  { %v2494_v10 = vpop.f32.mrf.mxu0  ;;  %2507 = vmax.xlane.f32.xlu0 %v2506_v18 }
 0xde2   :  { %v2495_v25 = vadd.f32 %v7928_v1, %v2494_v10  ;;  %v2515_v29 = vsel %vm1083_vm2, %v2503_v53, -inf }
 0xde4   :  { %v2509_v56 = vsel %vm1083_vm2, %v2495_v25, -inf }
 0xde5   :  { %2510 = vmax.xlane.f32.xlu1 %v2509_v56  ;;  %2513 = vmax.xlane.f32.xlu0 %v2512_v33 }
 0xde9   :  { %2516 = vmax.xlane.f32.xlu0 %v2515_v29 }
 0xdeb   :  { %v7104_v28 = vpop.f32.mrf.mxu0 }
 0xdec   :  { %v2737_v31 = vadd.f32 %v7927_v63, %v7104_v28 }
 0xded   :  { %v2728_v24 = vpop.f32.mrf.mxu0 }
 0xdee   :  { %v2729_v52 = vadd.f32 %v7926_v55, %v2728_v24 }
 0xdef   :  { %v7105_v50 = vpop.f32.mrf.mxu0 }
 0xdf0   :  { %v2740_v0 = vadd.f32 %v7929_v17, %v7105_v50  ;;  %v2743_v43 = vsel %vm1083_vm2, %v2729_v52, -inf }
 0xdf1   :  { %v2731_v30 = vpop.f32.mrf.mxu0 }
 0xdf2   :  { %v2732_v51 = vadd.f32 %v7928_v1, %v2731_v30  ;;  %v2752_v49 = vsel %vm1083_vm2, %v2740_v0, -inf  ;;  %v2912_v30 = vadd.f32 %v8730_v4, %v8221_v6  ;;  %v2914_v6 = vadd.f32 %v8728_v54, %v8232_v22 }
 0xdf4   :  { %v2746_v3 = vsel %vm1083_vm2, %v2732_v51, -inf }
 0xe6a   :  { %v2508_v15 = vpop.xlane.xlu0 %2507 }
 0xe6b   :  { %v2518_v2 = vsub.f32 %v2492_v38, %v2508_v15  ;;  %v2749_v38 = vsel %vm1083_vm2, %v2737_v31, -inf }
 0xe6d   :  { %v2522_v41 = vmul.f32 1.442695, %v2518_v2 }
 0xe6e   :  { %v2511_v14 = vpop.xlane.xlu1 %2510  ;;  %v2514_v32 = vpop.xlane.xlu0 %2513 }
 0xe6f   :  { %v2520_v21 = vsub.f32 %v2500_v23, %v2514_v32  ;;  %v2519_v26 = vsub.f32 %v2495_v25, %v2511_v14 }
 0xe71   :  { %v2526_v44 = vmul.f32 1.442695, %v2520_v21  ;;  %v2524_v45 = vmul.f32 1.442695, %v2519_v26 }
 0xe72   :  { %v2517_v42 = vpop.xlane.xlu0 %2516 }
 0xe73   :  { %v2521_v20 = vsub.f32 %v2503_v53, %v2517_v42  ;;  %7684 = vpow2.f32 %v2526_v44 }
 0xe74   :  { %7686 = vpow2.f32 %v2522_v41 }
 0xe75   :  { %v2528_v57 = vmul.f32 1.442695, %v2521_v20 }
 0xe77   :  { %7688 = vpow2.f32 %v2528_v57 }
 0xe78   :  { %7690 = vpow2.f32 %v2524_v45 }
 0xe80   :  { %v7685_v12 = vpop.eup %7684 }
 0xe81   :  { %v2536_v8 = vsel %vm1083_vm2, %v7685_v12, 0.0  ;;  %v7687_v9 = vpop.eup %7686 }
 0xe82   :  { %2537 = vadd.xlane.f32.xlu0 %v2536_v8  ;;  %v2530_v39 = vsel %vm1083_vm2, %v7687_v9, 0.0 }
 0xe84   :  { %v7689_v37 = vpop.eup %7688 }
 0xe85   :  { %v2539_v34 = vsel %vm1083_vm2, %v7689_v37, 0.0  ;;  %v7691_v7 = vpop.eup %7690 }
 0xe86   :  { %2540 = vadd.xlane.f32.xlu1 %v2539_v34  ;;  %2531 = vadd.xlane.f32.xlu0 %v2530_v39  ;;  %v2533_v27 = vsel %vm1083_vm2, %v7691_v7, 0.0 }
 0xe8a   :  { %2534 = vadd.xlane.f32.xlu1 %v2533_v27 }
 0xe9b   :  { %2552 = vrot.lane.b32.xlu1 %v8706_v47, %s7961_s3 }
 0xe9c   :  { %2554 = vrot.lane.b32.xlu0 %v8448_v46, %s7961_s3 }
 0xebb   :  { %2747 = vmax.xlane.f32.xlu0 %v2746_v3 }
 0xebf   :  { %2744 = vmax.xlane.f32.xlu1 %v2743_v43  ;;  %2750 = vmax.xlane.f32.xlu0 %v2749_v38 }
 0xec3   :  { %2753 = vmax.xlane.f32.xlu1 %v2752_v49 }
 0xf0b   :  { %v2538_v23 = vpop.xlane.xlu0 %2537 }
 0xf0f   :  { %v2541_v18 = vpop.xlane.xlu1 %2540  ;;  %v2532_v10 = vpop.xlane.xlu0 %2531 }
 0xf10   :  { %7692 = vrcp.f32 %v2541_v18 }
 0xf11   :  { %7694 = vrcp.f32 %v2532_v10 }
 0xf12   :  { %7696 = vrcp.f32 %v2538_v23 }
 0xf13   :  { %v2535_v55 = vpop.xlane.xlu1 %2534  ;;  %v2555_v63 = vpop.permute.xlu0 %2554 }
 0xf14   :  { %7698 = vrcp.f32 %v2535_v55  ;;  %7084 = vmatprep.subr.bf16.mxu1 %v2555_v63 }
 0xf15   :  { %7085 = vmatpush3.bf16.msra.mxu1 %v2555_v63 }
 0xf17   :  { %v2553_v1 = vpop.permute.xlu1 %2552 }
 0xf18   :  { %7086 = vmatprep.subr.bf16.mxu1 %v2553_v1 }
 0xf19   :  { %7087 = vmatpush3.bf16.msra.mxu1 %v2553_v1 }
 0xf1a   :  { %7092 = vmatprep.subr.bf16.mxu1 %v8647_v5 }
 0xf1d   :  { %v7693_v25 = vpop.eup %7692 }
 0xf1e   :  { %v7695_v17 = vpop.eup %7694  ;;  %v2549_v33 = vmul.f32 %v7693_v25, %v7689_v37 }
 0xf1f   :  { %v7697_v53 = vpop.eup %7696  ;;  %v2546_v29 = vmul.f32 %v7695_v17, %v7687_v9 }
 0xf20   :  { %v2548_v2 = vmul.f32 %v7697_v53, %v7685_v12 }
 0xf21   :  { %v7699_v56 = vpop.eup %7698 }
 0xf22   :  { %v2547_v15 = vmul.f32 %v7699_v56, %v7691_v7  ;;  %v2551_v32 = vpack.c.bf16 %v2549_v33, %v2548_v2 }
 0xf24   :  { %v2550_v14 = vpack.c.bf16 %v2547_v15, %v2546_v29 }
 0xf26   :  { %7088 = vmatprep.mubr.msk.bf16.mxu1 %vm1083_vm2, %v2550_v14 }
 0xf27   :  { %7089 = vmatmul.mubr.msk.bf16.vlgmr.msra.gmra.mxu1 %vm1083_vm2, %v2551_v32 }
 0xf28   :  { %7093 = vmatpush3.bf16.msra.mxu1 %v8647_v5 }
 0xf44   :  { %v2748_v21 = vpop.xlane.xlu0 %2747 }
 0xf45   :  { %v2756_v20 = vsub.f32 %v2732_v51, %v2748_v21  ;;  %v8840_v51 = vld [vmem:[%s9822_s10] ss:$0 sm:$0xff] }
 0xf46   :  { %v8847_v3 = vadd.f32 %v8840_v51, %v2912_v30 }
 0xf47   :  { %v2761_v12 = vmul.f32 1.442695, %v2756_v20 }
 0xf48   :  { %v2745_v26 = vpop.xlane.xlu1 %2744  ;;  %v2751_v41 = vpop.xlane.xlu0 %2750  ;;  %v2939_v4 = vsel %vm560_vm0, %v8847_v3, 0.0 }
 0xf49   :  { %v2755_v44 = vsub.f32 %v2729_v52, %v2745_v26  ;;  %v2757_v42 = vsub.f32 %v2737_v31, %v2751_v41  ;;  %v2911_v52 = vadd.f32 %v8726_v58, %v8214_v60  ;;  %v2913_v31 = vadd.f32 %v8722_v48, %v8228_v16  ;;  %v7074_v58 = vpop.f32.mrf.mxu1 }
 0xf4a   :  { %v8860_v60 = vadd.f32 %v8840_v51, %v2914_v6 }
 0xf4b   :  { %v2759_v45 = vmul.f32 1.442695, %v2755_v44  ;;  %v2763_v57 = vmul.f32 1.442695, %v2757_v42  ;;  %v2422_v54 = vpop.f32.mrf.mxu1  ;;  %v2431_v42 = vadd.f32 %v7074_v58, %v8784_v62 }
 0xf4c   :  { %v2754_v8 = vpop.xlane.xlu1 %2753  ;;  %v2945_v22 = vsel %vm560_vm0, %v8860_v60, 0.0 }
 0xf4d   :  { %v2758_v9 = vsub.f32 %v2740_v0, %v2754_v8  ;;  %7700 = vpow2.f32 %v2763_v57  ;;  %v7075_v0 = vpop.f32.mrf.mxu1 }
 0xf4e   :  { %7702 = vpow2.f32 %v2759_v45  ;;  %v2423_v45 = vadd.f32 %v2422_v54, %v8786_v36 }
 0xf4f   :  { %v2765_v37 = vmul.f32 1.442695, %v2758_v9  ;;  %v2425_v43 = vpop.f32.mrf.mxu1  ;;  %v2434_v9 = vadd.f32 %v7075_v0, %v8788_v59 }
 0xf51   :  { %7704 = vpow2.f32 %v2765_v37 }
 0xf52   :  { %7706 = vpow2.f32 %v2761_v12 }
 0xf5a   :  { %v8824_v34 = vpop.eup %7700 }
 0xf5b   :  { %v2773_v5 = vsel %vm1083_vm2, %v8824_v34, 0.0  ;;  %v7703_v7 = vpop.eup %7702 }
 0xf5c   :  { %2774 = vadd.xlane.f32.xlu0 %v2773_v5  ;;  %v2767_v24 = vsel %vm1083_vm2, %v7703_v7, 0.0 }
 0xf5e   :  { %v7705_v39 = vpop.eup %7704 }
 0xf5f   :  { %v2776_v27 = vsel %vm1083_vm2, %v7705_v39, 0.0  ;;  %v7707_v28 = vpop.eup %7706 }
 0xf60   :  { %2777 = vadd.xlane.f32.xlu1 %v2776_v27  ;;  %2768 = vadd.xlane.f32.xlu0 %v2767_v24  ;;  %v2770_v50 = vsel %vm1083_vm2, %v7707_v28, 0.0 }
 0xf64   :  { %2771 = vadd.xlane.f32.xlu1 %v2770_v50 }
 0xf75   :  { %2789 = vrot.lane.b32.xlu1 %v8706_v47, %s7962_s27  ;;  %v8850_v47 = vadd.f32 %v8840_v51, %v2911_v52 }
 0xf76   :  { %2791 = vrot.lane.b32.xlu0 %v8448_v46, %s7962_s27  ;;  %v8855_v46 = vadd.f32 %v8840_v51, %v2913_v31 }
 0xf77   :  { %v2936_v16 = vsel %vm560_vm0, %v8850_v47, 0.0 }
 0xf78   :  { %v2942_v48 = vsel %vm560_vm0, %v8855_v46, 0.0 }
 0xf95   :  { %2940 = vadd.xlane.f32.xlu0 %v2939_v4 }
 0xf99   :  { %2937 = vadd.xlane.f32.xlu1 %v2936_v16  ;;  %2943 = vadd.xlane.f32.xlu0 %v2942_v48 }
 0xf9d   :  { %2946 = vadd.xlane.f32.xlu1 %v2945_v22 }
 0xfe5   :  { %v2775_v38 = vpop.xlane.xlu0 %2774 }
 0xfe7   :  { %v7090_v49 = vpop.f32.mrf.mxu1 }
 0xfe9   :  { %v2778_v23 = vpop.xlane.xlu1 %2777  ;;  %v2598_v18 = vpop.f32.mrf.mxu1 }
 0xfea   :  { %v2769_v10 = vpop.xlane.xlu0 %2768  ;;  %7708 = vrcp.f32 %v2778_v23 }
 0xfeb   :  { %v7091_v55 = vpop.f32.mrf.mxu1  ;;  %7710 = vrcp.f32 %v2769_v10 }
 0xfec   :  { %7712 = vrcp.f32 %v2775_v38  ;;  %v2614_v53 = vpack.c.bf16 %v7091_v55, %v7090_v49 }
 0xfed   :  { %v2601_v63 = vpop.f32.mrf.mxu1  ;;  %v2772_v1 = vpop.xlane.xlu1 %2771 }
 0xfee   :  { %v2613_v25 = vpack.c.bf16 %v2601_v63, %v2598_v18  ;;  %7714 = vrcp.f32 %v2772_v1  ;;  %v2792_v17 = vpop.permute.xlu0 %2791 }
 0xfef   :  { %7106 = vmatprep.subr.bf16.mxu1 %v2792_v17 }
 0xff0   :  { %7094 = vmatprep.mubr.msk.bf16.mxu1 %vm1021_vm1, %v2613_v25 }
 0xff1   :  { %7095 = vmatmul.mubr.msk.bf16.vlgmr.msra.gmra.mxu1 %vm1021_vm1, %v2614_v53  ;;  %v2790_v56 = vpop.permute.xlu1 %2789 }
 0xff2   :  { %7107 = vmatpush3.bf16.msra.mxu1 %v2792_v17 }
 0xff3   :  { %7108 = vmatprep.subr.bf16.mxu1 %v2790_v56 }
 0xff6   :  { %7109 = vmatpush3.bf16.msra.mxu1 %v2790_v56 }
 0xff7   :  { %7114 = vmatprep.subr.bf16.mxu1 %v8676_v40  ;;  %v7709_v33 = vpop.eup %7708 }
 0xff8   :  { %v7711_v29 = vpop.eup %7710  ;;  %v2786_v14 = vmul.f32 %v7709_v33, %v7705_v39 }
 0xff9   :  { %v7713_v15 = vpop.eup %7712  ;;  %v2783_v32 = vmul.f32 %v7711_v29, %v7703_v7 }
 0xffa   :  { %v2785_v26 = vmul.f32 %v7713_v15, %v8824_v34  ;;  %v2426_v34 = vadd.f32 %v2425_v43, %v8790_v35 }
 0xffb   :  { %v7715_v2 = vpop.eup %7714 }
 0xffc   :  { %v2784_v21 = vmul.f32 %v7715_v2, %v7707_v28  ;;  %v2788_v41 = vpack.c.bf16 %v2786_v14, %v2785_v26 }
 0xffe   :  { %v2787_v44 = vpack.c.bf16 %v2784_v21, %v2783_v32 }
0x1000   :  { %7110 = vmatprep.mubr.msk.bf16.mxu1 %vm1083_vm2, %v2787_v44  ;;  %v7532_v44 = vld [vmem:[%s9825_s13 + $0x18] sm:$0xff]  }
0x1001   :  { %7111 = vmatmul.mubr.msk.bf16.vlgmr.msra.gmra.mxu1 %vm1083_vm2, %v2788_v41  ;;  %7120 = vmatprep.subr.bf16.mxu0 %v7532_v44  ;;  %v7533_v41 = vld [vmem:[%s9825_s13 + $0x10] sm:$0xff]  }
0x1002   :  { %7115 = vmatpush3.bf16.msra.mxu1 %v8676_v40  ;;  %7121 = vmatpush3.bf16.msra.mxu0 %v7532_v44 }
0x1003   :  { %7122 = vmatprep.subr.bf16.mxu0 %v7533_v41 }
0x1006   :  { %7123 = vmatpush3.bf16.msra.mxu0 %v7533_v41  ;;  %v7537_v41 = vld [vmem:[%s9827_s15 + $0x30] sm:$0xff]  }
0x101e   :  { %v2941_v36 = vpop.xlane.xlu0 %2940 }
0x101f   :  { %v2961_v38 = vmul.f32 0.015625, %v2941_v36 }
0x1021   :  { %v8900_v1 = vsub.f32 %v8847_v3, %v2961_v38 }
0x1022   :  { %v2938_v59 = vpop.xlane.xlu1 %2937  ;;  %v2944_v16 = vpop.xlane.xlu0 %2943 }
0x1023   :  { %v2960_v35 = vmul.f32 0.015625, %v2938_v59  ;;  %v2962_v23 = vmul.f32 0.015625, %v2944_v16  ;;  %v2977_v33 = vmul.f32 %v8900_v1, %v8900_v1 }
0x1025   :  { %v8887_v49 = vsub.f32 %v8850_v47, %v2960_v35  ;;  %v8903_v25 = vsub.f32 %v8855_v46, %v2962_v23  ;;  %v2987_v14 = vsel %vm560_vm0, %v2977_v33, 0.0  ;;  %v8977_v33 = vld [vmem:[%s9824_s12] ss:$0 sm:$0xff] }
0x1026   :  { %v2947_v18 = vpop.xlane.xlu1 %2946 }
0x1027   :  { %v2963_v17 = vmul.f32 0.015625, %v2947_v18  ;;  %v2976_v56 = vmul.f32 %v8887_v49, %v8887_v49  ;;  %v2978_v2 = vmul.f32 %v8903_v25, %v8903_v25 }
0x1029   :  { %v8917_v29 = vsub.f32 %v8860_v60, %v2963_v17  ;;  %v2990_v32 = vsel %vm560_vm0, %v2978_v2, 0.0 }
0x102b   :  { %v2979_v21 = vmul.f32 %v8917_v29, %v8917_v29 }
0x102d   :  { %v2993_v26 = vsel %vm560_vm0, %v2979_v21, 0.0 }
0x10b1   :  { %v7096_v20 = vpop.f32.mrf.mxu1 }
0x10b2   :  { %v2672_v57 = vadd.f32 %v7096_v20, %v2431_v42  ;;  %v7534_v42 = vld [vmem:[%s9825_s13 + $0x8] sm:$0xff]   ;;  %v7535_v20 = vld [vmem:[%s9825_s13] sm:$0xff]  }
0x10b3   :  { %v2655_v8 = vpop.f32.mrf.mxu1  ;;  %7124 = vmatprep.subr.bf16.mxu0 %v7534_v42 }
0x10b4   :  { %v2670_v12 = vadd.f32 %v2655_v8, %v2423_v45  ;;  %7125 = vmatpush3.bf16.msra.mxu0 %v7534_v42  ;;  %v7538_v42 = vld [vmem:[%s9827_s15 + $0x28] sm:$0xff]  }
0x10b5   :  { %v7097_v37 = vpop.f32.mrf.mxu1  ;;  %7126 = vmatprep.subr.bf16.mxu0 %v7535_v20 }
0x10b6   :  { %v2673_v5 = vadd.f32 %v7097_v37, %v2434_v9 }
0x10b7   :  { %v2658_v7 = vpop.f32.mrf.mxu1 }
0x10b8   :  { %v2671_v39 = vadd.f32 %v2658_v7, %v2426_v34  ;;  %7127 = vmatpush3.bf16.msra.mxu0 %v7535_v20  ;;  %v7539_v20 = vld [vmem:[%s9827_s15 + $0x20] sm:$0xff]  }
0x10c1   :  { %v7112_v27 = vpop.f32.mrf.mxu1 }
0x10c3   :  { %v2835_v28 = vpop.f32.mrf.mxu1 }
0x10c5   :  { %v7113_v24 = vpop.f32.mrf.mxu1 }
0x10c6   :  { %v2851_v62 = vpack.c.bf16 %v7113_v24, %v7112_v27 }
0x10c7   :  { %v2838_v40 = vpop.f32.mrf.mxu1 }
0x10c8   :  { %v2850_v50 = vpack.c.bf16 %v2838_v40, %v2835_v28 }
0x10ca   :  { %7116 = vmatprep.mubr.msk.bf16.mxu1 %vm1021_vm1, %v2850_v50 }
0x10cb   :  { %7117 = vmatmul.mubr.msk.bf16.vlgmr.msra.gmra.mxu1 %vm1021_vm1, %v2851_v62 }
0x118b   :  { %v7118_v30 = vpop.f32.mrf.mxu1 }
0x118c   :  { %v2909_v52 = vadd.f32 %v7118_v30, %v2672_v57 }
0x118d   :  { %v2892_v31 = vpop.f32.mrf.mxu1 }
0x118e   :  { %v2907_v6 = vadd.f32 %v2892_v31, %v2670_v12  ;;  %v2917_v48 = vadd.f32 %v2909_v52, %v8275_v13 }
0x118f   :  { %v7119_v4 = vpop.f32.mrf.mxu1 }
0x1190   :  { %v2915_v22 = vadd.f32 %v2907_v6, %v8260_v61  ;;  %v2910_v58 = vadd.f32 %v7119_v4, %v2673_v5  ;;  %v8890_v10 = vadd.f32 %v8840_v51, %v2917_v48 }
0x1191   :  { %v2895_v54 = vpop.f32.mrf.mxu1 }
0x1192   :  { %v8884_v0 = vadd.f32 %v8840_v51, %v2915_v22  ;;  %v2908_v43 = vadd.f32 %v2895_v54, %v2671_v39  ;;  %v2918_v55 = vadd.f32 %v2910_v58, %v8280_v19 }
0x1194   :  { %v2916_v13 = vadd.f32 %v2908_v43, %v8271_v11  ;;  %v2948_v61 = vsel %vm560_vm0, %v8884_v0, 0.0  ;;  %v8906_v53 = vadd.f32 %v8840_v51, %v2918_v55  ;;  %v2954_v11 = vsel %vm560_vm0, %v8890_v10, 0.0 }
0x1195   :  { %2949 = vadd.xlane.f32.xlu0 %v2948_v61 }
0x1196   :  { %v8897_v63 = vadd.f32 %v8840_v51, %v2916_v13  ;;  %v2984_v51 = vsel %vm560_vm0, %v2976_v56, 0.0  ;;  %v2957_v15 = vsel %vm560_vm0, %v8906_v53, 0.0  ;;  %v8969_v13 = vld [vmem:[%s9823_s11] ss:$0 sm:$0xff] }
0x1198   :  { %v2951_v19 = vsel %vm560_vm0, %v8897_v63, 0.0 }
0x1199   :  { %2955 = vadd.xlane.f32.xlu0 %v2954_v11  ;;  %2952 = vadd.xlane.f32.xlu1 %v2951_v19 }
0x119d   :  { %2985 = vadd.xlane.f32.xlu0 %v2984_v51  ;;  %2958 = vadd.xlane.f32.xlu1 %v2957_v15 }
0x11a1   :  { %2988 = vadd.xlane.f32.xlu1 %v2987_v14  ;;  %2991 = vadd.xlane.f32.xlu0 %v2990_v32 }
0x11a5   :  { %2994 = vadd.xlane.f32.xlu1 %v2993_v26 }
0x121e   :  { %v2950_v45 = vpop.xlane.xlu0 %2949 }
0x121f   :  { %v2964_v57 = vmul.f32 0.015625, %v2950_v45  ;;  %v7540_v45 = vld [vmem:[%s9827_s15 + $0x18] sm:$0xff]  }
0x1221   :  { %v8942_v8 = vsub.f32 %v8884_v0, %v2964_v57  ;;  %v7541_v57 = vld [vmem:[%s9827_s15 + $0x10] sm:$0xff]  }
0x1222   :  { %v2953_v9 = vpop.xlane.xlu1 %2952  ;;  %v2956_v12 = vpop.xlane.xlu0 %2955 }
0x1223   :  { %v2965_v37 = vmul.f32 0.015625, %v2953_v9  ;;  %v2966_v34 = vmul.f32 0.015625, %v2956_v12  ;;  %v2980_v5 = vmul.f32 %v8942_v8, %v8942_v8  ;;  %v7542_v9 = vld [vmem:[%s9827_s15 + $0x8] sm:$0xff]   ;;  %v7543_v12 = vld [vmem:[%s9827_s15] sm:$0xff]  }
0x1225   :  { %v8947_v7 = vsub.f32 %v8897_v63, %v2965_v37  ;;  %v8950_v39 = vsub.f32 %v8890_v10, %v2966_v34  ;;  %v2996_v27 = vsel %vm560_vm0, %v2980_v5, 0.0 }
0x1226   :  { %v2959_v28 = vpop.xlane.xlu1 %2958  ;;  %2997 = vadd.xlane.f32.xlu0 %v2996_v27  ;;  %v2986_v24 = vpop.xlane.xlu0 %2985 }
0x1227   :  { %v2967_v40 = vmul.f32 0.015625, %v2959_v28  ;;  %v3008_v50 = vmul.f32 0.015625, %v2986_v24  ;;  %v2981_v62 = vmul.f32 %v8947_v7, %v8947_v7  ;;  %v2982_v36 = vmul.f32 %v8950_v39, %v8950_v39 }
0x1229   :  { %v8958_v30 = vsub.f32 %v8906_v53, %v2967_v40  ;;  %v3016_v59 = vadd.f32 1e-05, %v3008_v50  ;;  %v2999_v52 = vsel %vm560_vm0, %v2981_v62, 0.0  ;;  %v3002_v31 = vsel %vm560_vm0, %v2982_v36, 0.0 }
0x122a   :  { %3000 = vadd.xlane.f32.xlu1 %v2999_v52  ;;  %v2989_v6 = vpop.xlane.xlu1 %2988  ;;  %3003 = vadd.xlane.f32.xlu0 %v3002_v31  ;;  %v2992_v35 = vpop.xlane.xlu0 %2991 }
0x122b   :  { %7716 = vrsqrt.f32 %v3016_v59  ;;  %v3009_v4 = vmul.f32 0.015625, %v2989_v6  ;;  %v3010_v16 = vmul.f32 0.015625, %v2992_v35  ;;  %v2983_v48 = vmul.f32 %v8958_v30, %v8958_v30 }
0x122d   :  { %v3017_v22 = vadd.f32 1e-05, %v3009_v4  ;;  %v3018_v58 = vadd.f32 1e-05, %v3010_v16  ;;  %v3005_v54 = vsel %vm560_vm0, %v2983_v48, 0.0 }
0x122e   :  { %3006 = vadd.xlane.f32.xlu1 %v3005_v54  ;;  %v2995_v43 = vpop.xlane.xlu1 %2994 }
0x122f   :  { %7718 = vrsqrt.f32 %v3017_v22  ;;  %v3011_v38 = vmul.f32 0.015625, %v2995_v43 }
0x1230   :  { %7720 = vrsqrt.f32 %v3018_v58 }
0x1231   :  { %v3019_v23 = vadd.f32 1e-05, %v3011_v38 }
0x1233   :  { %7722 = vrsqrt.f32 %v3019_v23 }
0x1238   :  { %v7717_v18 = vpop.eup %7716 }
0x1239   :  { %v3032_v55 = vmul.f32 %v7717_v18, %v8887_v49 }
0x123b   :  { %v3046_v19 = vmul.f32 %v8969_v13, %v3032_v55 }
0x123c   :  { %v7719_v61 = vpop.eup %7718 }
0x123d   :  { %v7721_v17 = vpop.eup %7720  ;;  %v3033_v11 = vmul.f32 %v7719_v61, %v8900_v1  ;;  %v3060_v2 = vadd.f32 %v8977_v33, %v3046_v19 }
0x123e   :  { %v3034_v56 = vmul.f32 %v7721_v17, %v8903_v25  ;;  %v6370_v17 = vld [vmem:[%s9826_s14] ss:$0 sm:$0xff] }
0x123f   :  { %v3047_v49 = vmul.f32 %v8969_v13, %v3033_v11 }
0x1240   :  { %v7723_v51 = vpop.eup %7722  ;;  %v3048_v1 = vmul.f32 %v8969_v13, %v3034_v56 }
0x1241   :  { %v3035_v15 = vmul.f32 %v7723_v51, %v8917_v29  ;;  %v3061_v14 = vadd.f32 %v8977_v33, %v3047_v49  ;;  %v7536_v29 = vld [vmem:[%s9827_s15 + $0x38] sm:$0xff]  }
0x1242   :  { %v3062_v25 = vadd.f32 %v8977_v33, %v3048_v1  ;;  %7136 = vmatprep.subr.bf16.mxu1 %v7536_v29 }
0x1243   :  { %v3068_v32 = vpack.c.bf16 %v3061_v14, %v3060_v2  ;;  %v3049_v21 = vmul.f32 %v8969_v13, %v3035_v15  ;;  %7137 = vmatpush3.bf16.msra.mxu1 %v7536_v29 }
0x1244   :  { %7138 = vmatprep.subr.bf16.mxu1 %v7537_v41 }
0x1245   :  { %7128 = vmatprep.mubr.msk.bf16.mxu0 %vm560_vm0, %v3068_v32  ;;  %v3063_v26 = vadd.f32 %v8977_v33, %v3049_v21 }
0x1247   :  { %v3069_v44 = vpack.c.bf16 %v3063_v26, %v3062_v25  ;;  %7139 = vmatpush3.bf16.msra.mxu1 %v7537_v41 }
0x1248   :  { %7140 = vmatprep.subr.bf16.mxu1 %v7538_v42 }
0x1249   :  { %7129 = vmatmul.mubr.msk.bf16.vlgmr.msra.gmra.mxu0 %vm560_vm0, %v3069_v44 }
0x124b   :  { %7141 = vmatpush3.bf16.msra.mxu1 %v7538_v42 }
0x124c   :  { %7142 = vmatprep.subr.bf16.mxu1 %v7539_v20 }
0x124f   :  { %7143 = vmatpush3.bf16.msra.mxu1 %v7539_v20 }
0x1250   :  { %7144 = vmatprep.subr.bf16.mxu1 %v7540_v45 }
0x1253   :  { %7145 = vmatpush3.bf16.msra.mxu1 %v7540_v45 }
0x1254   :  { %7146 = vmatprep.subr.bf16.mxu1 %v7541_v57 }
0x1257   :  { %7147 = vmatpush3.bf16.msra.mxu1 %v7541_v57 }
0x1258   :  { %7148 = vmatprep.subr.bf16.mxu1 %v7542_v9 }
0x125b   :  { %7149 = vmatpush3.bf16.msra.mxu1 %v7542_v9 }
0x125c   :  { %7150 = vmatprep.subr.bf16.mxu1 %v7543_v12 }
0x125f   :  { %7151 = vmatpush3.bf16.msra.mxu1 %v7543_v12 }
0x12af   :  { %v2998_v37 = vpop.xlane.xlu0 %2997 }
0x12b0   :  { %v3012_v34 = vmul.f32 0.015625, %v2998_v37 }
0x12b2   :  { %v3020_v5 = vadd.f32 1e-05, %v3012_v34 }
0x12b3   :  { %v3001_v27 = vpop.xlane.xlu1 %3000  ;;  %v3004_v28 = vpop.xlane.xlu0 %3003 }
0x12b4   :  { %7724 = vrsqrt.f32 %v3020_v5  ;;  %v3013_v24 = vmul.f32 0.015625, %v3001_v27  ;;  %v3014_v40 = vmul.f32 0.015625, %v3004_v28 }
0x12b6   :  { %v3021_v50 = vadd.f32 1e-05, %v3013_v24  ;;  %v3022_v62 = vadd.f32 1e-05, %v3014_v40 }
0x12b7   :  { %v3007_v36 = vpop.xlane.xlu1 %3006 }
0x12b8   :  { %7726 = vrsqrt.f32 %v3021_v50  ;;  %v3015_v59 = vmul.f32 0.015625, %v3007_v36 }
0x12b9   :  { %7728 = vrsqrt.f32 %v3022_v62 }
0x12ba   :  { %v3023_v52 = vadd.f32 1e-05, %v3015_v59 }
0x12bc   :  { %7730 = vrsqrt.f32 %v3023_v52 }
0x12c1   :  { %v7725_v31 = vpop.eup %7724 }
0x12c2   :  { %v3036_v6 = vmul.f32 %v7725_v31, %v8942_v8 }
0x12c4   :  { %v3050_v48 = vmul.f32 %v8969_v13, %v3036_v6 }
0x12c5   :  { %v7727_v35 = vpop.eup %7726 }
0x12c6   :  { %v7729_v4 = vpop.eup %7728  ;;  %v3037_v16 = vmul.f32 %v7727_v35, %v8947_v7  ;;  %v3064_v43 = vadd.f32 %v8977_v33, %v3050_v48 }
0x12c7   :  { %v3038_v22 = vmul.f32 %v7729_v4, %v8950_v39 }
0x12c8   :  { %v3051_v58 = vmul.f32 %v8969_v13, %v3037_v16 }
0x12c9   :  { %v7731_v54 = vpop.eup %7730  ;;  %v3052_v18 = vmul.f32 %v8969_v13, %v3038_v22 }
0x12ca   :  { %v3065_v38 = vadd.f32 %v8977_v33, %v3051_v58  ;;  %v3039_v23 = vmul.f32 %v7731_v54, %v8958_v30 }
0x12cb   :  { %v3066_v7 = vadd.f32 %v8977_v33, %v3052_v18 }
0x12cc   :  { %v3070_v8 = vpack.c.bf16 %v3065_v38, %v3064_v43  ;;  %v3053_v55 = vmul.f32 %v8969_v13, %v3039_v23 }
0x12ce   :  { %7132 = vmatprep.mubr.msk.bf16.mxu0 %vm560_vm0, %v3070_v8  ;;  %v3067_v39 = vadd.f32 %v8977_v33, %v3053_v55 }
0x12d0   :  { %v3071_v61 = vpack.c.bf16 %v3067_v39, %v3066_v7 }
0x12d2   :  { %7133 = vmatmul.mubr.msk.bf16.gmra.mxu0 %vm560_vm0, %v3071_v61 }
0x1309   :  { %v7130_v11 = vpop.f32.mrf.mxu0 }
0x130a   :  { %v3166_v30 = vadd.f32 %v7130_v11, %v6370_v17 }
0x130b   :  { %v3157_v19 = vpop.f32.mrf.mxu0 }
0x130c   :  { %v3158_v56 = vadd.f32 %v6370_v17, %v3157_v19  ;;  %v3198_v49 = vmul.f32 0.70710677, %v3166_v30  ;;  %v3190_v9 = vmul.f32 0.5, %v3166_v30 }
0x130d   :  { %v7131_v51 = vpop.f32.mrf.mxu0 }
0x130e   :  { %v3196_v13 = vmul.f32 0.70710677, %v3158_v56  ;;  %v3169_v15 = vadd.f32 %v7131_v51, %v6370_v17  ;;  %v3188_v20 = vmul.f32 0.5, %v3158_v56  ;;  %v6379_v51 = vld [vmem:[%s9828_s16] ss:$0 sm:$0xff] }
0x130f   :  { %v3160_v2 = vpop.f32.mrf.mxu0 }
0x1310   :  { %7732 = verf.f32 %v3196_v13  ;;  %v3199_v14 = vmul.f32 0.70710677, %v3169_v15  ;;  %v3161_v1 = vadd.f32 %v6370_v17, %v3160_v2  ;;  %v3191_v42 = vmul.f32 0.5, %v3169_v15 }
0x1311   :  { %7734 = verf.f32 %v3198_v49 }
0x1312   :  { %7736 = verf.f32 %v3199_v14  ;;  %v3197_v33 = vmul.f32 0.70710677, %v3161_v1  ;;  %v3189_v45 = vmul.f32 0.5, %v3161_v1 }
0x1314   :  { %7738 = verf.f32 %v3197_v33 }
0x131d   :  { %v7733_v32 = vpop.eup %7732 }
0x131e   :  { %v7735_v21 = vpop.eup %7734  ;;  %v3212_v26 = vadd.f32 1.0, %v7733_v32 }
0x131f   :  { %v7737_v25 = vpop.eup %7736  ;;  %v3214_v41 = vadd.f32 1.0, %v7735_v21 }
0x1320   :  { %v3215_v44 = vadd.f32 1.0, %v7737_v25  ;;  %v3220_v37 = vmul.f32 %v3212_v26, %v3188_v20 }
0x1321   :  { %v7739_v29 = vpop.eup %7738  ;;  %v3222_v5 = vmul.f32 %v3214_v41, %v3190_v9 }
0x1322   :  { %v3213_v57 = vadd.f32 1.0, %v7739_v29  ;;  %v3223_v12 = vmul.f32 %v3215_v44, %v3191_v42 }
0x1324   :  { %v3221_v34 = vmul.f32 %v3213_v57, %v3189_v45  ;;  %v3229_v28 = vpack.c.bf16 %v3223_v12, %v3222_v5 }
0x1326   :  { %v3228_v27 = vpack.c.bf16 %v3221_v34, %v3220_v37 }
0x1328   :  { %7152 = vmatprep.mubr.bf16.mxu1 %v3228_v27 }
0x1329   :  { %7153 = vmatmul.mubr.bf16.vlgmr.msra.gmra.mxu1 %v3229_v28 }
0x1392   :  { %v7134_v24 = vpop.f32.mrf.mxu0 }
0x1393   :  { %v3182_v40 = vadd.f32 %v7134_v24, %v6370_v17 }
0x1394   :  { %v3173_v50 = vpop.f32.mrf.mxu0 }
0x1395   :  { %v3174_v62 = vadd.f32 %v6370_v17, %v3173_v50  ;;  %v3202_v36 = vmul.f32 0.70710677, %v3182_v40  ;;  %v3194_v39 = vmul.f32 0.5, %v3182_v40 }
0x1396   :  { %v7135_v59 = vpop.f32.mrf.mxu0 }
0x1397   :  { %v3200_v52 = vmul.f32 0.70710677, %v3174_v62  ;;  %v3185_v31 = vadd.f32 %v7135_v59, %v6370_v17  ;;  %v3192_v8 = vmul.f32 0.5, %v3174_v62 }
0x1398   :  { %v3176_v6 = vpop.f32.mrf.mxu0 }
0x1399   :  { %7740 = verf.f32 %v3200_v52  ;;  %v3203_v35 = vmul.f32 0.70710677, %v3185_v31  ;;  %v3177_v4 = vadd.f32 %v6370_v17, %v3176_v6  ;;  %v3195_v18 = vmul.f32 0.5, %v3185_v31 }
0x139a   :  { %7742 = verf.f32 %v3202_v36 }
0x139b   :  { %7744 = verf.f32 %v3203_v35  ;;  %v3201_v16 = vmul.f32 0.70710677, %v3177_v4  ;;  %v3193_v55 = vmul.f32 0.5, %v3177_v4 }
0x139d   :  { %7746 = verf.f32 %v3201_v16 }
0x13a6   :  { %v7741_v48 = vpop.eup %7740 }
0x13a7   :  { %v7743_v22 = vpop.eup %7742  ;;  %v3216_v54 = vadd.f32 1.0, %v7741_v48 }
0x13a8   :  { %v7745_v58 = vpop.eup %7744  ;;  %v3218_v23 = vadd.f32 1.0, %v7743_v22 }
0x13a9   :  { %v3219_v43 = vadd.f32 1.0, %v7745_v58  ;;  %v3224_v11 = vmul.f32 %v3216_v54, %v3192_v8  ;;  %v7545_v8 = vld [vmem:[%s9820_s8 + $0x38] sm:$0xff]  }
0x13aa   :  { %v7747_v38 = vpop.eup %7746  ;;  %v3226_v17 = vmul.f32 %v3218_v23, %v3194_v39  ;;  %7192 = vmatprep.subr.bf16.mxu1 %v7545_v8  ;;  %v7548_v39 = vld [vmem:[%s9818_s6 + $0x28] sm:$0xff]  }
0x13ab   :  { %v3217_v7 = vadd.f32 1.0, %v7747_v38  ;;  %v3227_v61 = vmul.f32 %v3219_v43, %v3195_v18  ;;  %v7544_v18 = vld [vmem:[%s9818_s6 + $0x38] sm:$0xff]   ;;  %7193 = vmatpush3.bf16.msra.mxu1 %v7545_v8 }
0x13ac   :  { %7160 = vmatprep.subr.bf16.mxu0 %v7544_v18 }
0x13ad   :  { %v3225_v30 = vmul.f32 %v3217_v7, %v3193_v55  ;;  %v3231_v56 = vpack.c.bf16 %v3227_v61, %v3226_v17  ;;  %7161 = vmatpush3.bf16.msra.mxu0 %v7544_v18  ;;  %v7546_v55 = vld [vmem:[%s9818_s6 + $0x30] sm:$0xff]   ;;  %v7549_v61 = vld [vmem:[%s9820_s8 + $0x28] sm:$0xff]  }
0x13ae   :  { %v7547_v7 = vld [vmem:[%s9820_s8 + $0x30] sm:$0xff]   ;;  %7162 = vmatprep.subr.bf16.mxu0 %v7546_v55 }
0x13af   :  { %v3230_v19 = vpack.c.bf16 %v3225_v30, %v3224_v11  ;;  %7194 = vmatprep.subr.bf16.mxu1 %v7547_v7  ;;  %v7550_v11 = vld [vmem:[%s9818_s6 + $0x20] sm:$0xff]  }
0x13b0   :  { %7195 = vmatpush3.bf16.msra.mxu1 %v7547_v7  ;;  %v7551_v30 = vld [vmem:[%s9820_s8 + $0x20] sm:$0xff]  }
0x13b1   :  { %7156 = vmatprep.mubr.bf16.mxu1 %v3230_v19  ;;  %7163 = vmatpush3.bf16.msra.mxu0 %v7546_v55 }
0x13b2   :  { %7157 = vmatmul.mubr.bf16.gmra.mxu1 %v3231_v56  ;;  %7164 = vmatprep.subr.bf16.mxu0 %v7548_v39 }
0x13b3   :  { %7196 = vmatprep.subr.bf16.mxu1 %v7549_v61 }
0x13b4   :  { %7197 = vmatpush3.bf16.msra.mxu1 %v7549_v61 }
0x13b5   :  { %7165 = vmatpush3.bf16.msra.mxu0 %v7548_v39  ;;  %7198 = vmatprep.subr.bf16.mxu1 %v7551_v30 }
0x13b6   :  { %7166 = vmatprep.subr.bf16.mxu0 %v7550_v11 }
0x13b8   :  { %7199 = vmatpush3.bf16.msra.mxu1 %v7551_v30  ;;  %v7555_v30 = vld [vmem:[%s9819_s7 + $0x20] sm:$0xff]  }
0x13b9   :  { %7167 = vmatpush3.bf16.msra.mxu0 %v7550_v11  ;;  %v7554_v11 = vld [vmem:[%s9819_s7 + $0x28] sm:$0xff]  }
0x13e9   :  { %v7154_v49 = vpop.f32.mrf.mxu1 }
0x13ea   :  { %v3346_v15 = vadd.f32 %v7154_v49, %v6379_v51 }
0x13eb   :  { %v3337_v13 = vpop.f32.mrf.mxu1 }
0x13ec   :  { %v3338_v2 = vadd.f32 %v6379_v51, %v3337_v13  ;;  %v9037_v32 = vadd.f32 %v3346_v15, %v8855_v46 }
0x13ed   :  { %v7155_v14 = vpop.f32.mrf.mxu1 }
0x13ee   :  { %v9034_v1 = vadd.f32 %v3338_v2, %v8850_v47  ;;  %v3349_v21 = vadd.f32 %v7155_v14, %v6379_v51  ;;  %v3386_v41 = vsel %vm560_vm0, %v9037_v32, 0.0 }
0x13ef   :  { %v3340_v33 = vpop.f32.mrf.mxu1 }
0x13f0   :  { %v3341_v25 = vadd.f32 %v6379_v51, %v3340_v33  ;;  %v3380_v26 = vsel %vm560_vm0, %v9034_v1, 0.0  ;;  %v9045_v29 = vadd.f32 %v3349_v21, %v8860_v60 }
0x13f1   :  { %3381 = vadd.xlane.f32.xlu0 %v3380_v26 }
0x13f2   :  { %v9042_v44 = vadd.f32 %v3341_v25, %v8847_v3  ;;  %v3389_v46 = vsel %vm560_vm0, %v9045_v29, 0.0 }
0x13f4   :  { %v3383_v47 = vsel %vm560_vm0, %v9042_v44, 0.0 }
0x13f5   :  { %3384 = vadd.xlane.f32.xlu1 %v3383_v47  ;;  %3387 = vadd.xlane.f32.xlu0 %v3386_v41 }
0x13f9   :  { %3390 = vadd.xlane.f32.xlu1 %v3389_v46 }
0x1472   :  { %v7158_v42 = vpop.f32.mrf.mxu1 }
0x1473   :  { %v3362_v45 = vadd.f32 %v7158_v42, %v6379_v51 }
0x1474   :  { %v3353_v20 = vpop.f32.mrf.mxu1 }
0x1475   :  { %v3354_v3 = vadd.f32 %v6379_v51, %v3353_v20  ;;  %v9057_v12 = vadd.f32 %v3362_v45, %v8890_v10 }
0x1476   :  { %v7159_v57 = vpop.f32.mrf.mxu1 }
0x1477   :  { %v9054_v60 = vadd.f32 %v3354_v3, %v8884_v0  ;;  %v3365_v37 = vadd.f32 %v7159_v57, %v6379_v51  ;;  %v3398_v50 = vsel %vm560_vm0, %v9057_v12, 0.0 }
0x1478   :  { %v3356_v9 = vpop.f32.mrf.mxu1 }
0x1479   :  { %v3357_v34 = vadd.f32 %v6379_v51, %v3356_v9  ;;  %v3392_v5 = vsel %vm560_vm0, %v9054_v60, 0.0  ;;  %v9065_v40 = vadd.f32 %v3365_v37, %v8906_v53 }
0x147a   :  { %3393 = vadd.xlane.f32.xlu0 %v3392_v5  ;;  %v3382_v27 = vpop.xlane.xlu0 %3381 }
0x147b   :  { %v9062_v28 = vadd.f32 %v3357_v34, %v8897_v63  ;;  %v3404_v24 = vmul.f32 0.015625, %v3382_v27  ;;  %v3401_v6 = vsel %vm560_vm0, %v9065_v40, 0.0 }
0x147d   :  { %v9068_v0 = vsub.f32 %v9034_v1, %v3404_v24  ;;  %v3395_v10 = vsel %vm560_vm0, %v9062_v28, 0.0 }
0x147e   :  { %v3385_v62 = vpop.xlane.xlu1 %3384  ;;  %3396 = vadd.xlane.f32.xlu1 %v3395_v10  ;;  %3399 = vadd.xlane.f32.xlu0 %v3398_v50  ;;  %v3388_v36 = vpop.xlane.xlu0 %3387 }
0x147f   :  { %v3405_v59 = vmul.f32 0.015625, %v3385_v62  ;;  %v3406_v63 = vmul.f32 0.015625, %v3388_v36  ;;  %v3420_v52 = vmul.f32 %v9068_v0, %v9068_v0 }
0x1481   :  { %v9077_v53 = vsub.f32 %v9042_v44, %v3405_v59  ;;  %v9080_v31 = vsub.f32 %v9037_v32, %v3406_v63  ;;  %v3428_v35 = vsel %vm560_vm0, %v3420_v52, 0.0 }
0x1482   :  { %v3391_v4 = vpop.xlane.xlu1 %3390  ;;  %3402 = vadd.xlane.f32.xlu1 %v3401_v6  ;;  %3429 = vadd.xlane.f32.xlu0 %v3428_v35  ;;  %v9149_v6 = vld [vmem:[%s9816_s4 + $0x1] ss:$0 sm:$0xff] }
0x1483   :  { %v3407_v16 = vmul.f32 0.015625, %v3391_v4  ;;  %v3421_v48 = vmul.f32 %v9077_v53, %v9077_v53  ;;  %v3422_v22 = vmul.f32 %v9080_v31, %v9080_v31  ;;  %v7552_v4 = vld [vmem:[%s9819_s7 + $0x38] sm:$0xff]  }
0x1484   :  { %7176 = vmatprep.subr.bf16.mxu0 %v7552_v4 }
0x1485   :  { %v9090_v58 = vsub.f32 %v9045_v29, %v3407_v16  ;;  %v3431_v54 = vsel %vm560_vm0, %v3421_v48, 0.0  ;;  %v3434_v43 = vsel %vm560_vm0, %v3422_v22, 0.0 }
0x1486   :  { %3432 = vadd.xlane.f32.xlu1 %v3431_v54  ;;  %3435 = vadd.xlane.f32.xlu0 %v3434_v43 }
0x1487   :  { %v3423_v38 = vmul.f32 %v9090_v58, %v9090_v58 }
0x1489   :  { %v3437_v23 = vsel %vm560_vm0, %v3423_v38, 0.0 }
0x148a   :  { %3438 = vadd.xlane.f32.xlu1 %v3437_v23 }
0x1503   :  { %v3394_v17 = vpop.xlane.xlu0 %3393 }
0x1504   :  { %v3408_v19 = vmul.f32 0.015625, %v3394_v17 }
0x1506   :  { %v9122_v56 = vsub.f32 %v9054_v60, %v3408_v19 }
0x1507   :  { %v3397_v49 = vpop.xlane.xlu1 %3396  ;;  %v3400_v51 = vpop.xlane.xlu0 %3399 }
0x1508   :  { %v3409_v13 = vmul.f32 0.015625, %v3397_v49  ;;  %v3410_v15 = vmul.f32 0.015625, %v3400_v51  ;;  %v3424_v2 = vmul.f32 %v9122_v56, %v9122_v56 }
0x150a   :  { %v9127_v14 = vsub.f32 %v9062_v28, %v3409_v13  ;;  %v9130_v33 = vsub.f32 %v9057_v12, %v3410_v15  ;;  %v3440_v21 = vsel %vm560_vm0, %v3424_v2, 0.0 }
0x150b   :  { %v3403_v25 = vpop.xlane.xlu1 %3402  ;;  %3441 = vadd.xlane.f32.xlu0 %v3440_v21  ;;  %v3430_v26 = vpop.xlane.xlu0 %3429 }
0x150c   :  { %v3411_v47 = vmul.f32 0.015625, %v3403_v25  ;;  %v3452_v41 = vmul.f32 0.015625, %v3430_v26  ;;  %v3425_v46 = vmul.f32 %v9127_v14, %v9127_v14  ;;  %v3426_v42 = vmul.f32 %v9130_v33, %v9130_v33 }
0x150e   :  { %v9138_v20 = vsub.f32 %v9065_v40, %v3411_v47  ;;  %v3460_v45 = vadd.f32 1e-05, %v3452_v41  ;;  %v3443_v3 = vsel %vm560_vm0, %v3425_v46, 0.0  ;;  %v3446_v57 = vsel %vm560_vm0, %v3426_v42, 0.0 }
0x150f   :  { %3444 = vadd.xlane.f32.xlu1 %v3443_v3  ;;  %v3433_v9 = vpop.xlane.xlu1 %3432  ;;  %3447 = vadd.xlane.f32.xlu0 %v3446_v57  ;;  %v3436_v37 = vpop.xlane.xlu0 %3435 }
0x1510   :  { %7748 = vrsqrt.f32 %v3460_v45  ;;  %v3453_v34 = vmul.f32 0.015625, %v3433_v9  ;;  %v3454_v5 = vmul.f32 0.015625, %v3436_v37  ;;  %v3427_v27 = vmul.f32 %v9138_v20, %v9138_v20 }
0x1512   :  { %v3461_v24 = vadd.f32 1e-05, %v3453_v34  ;;  %v3462_v10 = vadd.f32 1e-05, %v3454_v5  ;;  %v3449_v50 = vsel %vm560_vm0, %v3427_v27, 0.0 }
0x1513   :  { %3450 = vadd.xlane.f32.xlu1 %v3449_v50  ;;  %v3439_v62 = vpop.xlane.xlu1 %3438 }
0x1514   :  { %7750 = vrsqrt.f32 %v3461_v24  ;;  %v3455_v36 = vmul.f32 0.015625, %v3439_v62 }
0x1515   :  { %7752 = vrsqrt.f32 %v3462_v10 }
0x1516   :  { %v3463_v59 = vadd.f32 1e-05, %v3455_v36 }
0x1518   :  { %7754 = vrsqrt.f32 %v3463_v59 }
0x151d   :  { %v7749_v63 = vpop.eup %7748 }
0x151e   :  { %v3476_v52 = vmul.f32 %v7749_v63, %v9068_v0  ;;  %v6391_v0 = vld [vmem:[%s9817_s5 + $0x1] ss:$0 sm:$0xff] }
0x1520   :  { %v3490_v22 = vmul.f32 %v9149_v6, %v3476_v52 }
0x1521   :  { %v7751_v35 = vpop.eup %7750 }
0x1522   :  { %v7753_v16 = vpop.eup %7752  ;;  %v3477_v48 = vmul.f32 %v7751_v35, %v9077_v53  ;;  %v3504_v8 = vadd.f32 %v6391_v0, %v3490_v22 }
0x1523   :  { %v3478_v54 = vmul.f32 %v7753_v16, %v9080_v31 }
0x1524   :  { %v3491_v43 = vmul.f32 %v9149_v6, %v3477_v48 }
0x1525   :  { %v7755_v38 = vpop.eup %7754  ;;  %v3492_v23 = vmul.f32 %v9149_v6, %v3478_v54 }
0x1526   :  { %v3479_v18 = vmul.f32 %v7755_v38, %v9090_v58  ;;  %v3505_v55 = vadd.f32 %v6391_v0, %v3491_v43  ;;  %v7553_v58 = vld [vmem:[%s9819_s7 + $0x30] sm:$0xff]  }
0x1527   :  { %v3506_v31 = vadd.f32 %v6391_v0, %v3492_v23 }
0x1528   :  { %v3493_v53 = vmul.f32 %v9149_v6, %v3479_v18  ;;  %v3512_v7 = vpack.c.bf16 %v3505_v55, %v3504_v8 }
0x152a   :  { %7168 = vmatprep.mubr.msk.bf16.mxu0 %vm560_vm0, %v3512_v7  ;;  %7200 = vmatprep.mubr.msk.bf16.mxu1 %vm560_vm0, %v3512_v7  ;;  %v3507_v39 = vadd.f32 %v6391_v0, %v3493_v53 }
0x152c   :  { %v3513_v61 = vpack.c.bf16 %v3507_v39, %v3506_v31 }
0x152e   :  { %7169 = vmatmul.mubr.msk.bf16.vlgmr.msra.gmra.mxu0 %vm560_vm0, %v3513_v61  ;;  %7201 = vmatmul.mubr.msk.bf16.vlgmr.msra.gmra.mxu1 %vm560_vm0, %v3513_v61 }
0x152f   :  { %7177 = vmatpush3.bf16.msra.mxu0 %v7552_v4 }
0x1530   :  { %7178 = vmatprep.subr.bf16.mxu0 %v7553_v58 }
0x1533   :  { %7179 = vmatpush3.bf16.msra.mxu0 %v7553_v58 }
0x1534   :  { %7180 = vmatprep.subr.bf16.mxu0 %v7554_v11 }
0x1537   :  { %7181 = vmatpush3.bf16.msra.mxu0 %v7554_v11 }
0x1538   :  { %7182 = vmatprep.subr.bf16.mxu0 %v7555_v30 }
0x153b   :  { %7183 = vmatpush3.bf16.msra.mxu0 %v7555_v30 }
0x1594   :  { %v3442_v17 = vpop.xlane.xlu0 %3441 }
0x1595   :  { %v3456_v19 = vmul.f32 0.015625, %v3442_v17 }
0x1597   :  { %v3464_v49 = vadd.f32 1e-05, %v3456_v19 }
0x1598   :  { %v3445_v51 = vpop.xlane.xlu1 %3444  ;;  %v3448_v13 = vpop.xlane.xlu0 %3447 }
0x1599   :  { %7756 = vrsqrt.f32 %v3464_v49  ;;  %v3457_v15 = vmul.f32 0.015625, %v3445_v51  ;;  %v3458_v2 = vmul.f32 0.015625, %v3448_v13 }
0x159b   :  { %v3465_v21 = vadd.f32 1e-05, %v3457_v15  ;;  %v3466_v25 = vadd.f32 1e-05, %v3458_v2 }
0x159c   :  { %v3451_v26 = vpop.xlane.xlu1 %3450 }
0x159d   :  { %7758 = vrsqrt.f32 %v3465_v21  ;;  %v3459_v47 = vmul.f32 0.015625, %v3451_v26 }
0x159e   :  { %7760 = vrsqrt.f32 %v3466_v25 }
0x159f   :  { %v3467_v41 = vadd.f32 1e-05, %v3459_v47 }
0x15a1   :  { %7762 = vrsqrt.f32 %v3467_v41 }
0x15a6   :  { %v7757_v46 = vpop.eup %7756 }
0x15a7   :  { %v3480_v42 = vmul.f32 %v7757_v46, %v9122_v56 }
0x15a9   :  { %v3494_v9 = vmul.f32 %v9149_v6, %v3480_v42 }
0x15aa   :  { %v7759_v45 = vpop.eup %7758 }
0x15ab   :  { %v7761_v3 = vpop.eup %7760  ;;  %v3481_v57 = vmul.f32 %v7759_v45, %v9127_v14  ;;  %v3508_v27 = vadd.f32 %v6391_v0, %v3494_v9  ;;  %v9252_v9 = vld [vmem:[%s9843_s21] sm:$0xff] }
0x15ac   :  { %v3482_v37 = vmul.f32 %v7761_v3, %v9130_v33 }
0x15ad   :  { %v3495_v34 = vmul.f32 %v9149_v6, %v3481_v57 }
0x15ae   :  { %v7763_v5 = vpop.eup %7762  ;;  %v3496_v50 = vmul.f32 %v9149_v6, %v3482_v37 }
0x15af   :  { %v3509_v24 = vadd.f32 %v6391_v0, %v3495_v34  ;;  %v3483_v10 = vmul.f32 %v7763_v5, %v9138_v20  ;;  %v9258_v5 = vld [vmem:[%s9843_s21 + $0x10] sm:$0xff] }
0x15b0   :  { %v3510_v14 = vadd.f32 %v6391_v0, %v3496_v50  ;;  %v9265_v50 = vld [vmem:[%s9843_s21 + $0x8] sm:$0xff] }
0x15b1   :  { %v3514_v62 = vpack.c.bf16 %v3509_v24, %v3508_v27  ;;  %v3497_v56 = vmul.f32 %v9149_v6, %v3483_v10 }
0x15b3   :  { %7172 = vmatprep.mubr.msk.bf16.mxu0 %vm560_vm0, %v3514_v62  ;;  %7204 = vmatprep.mubr.msk.bf16.mxu1 %vm560_vm0, %v3514_v62  ;;  %v3511_v36 = vadd.f32 %v6391_v0, %v3497_v56  ;;  %v9271_v56 = vld [vmem:[%s9843_s21 + $0x18] sm:$0xff] }
0x15b5   :  { %v3515_v59 = vpack.c.bf16 %v3511_v36, %v3510_v14 }
0x15b7   :  { %7173 = vmatmul.mubr.msk.bf16.gmra.mxu0 %vm560_vm0, %v3515_v59  ;;  %7205 = vmatmul.mubr.msk.bf16.gmra.mxu1 %vm560_vm0, %v3515_v59 }
0x15b8   :  { %7184 = vmatprep.mubr.msk.bf16.mxu0 %vm560_vm0, %v3512_v7 }
0x15bf   :  { %7185 = vmatmul.mubr.msk.bf16.vlgmr.msra.gmra.mxu0 %vm560_vm0, %v3513_v61 }
0x15c0   :  { %7188 = vmatprep.mubr.msk.bf16.mxu0 %vm560_vm0, %v3514_v62 }
0x15c7   :  { %7189 = vmatmul.mubr.msk.bf16.gmra.mxu0 %vm560_vm0, %v3515_v59 }
0x15ee   :  { %v7170_v33 = vpop.f32.mrf.mxu0  ;;  %v7202_v4 = vpop.f32.mrf.mxu1 }
0x15f0   :  { %v3595_v20 = vpop.f32.mrf.mxu0  ;;  %v3799_v16 = vpop.f32.mrf.mxu1 }
0x15f2   :  { %v7171_v63 = vpop.f32.mrf.mxu0  ;;  %v7203_v48 = vpop.f32.mrf.mxu1 }
0x15f3   :  { %v9193_v52 = vpack.c.bf16 %v7171_v63, %v7170_v33  ;;  %v9227_v15 = vpack.c.bf16 %v7203_v48, %v7202_v4 }
0x15f4   :  { %v3598_v6 = vpop.f32.mrf.mxu0  ;;  %v3802_v22 = vpop.f32.mrf.mxu1 }
0x15f5   :  { %v9195_v35 = vpack.c.bf16 %v3598_v6, %v3595_v20  ;;  %v9234_v21 = vpack.c.bf16 %v3802_v22, %v3799_v16 }
0x15f7   :  { %7212 = vmatprep.mubr.msk.bf16.mxu1 %vm1021_vm1, %v9195_v35 }
0x1677   :  { %v7174_v54 = vpop.f32.mrf.mxu0  ;;  %v7206_v0 = vpop.f32.mrf.mxu1 }
0x1679   :  { %v3611_v43 = vpop.f32.mrf.mxu0  ;;  %v9199_v38 = vpop.f32.mrf.mxu1 }
0x167b   :  { %v7175_v23 = vpop.f32.mrf.mxu0  ;;  %v7207_v18 = vpop.f32.mrf.mxu1 }
0x167c   :  { %v9201_v8 = vpack.c.bf16 %v7175_v23, %v7174_v54  ;;  %v9203_v55 = vpack.c.bf16 %v7207_v18, %v7206_v0 }
0x167d   :  { %v3614_v53 = vpop.f32.mrf.mxu0  ;;  %v9247_v45 = vpop.f32.mrf.mxu1 }
0x167e   :  { %v9205_v7 = vpack.c.bf16 %v3614_v53, %v3611_v43 }
0x167f   :  { %v7186_v31 = vpop.f32.mrf.mxu0 }
0x1681   :  { %v3697_v39 = vpop.f32.mrf.mxu0 }
0x1683   :  { %v7187_v61 = vpop.f32.mrf.mxu0 }
0x1684   :  { %v9207_v58 = vpack.c.bf16 %v7187_v61, %v7186_v31 }
0x1685   :  { %v3700_v11 = vpop.f32.mrf.mxu0 }
0x1686   :  { %v9209_v30 = vpack.c.bf16 %v3700_v11, %v3697_v39  ;;  %4017 = vrot.lane.b32.xlu0 %v9207_v58, %s7960_s29  ;;  %7440 = vmatprep.subr.msk.bf16.mxu1 %vm1021_vm1, %v9207_v58  ;;  %v3853_v17 = vsel %vm1021_vm1, %v9207_v58, 0 }
0x1687   :  { %v7190_v19 = vpop.f32.mrf.mxu0  ;;  %7209 = vmatpush3.bf16.xpose.msra.mxu1 %v3853_v17 }
0x1688   :  { %4015 = vrot.lane.b32.xlu1 %v9209_v30, %s7960_s29  ;;  %7441 = vmatprep.subr.msk.bf16.mxu1 %vm1021_vm1, %v9209_v30  ;;  %v3850_v2 = vsel %vm1021_vm1, %v9209_v30, 0 }
0x1689   :  { %v9221_v49 = vpop.f32.mrf.mxu0 }
0x168b   :  { %v7191_v51 = vpop.f32.mrf.mxu0 }
0x168c   :  { %v9223_v13 = vpack.c.bf16 %v7191_v51, %v7190_v19  ;;  %4009 = vrot.lane.b32.xlu1 %v9195_v35, %s7960_s29 }
0x168d   :  { %v9277_v20 = vpop.f32.mrf.mxu0 }
0x168f   :  { %7211 = vmatpush3.bf16.xpose.msra.mxu1 %v3850_v2 }
0x1690   :  { %4011 = vrot.lane.b32.xlu1 %v9193_v52, %s7960_s29  ;;  %7216 = vmatprep.subr.bf16.mxu1 %v9227_v15 }
0x1696   :  { %7213 = vmatmul.mubr.msk.bf16.vlgmr.msra.gmra.mxu1 %vm1021_vm1, %v9193_v52 }
0x1697   :  { %7217 = vmatpush3.bf16.msra.mxu1 %v9227_v15 }
0x1698   :  { %7218 = vmatprep.subr.bf16.mxu1 %v9234_v21 }
0x169b   :  { %7219 = vmatpush3.bf16.msra.mxu1 %v9234_v21 }
0x16f8   :  { %v4018_v25 = vpop.permute.xlu0 %4017 }
0x16f9   :  { %7442 = vmatprep.subr.msk.bf16.mxu0 %vm1021_vm1, %v4018_v25  ;;  %v4029_v26 = vsel %vm1021_vm1, %v4018_v25, 0 }
0x16fa   :  { %7225 = vmatpush3.bf16.xpose.msra.mxu0 %v4029_v26  ;;  %v4016_v47 = vpop.permute.xlu1 %4015 }
0x16fb   :  { %7443 = vmatprep.subr.msk.bf16.mxu0 %vm1021_vm1, %v4016_v47  ;;  %v4026_v46 = vsel %vm1021_vm1, %v4016_v47, 0 }
0x16fe   :  { %v4010_v41 = vpop.permute.xlu1 %4009 }
0x16ff   :  { %7228 = vmatprep.mubr.msk.bf16.mxu0 %vm1021_vm1, %v4010_v41 }
0x1702   :  { %7227 = vmatpush3.bf16.xpose.msra.mxu0 %v4026_v46  ;;  %v4012_v42 = vpop.permute.xlu1 %4011 }
0x1709   :  { %7229 = vmatmul.mubr.msk.bf16.vlgmr.msra.gmra.mxu0 %vm1021_vm1, %v4012_v42 }
0x1756   :  { %v7214_v3 = vpop.f32.mrf.mxu1 }
0x1757   :  { %v3898_v27 = vadd.f32 %v9258_v5, %v7214_v3 }
0x1758   :  { %v3889_v57 = vpop.f32.mrf.mxu1 }
0x1759   :  { %v3890_v37 = vadd.f32 %v9252_v9, %v3889_v57  ;;  %v3910_v59 = vsel %vm1083_vm2, %v3898_v27, -inf }
0x175a   :  { %v7215_v34 = vpop.f32.mrf.mxu1 }
0x175b   :  { %v3904_v24 = vsel %vm1083_vm2, %v3890_v37, -inf  ;;  %v3901_v14 = vadd.f32 %v9271_v56, %v7215_v34 }
0x175c   :  { %v3892_v10 = vpop.f32.mrf.mxu1  ;;  %3905 = vmax.xlane.f32.xlu0 %v3904_v24 }
0x175d   :  { %v3893_v62 = vadd.f32 %v9265_v50, %v3892_v10  ;;  %v3913_v33 = vsel %vm1083_vm2, %v3901_v14, -inf }
0x175f   :  { %v3907_v36 = vsel %vm1083_vm2, %v3893_v62, -inf }
0x1760   :  { %3908 = vmax.xlane.f32.xlu1 %v3907_v36  ;;  %3911 = vmax.xlane.f32.xlu0 %v3910_v59 }
0x1764   :  { %3914 = vmax.xlane.f32.xlu0 %v3913_v33 }
0x17c9   :  { %v7230_v63 = vpop.f32.mrf.mxu0 }
0x17ca   :  { %v4074_v48 = vadd.f32 %v9258_v5, %v7230_v63 }
0x17cb   :  { %v4065_v6 = vpop.f32.mrf.mxu0 }
0x17cc   :  { %v4066_v4 = vadd.f32 %v9252_v9, %v4065_v6  ;;  %v4086_v18 = vsel %vm1083_vm2, %v4074_v48, -inf }
0x17cd   :  { %v7231_v16 = vpop.f32.mrf.mxu0 }
0x17ce   :  { %v4080_v22 = vsel %vm1083_vm2, %v4066_v4, -inf  ;;  %v4077_v43 = vadd.f32 %v9271_v56, %v7231_v16 }
0x17cf   :  { %v4068_v54 = vpop.f32.mrf.mxu0  ;;  %4081 = vmax.xlane.f32.xlu0 %v4080_v22 }
0x17d0   :  { %v4069_v0 = vadd.f32 %v9265_v50, %v4068_v54  ;;  %v4089_v53 = vsel %vm1083_vm2, %v4077_v43, -inf }
0x17d2   :  { %v4083_v23 = vsel %vm1083_vm2, %v4069_v0, -inf }
0x17d3   :  { %4084 = vmax.xlane.f32.xlu1 %v4083_v23  ;;  %4087 = vmax.xlane.f32.xlu0 %v4086_v18 }
0x17d7   :  { %4090 = vmax.xlane.f32.xlu1 %v4089_v53 }
0x17e5   :  { %v3906_v31 = vpop.xlane.xlu0 %3905 }
0x17e6   :  { %v3916_v39 = vsub.f32 %v3890_v37, %v3906_v31 }
0x17e8   :  { %v3920_v2 = vmul.f32 1.442695, %v3916_v39 }
0x17e9   :  { %v3909_v61 = vpop.xlane.xlu1 %3908  ;;  %v3912_v11 = vpop.xlane.xlu0 %3911 }
0x17ea   :  { %v3918_v17 = vsub.f32 %v3898_v27, %v3912_v11  ;;  %v3917_v19 = vsub.f32 %v3893_v62, %v3909_v61 }
0x17ec   :  { %v3924_v51 = vmul.f32 1.442695, %v3918_v17  ;;  %v3922_v47 = vmul.f32 1.442695, %v3917_v19 }
0x17ed   :  { %v3915_v25 = vpop.xlane.xlu0 %3914 }
0x17ee   :  { %v3919_v26 = vsub.f32 %v3901_v14, %v3915_v25  ;;  %7764 = vpow2.f32 %v3924_v51 }
0x17ef   :  { %7766 = vpow2.f32 %v3920_v2 }
0x17f0   :  { %v3926_v41 = vmul.f32 1.442695, %v3919_v26 }
0x17f2   :  { %7768 = vpow2.f32 %v3926_v41 }
0x17f3   :  { %7770 = vpow2.f32 %v3922_v47 }
0x17fb   :  { %v9287_v46 = vpop.eup %7764 }
0x17fc   :  { %v3934_v42 = vsel %vm1083_vm2, %v9287_v46, 0.0  ;;  %v7767_v3 = vpop.eup %7766 }
0x17fd   :  { %3935 = vadd.xlane.f32.xlu0 %v3934_v42  ;;  %v3928_v27 = vsel %vm1083_vm2, %v7767_v3, 0.0 }
0x17ff   :  { %v7769_v57 = vpop.eup %7768 }
0x1800   :  { %v3937_v37 = vsel %vm1083_vm2, %v7769_v57, 0.0  ;;  %v7771_v34 = vpop.eup %7770 }
0x1801   :  { %3938 = vadd.xlane.f32.xlu1 %v3937_v37  ;;  %3929 = vadd.xlane.f32.xlu0 %v3928_v27  ;;  %v3931_v24 = vsel %vm1083_vm2, %v7771_v34, 0.0 }
0x1805   :  { %3932 = vadd.xlane.f32.xlu1 %v3931_v24  ;;  %v9337_v24 = vld [vmem:[%s9821_s9 + $0x28] sm:$0xff]  }
0x1858   :  { %v4082_v10 = vpop.xlane.xlu0 %4081 }
0x1859   :  { %v4092_v62 = vsub.f32 %v4066_v4, %v4082_v10 }
0x185b   :  { %v4096_v6 = vmul.f32 1.442695, %v4092_v62 }
0x185c   :  { %v4085_v14 = vpop.xlane.xlu1 %4084  ;;  %v4088_v36 = vpop.xlane.xlu0 %4087 }
0x185d   :  { %v4094_v59 = vsub.f32 %v4074_v48, %v4088_v36  ;;  %v4093_v33 = vsub.f32 %v4069_v0, %v4085_v14 }
0x185f   :  { %v4100_v63 = vmul.f32 1.442695, %v4094_v59  ;;  %v4098_v54 = vmul.f32 1.442695, %v4093_v33 }
0x1860   :  { %v4091_v16 = vpop.xlane.xlu1 %4090 }
0x1861   :  { %v4095_v22 = vsub.f32 %v4077_v43, %v4091_v16  ;;  %7772 = vpow2.f32 %v4100_v63 }
0x1862   :  { %7774 = vpow2.f32 %v4096_v6 }
0x1863   :  { %v4102_v23 = vmul.f32 1.442695, %v4095_v22 }
0x1865   :  { %7776 = vpow2.f32 %v4102_v23 }
0x1866   :  { %7778 = vpow2.f32 %v4098_v54 }
0x186e   :  { %v9294_v18 = vpop.eup %7772 }
0x186f   :  { %v4110_v53 = vsel %vm1083_vm2, %v9294_v18, 0.0  ;;  %v9298_v4 = vpop.eup %7774 }
0x1870   :  { %4111 = vadd.xlane.f32.xlu0 %v4110_v53  ;;  %v4104_v43 = vsel %vm1083_vm2, %v9298_v4, 0.0 }
0x1872   :  { %v7777_v48 = vpop.eup %7776 }
0x1873   :  { %v4113_v0 = vsel %vm1083_vm2, %v7777_v48, 0.0  ;;  %v7779_v31 = vpop.eup %7778 }
0x1874   :  { %4114 = vadd.xlane.f32.xlu1 %v4113_v0  ;;  %4105 = vadd.xlane.f32.xlu0 %v4104_v43  ;;  %v4107_v39 = vsel %vm1083_vm2, %v7779_v31, 0.0 }
0x1878   :  { %4108 = vadd.xlane.f32.xlu1 %v4107_v39 }
0x1886   :  { %v3936_v61 = vpop.xlane.xlu0 %3935 }
0x1889   :  { %4128 = vrot.lane.b32.xlu1 %v9234_v21, %s7960_s29 }
0x188a   :  { %v3939_v11 = vpop.xlane.xlu1 %3938  ;;  %4130 = vrot.lane.b32.xlu0 %v9227_v15, %s7960_s29  ;;  %v3930_v17 = vpop.xlane.xlu0 %3929 }
0x188b   :  { %7780 = vrcp.f32 %v3939_v11 }
0x188c   :  { %7782 = vrcp.f32 %v3930_v17 }
0x188d   :  { %4319 = vrot.lane.b32.xlu1 %v9207_v58, %s7961_s3  ;;  %7784 = vrcp.f32 %v3936_v61 }
0x188e   :  { %v3933_v19 = vpop.xlane.xlu1 %3932  ;;  %4313 = vrot.lane.b32.xlu0 %v9195_v35, %s7961_s3 }
0x188f   :  { %7786 = vrcp.f32 %v3933_v19 }
0x1891   :  { %4317 = vrot.lane.b32.xlu1 %v9209_v30, %s7961_s3 }
0x1892   :  { %4562 = vrot.lane.b32.xlu0 %v9207_v58, %s7962_s27 }
0x1895   :  { %4315 = vrot.lane.b32.xlu1 %v9193_v52, %s7961_s3 }
0x1896   :  { %4556 = vrot.lane.b32.xlu0 %v9195_v35, %s7962_s27  ;;  %v9330_v35 = vld [vmem:[%s9821_s9 + $0x20] sm:$0xff]  }
0x1897   :  { %7246 = vmatprep.subr.bf16.mxu0 %v9330_v35 }
0x1898   :  { %v7781_v51 = vpop.eup %7780  ;;  %7247 = vmatpush3.bf16.msra.mxu0 %v9330_v35 }
0x1899   :  { %4560 = vrot.lane.b32.xlu1 %v9209_v30, %s7962_s27  ;;  %v7783_v2 = vpop.eup %7782  ;;  %v3947_v47 = vmul.f32 %v7781_v51, %v7769_v57 }
0x189a   :  { %v7785_v25 = vpop.eup %7784  ;;  %v3944_v41 = vmul.f32 %v7783_v2, %v7767_v3 }
0x189b   :  { %v3946_v58 = vmul.f32 %v7785_v25, %v9287_v46 }
0x189c   :  { %v7787_v26 = vpop.eup %7786 }
0x189d   :  { %4558 = vrot.lane.b32.xlu1 %v9193_v52, %s7962_s27  ;;  %v3945_v42 = vmul.f32 %v7787_v26, %v7771_v34  ;;  %v3949_v27 = vpack.c.bf16 %v3947_v47, %v3946_v58 }
0x189f   :  { %v3948_v37 = vpack.c.bf16 %v3945_v42, %v3944_v41 }
0x18a1   :  { %7220 = vmatprep.mubr.msk.bf16.mxu1 %vm1083_vm2, %v3948_v37 }
0x18a2   :  { %7221 = vmatmul.mubr.msk.bf16.vlgmr.msra.gmra.mxu1 %vm1083_vm2, %v3949_v27 }
0x18f9   :  { %v4112_v52 = vpop.xlane.xlu0 %4111 }
0x18fd   :  { %v4115_v30 = vpop.xlane.xlu1 %4114  ;;  %v4106_v3 = vpop.xlane.xlu0 %4105 }
0x18fe   :  { %7788 = vrcp.f32 %v4115_v30  ;;  %v4809_v30 = vsel %vm1021_vm1, %v9223_v13, 0 }
0x18ff   :  { %7790 = vrcp.f32 %v4106_v3 }
0x1900   :  { %7792 = vrcp.f32 %v4112_v52  ;;  %v9364_v52 = vpack.c.bf16 %v9277_v20, %v9221_v49 }
0x1901   :  { %v4109_v46 = vpop.xlane.xlu1 %4108  ;;  %v4131_v57 = vpop.permute.xlu0 %4130 }
0x1902   :  { %7794 = vrcp.f32 %v4109_v46  ;;  %7232 = vmatprep.subr.bf16.mxu1 %v4131_v57  ;;  %v4806_v3 = vsel %vm1021_vm1, %v9364_v52, 0 }
0x1903   :  { %7233 = vmatpush3.bf16.msra.mxu1 %v4131_v57 }
0x1905   :  { %v4129_v34 = vpop.permute.xlu1 %4128  ;;  %v4314_v19 = vpop.permute.xlu0 %4313 }
0x1906   :  { %7234 = vmatprep.subr.bf16.mxu1 %v4129_v34 }
0x1907   :  { %7235 = vmatpush3.bf16.msra.mxu1 %v4129_v34 }
0x1908   :  { %7240 = vmatprep.subr.bf16.mxu1 %v9337_v24 }
0x1909   :  { %v4320_v54 = vpop.permute.xlu1 %4319  ;;  %v4563_v26 = vpop.permute.xlu0 %4562 }
0x190a   :  { %v4331_v51 = vsel %vm1021_vm1, %v4320_v54, 0  ;;  %v4574_v41 = vsel %vm1021_vm1, %v4563_v26, 0 }
0x190b   :  { %v7789_v10 = vpop.eup %7788 }
0x190c   :  { %v7791_v62 = vpop.eup %7790  ;;  %v4123_v59 = vmul.f32 %v7789_v10, %v7777_v48 }
0x190d   :  { %v7793_v14 = vpop.eup %7792  ;;  %v4120_v33 = vmul.f32 %v7791_v62, %v9298_v4  ;;  %v4318_v2 = vpop.permute.xlu1 %4317 }
0x190e   :  { %v4122_v6 = vmul.f32 %v7793_v14, %v9294_v18  ;;  %v4328_v25 = vsel %vm1021_vm1, %v4318_v2, 0  ;;  %v4557_v42 = vpop.permute.xlu0 %4556 }
0x190f   :  { %v7795_v36 = vpop.eup %7794 }
0x1910   :  { %v4121_v63 = vmul.f32 %v7795_v36, %v7779_v31  ;;  %v4125_v22 = vpack.c.bf16 %v4123_v59, %v4122_v6 }
0x1911   :  { %v4316_v47 = vpop.permute.xlu1 %4315 }
0x1912   :  { %v4124_v16 = vpack.c.bf16 %v4121_v63, %v4120_v33 }
0x1914   :  { %7236 = vmatprep.mubr.msk.bf16.mxu1 %vm1083_vm2, %v4124_v16 }
0x1915   :  { %7237 = vmatmul.mubr.msk.bf16.vlgmr.msra.gmra.mxu1 %vm1083_vm2, %v4125_v22  ;;  %v4561_v58 = vpop.permute.xlu1 %4560 }
0x1916   :  { %7241 = vmatpush3.bf16.msra.mxu1 %v9337_v24  ;;  %v4571_v37 = vsel %vm1021_vm1, %v4561_v58, 0 }
0x1917   :  { %7444 = vmatprep.subr.msk.bf16.mxu1 %vm1021_vm1, %v4320_v54 }
0x1919   :  { %v4559_v27 = vpop.permute.xlu1 %4558 }
0x1962   :  { %v7222_v23 = vpop.f32.mrf.mxu1 }
0x1964   :  { %v3990_v53 = vpop.f32.mrf.mxu1 }
0x1966   :  { %v7223_v0 = vpop.f32.mrf.mxu1 }
0x1967   :  { %v4006_v4 = vpack.c.bf16 %v7223_v0, %v7222_v23 }
0x1968   :  { %v3993_v48 = vpop.f32.mrf.mxu1 }
0x1969   :  { %v4005_v43 = vpack.c.bf16 %v3993_v48, %v3990_v53 }
0x196b   :  { %7248 = vmatprep.mubr.msk.bf16.mxu0 %vm1021_vm1, %v4005_v43 }
0x196c   :  { %7249 = vmatmul.mubr.msk.bf16.vlgmr.msra.gmra.mxu0 %vm1021_vm1, %v4006_v4 }
0x19d5   :  { %v7238_v18 = vpop.f32.mrf.mxu1 }
0x19d7   :  { %v4174_v31 = vpop.f32.mrf.mxu1 }
0x19d9   :  { %v7239_v39 = vpop.f32.mrf.mxu1 }
0x19da   :  { %v4190_v17 = vpack.c.bf16 %v7239_v39, %v7238_v18 }
0x19db   :  { %v4177_v61 = vpop.f32.mrf.mxu1 }
0x19dc   :  { %v4189_v11 = vpack.c.bf16 %v4177_v61, %v4174_v31 }
0x19de   :  { %7242 = vmatprep.mubr.msk.bf16.mxu1 %vm1021_vm1, %v4189_v11 }
0x19df   :  { %7243 = vmatmul.mubr.msk.bf16.vlgmr.msra.gmra.mxu1 %vm1021_vm1, %v4190_v17 }
0x19e0   :  { %7253 = vmatpush3.bf16.xpose.msra.mxu1 %v4331_v51  ;;  %7256 = vmatprep.mubr.msk.bf16.mxu1 %vm1021_vm1, %v4314_v19 }
0x19e1   :  { %7445 = vmatprep.subr.msk.bf16.mxu1 %vm1021_vm1, %v4318_v2 }
0x19e8   :  { %7255 = vmatpush3.bf16.xpose.msra.mxu1 %v4328_v25 }
0x19e9   :  { %7446 = vmatprep.subr.msk.bf16.mxu1 %vm1021_vm1, %v4563_v26 }
0x19ef   :  { %7257 = vmatmul.mubr.msk.bf16.vlgmr.msra.gmra.mxu1 %vm1021_vm1, %v4316_v47 }
0x19f0   :  { %7275 = vmatpush3.bf16.xpose.msra.mxu1 %v4574_v41  ;;  %7278 = vmatprep.mubr.msk.bf16.mxu1 %vm1021_vm1, %v4557_v42 }
0x19f1   :  { %7447 = vmatprep.subr.msk.bf16.mxu1 %vm1021_vm1, %v4561_v58 }
0x19f8   :  { %7277 = vmatpush3.bf16.xpose.msra.mxu1 %v4571_v37 }
0x19f9   :  { %7448 = vmatprep.subr.msk.bf16.mxu1 %vm1021_vm1, %v9223_v13 }
0x19ff   :  { %7279 = vmatmul.mubr.msk.bf16.vlgmr.msra.gmra.mxu1 %vm1021_vm1, %v4559_v27 }
0x1a00   :  { %7297 = vmatpush3.bf16.xpose.msra.mxu1 %v4809_v30  ;;  %7300 = vmatprep.mubr.msk.bf16.mxu1 %vm1021_vm1, %v9205_v7 }
0x1a01   :  { %7449 = vmatprep.subr.msk.bf16.mxu1 %vm1021_vm1, %v9364_v52 }
0x1a08   :  { %7299 = vmatpush3.bf16.xpose.msra.mxu1 %v4806_v3 }
0x1a0f   :  { %7301 = vmatmul.mubr.msk.bf16.vlgmr.msra.gmra.mxu1 %vm1021_vm1, %v9201_v8 }
0x1a9f   :  { %v9377_v49 = vpop.f32.mrf.mxu1 }
0x1aa1   :  { %v9379_v20 = vpop.f32.mrf.mxu1 }
0x1aa3   :  { %v9381_v46 = vpop.f32.mrf.mxu1 }
0x1aa5   :  { %v9383_v57 = vpop.f32.mrf.mxu1 }
0x1aaf   :  { %v7258_v34 = vpop.f32.mrf.mxu1 }
0x1ab0   :  { %v4376_v36 = vadd.f32 %v9258_v5, %v7258_v34 }
0x1ab1   :  { %v4367_v10 = vpop.f32.mrf.mxu1 }
0x1ab2   :  { %v4368_v62 = vadd.f32 %v9252_v9, %v4367_v10  ;;  %v4388_v22 = vsel %vm1083_vm2, %v4376_v36, -inf }
0x1ab3   :  { %v7259_v14 = vpop.f32.mrf.mxu1 }
0x1ab4   :  { %v4382_v59 = vsel %vm1083_vm2, %v4368_v62, -inf  ;;  %v4379_v6 = vadd.f32 %v9271_v56, %v7259_v14 }
0x1ab5   :  { %v4370_v33 = vpop.f32.mrf.mxu1  ;;  %4383 = vmax.xlane.f32.xlu0 %v4382_v59 }
0x1ab6   :  { %v4371_v63 = vadd.f32 %v9265_v50, %v4370_v33  ;;  %v4391_v54 = vsel %vm1083_vm2, %v4379_v6, -inf }
0x1ab8   :  { %v4385_v16 = vsel %vm1083_vm2, %v4371_v63, -inf }
0x1ab9   :  { %4386 = vmax.xlane.f32.xlu1 %v4385_v16  ;;  %4389 = vmax.xlane.f32.xlu0 %v4388_v22 }
0x1abd   :  { %4392 = vmax.xlane.f32.xlu0 %v4391_v54 }
0x1abf   :  { %v7280_v58 = vpop.f32.mrf.mxu1 }
0x1ac0   :  { %v4619_v10 = vadd.f32 %v9258_v5, %v7280_v58 }
0x1ac1   :  { %v4610_v37 = vpop.f32.mrf.mxu1 }
0x1ac2   :  { %v4611_v34 = vadd.f32 %v9252_v9, %v4610_v37  ;;  %v4631_v59 = vsel %vm1083_vm2, %v4619_v10, -inf }
0x1ac3   :  { %v7281_v27 = vpop.f32.mrf.mxu1 }
0x1ac4   :  { %v4622_v14 = vadd.f32 %v9271_v56, %v7281_v27 }
0x1ac5   :  { %v4613_v30 = vpop.f32.mrf.mxu1 }
0x1ac6   :  { %v4614_v3 = vadd.f32 %v9265_v50, %v4613_v30  ;;  %v4634_v33 = vsel %vm1083_vm2, %v4622_v14, -inf }
0x1b3e   :  { %v4384_v23 = vpop.xlane.xlu0 %4383 }
0x1b3f   :  { %v4394_v53 = vsub.f32 %v4368_v62, %v4384_v23  ;;  %v4628_v62 = vsel %vm1083_vm2, %v4614_v3, -inf }
0x1b41   :  { %v4398_v31 = vmul.f32 1.442695, %v4394_v53 }
0x1b42   :  { %v4387_v0 = vpop.xlane.xlu1 %4386  ;;  %v4390_v48 = vpop.xlane.xlu0 %4389 }
0x1b43   :  { %v4396_v43 = vsub.f32 %v4376_v36, %v4390_v48  ;;  %v4395_v4 = vsub.f32 %v4371_v63, %v4387_v0  ;;  %v4625_v36 = vsel %vm1083_vm2, %v4611_v34, -inf }
0x1b45   :  { %v4402_v18 = vmul.f32 1.442695, %v4396_v43  ;;  %v4400_v11 = vmul.f32 1.442695, %v4395_v4 }
0x1b46   :  { %v4393_v39 = vpop.xlane.xlu0 %4392 }
0x1b47   :  { %v4397_v61 = vsub.f32 %v4379_v6, %v4393_v39  ;;  %7796 = vpow2.f32 %v4402_v18 }
0x1b48   :  { %7798 = vpow2.f32 %v4398_v31 }
0x1b49   :  { %v4404_v17 = vmul.f32 1.442695, %v4397_v61 }
0x1b4b   :  { %7800 = vpow2.f32 %v4404_v17 }
0x1b4c   :  { %7802 = vpow2.f32 %v4400_v11 }
0x1b54   :  { %v7797_v19 = vpop.eup %7796 }
0x1b55   :  { %v4412_v51 = vsel %vm1083_vm2, %v7797_v19, 0.0  ;;  %v7799_v2 = vpop.eup %7798 }
0x1b56   :  { %4413 = vadd.xlane.f32.xlu0 %v4412_v51  ;;  %v4406_v41 = vsel %vm1083_vm2, %v7799_v2, 0.0 }
0x1b58   :  { %v7801_v25 = vpop.eup %7800 }
0x1b59   :  { %v4415_v26 = vsel %vm1083_vm2, %v7801_v25, 0.0  ;;  %v7803_v47 = vpop.eup %7802 }
0x1b5a   :  { %4416 = vadd.xlane.f32.xlu1 %v4415_v26  ;;  %4407 = vadd.xlane.f32.xlu0 %v4406_v41  ;;  %v4409_v42 = vsel %vm1083_vm2, %v7803_v47, 0.0 }
0x1b5e   :  { %4410 = vadd.xlane.f32.xlu1 %v4409_v42 }
0x1b6f   :  { %4428 = vrot.lane.b32.xlu1 %v9234_v21, %s7961_s3 }
0x1b70   :  { %4430 = vrot.lane.b32.xlu0 %v9227_v15, %s7961_s3 }
0x1b8f   :  { %4629 = vmax.xlane.f32.xlu0 %v4628_v62 }
0x1b93   :  { %4626 = vmax.xlane.f32.xlu1 %v4625_v36  ;;  %4632 = vmax.xlane.f32.xlu0 %v4631_v59 }
0x1b97   :  { %4635 = vmax.xlane.f32.xlu1 %v4634_v33  ;;  %v9424_v33 = vld [vmem:[%s9821_s9 + $0x30] sm:$0xff]  }
0x1bdf   :  { %v4414_v63 = vpop.xlane.xlu0 %4413 }
0x1be3   :  { %v4417_v6 = vpop.xlane.xlu1 %4416  ;;  %v4408_v16 = vpop.xlane.xlu0 %4407 }
0x1be4   :  { %7804 = vrcp.f32 %v4417_v6 }
0x1be5   :  { %7806 = vrcp.f32 %v4408_v16 }
0x1be6   :  { %7808 = vrcp.f32 %v4414_v63  ;;  %v7302_v63 = vpop.f32.mrf.mxu1 }
0x1be7   :  { %v4411_v22 = vpop.xlane.xlu1 %4410  ;;  %v4431_v54 = vpop.permute.xlu0 %4430 }
0x1be8   :  { %7810 = vrcp.f32 %v4411_v22  ;;  %7260 = vmatprep.subr.bf16.mxu0 %v4431_v54  ;;  %v4845_v6 = vpop.f32.mrf.mxu1 }
0x1be9   :  { %7261 = vmatpush3.bf16.msra.mxu0 %v4431_v54 }
0x1bea   :  { %v7303_v16 = vpop.f32.mrf.mxu1 }
0x1beb   :  { %v4429_v23 = vpop.permute.xlu1 %4428 }
0x1bec   :  { %7262 = vmatprep.subr.bf16.mxu0 %v4429_v23  ;;  %v4848_v22 = vpop.f32.mrf.mxu1 }
0x1bed   :  { %7263 = vmatpush3.bf16.msra.mxu0 %v4429_v23  ;;  %v4849_v54 = vadd.f32 %v9265_v50, %v4848_v22  ;;  %v4846_v23 = vadd.f32 %v9252_v9, %v4845_v6 }
0x1bee   :  { %7268 = vmatprep.subr.bf16.mxu0 %v9424_v33 }
0x1bf1   :  { %v7805_v53 = vpop.eup %7804 }
0x1bf2   :  { %v7807_v0 = vpop.eup %7806  ;;  %v4425_v4 = vmul.f32 %v7805_v53, %v7801_v25  ;;  %v4854_v53 = vadd.f32 %v9258_v5, %v7302_v63 }
0x1bf3   :  { %v7809_v48 = vpop.eup %7808  ;;  %v4422_v18 = vmul.f32 %v7807_v0, %v7799_v2  ;;  %v4863_v0 = vsel %vm1083_vm2, %v4849_v54, -inf }
0x1bf4   :  { %v4424_v39 = vmul.f32 %v7809_v48, %v7797_v19  ;;  %v4857_v48 = vadd.f32 %v9271_v56, %v7303_v16 }
0x1bf5   :  { %v7811_v43 = vpop.eup %7810 }
0x1bf6   :  { %v4423_v31 = vmul.f32 %v7811_v43, %v7803_v47  ;;  %v4427_v11 = vpack.c.bf16 %v4425_v4, %v4424_v39  ;;  %v4866_v43 = vsel %vm1083_vm2, %v4854_v53, -inf  ;;  %v9440_v4 = vpop.f32.mrf.mxu0 }
0x1bf8   :  { %v4426_v61 = vpack.c.bf16 %v4423_v31, %v4422_v18  ;;  %v9442_v18 = vpop.f32.mrf.mxu0 }
0x1bfa   :  { %7264 = vmatprep.mubr.msk.bf16.mxu0 %vm1083_vm2, %v4426_v61  ;;  %v9444_v31 = vpop.f32.mrf.mxu0 }
0x1bfb   :  { %7265 = vmatmul.mubr.msk.bf16.vlgmr.msra.gmra.mxu0 %vm1083_vm2, %v4427_v11 }
0x1bfc   :  { %7269 = vmatpush3.bf16.msra.mxu0 %v9424_v33  ;;  %v9446_v39 = vpop.f32.mrf.mxu0 }
0x1c18   :  { %v4630_v17 = vpop.xlane.xlu0 %4629 }
0x1c19   :  { %v4638_v58 = vsub.f32 %v4614_v3, %v4630_v17 }
0x1c1b   :  { %v4643_v2 = vmul.f32 1.442695, %v4638_v58 }
0x1c1c   :  { %v4627_v51 = vpop.xlane.xlu1 %4626  ;;  %v4633_v41 = vpop.xlane.xlu0 %4632 }
0x1c1d   :  { %v4637_v26 = vsub.f32 %v4611_v34, %v4627_v51  ;;  %v4639_v42 = vsub.f32 %v4619_v10, %v4633_v41 }
0x1c1f   :  { %v4641_v37 = vmul.f32 1.442695, %v4637_v26  ;;  %v4645_v27 = vmul.f32 1.442695, %v4639_v42 }
0x1c20   :  { %v4636_v30 = vpop.xlane.xlu1 %4635 }
0x1c21   :  { %v4640_v62 = vsub.f32 %v4622_v14, %v4636_v30  ;;  %7812 = vpow2.f32 %v4645_v27 }
0x1c22   :  { %7814 = vpow2.f32 %v4641_v37 }
0x1c23   :  { %v4647_v25 = vmul.f32 1.442695, %v4640_v62 }
0x1c25   :  { %7816 = vpow2.f32 %v4647_v25 }
0x1c26   :  { %7818 = vpow2.f32 %v4643_v2  ;;  %v9453_v2 = vld [vmem:[%s9821_s9 + $0x38] sm:$0xff]  }
0x1c2e   :  { %v9411_v19 = vpop.eup %7812 }
0x1c2f   :  { %v4655_v47 = vsel %vm1083_vm2, %v9411_v19, 0.0  ;;  %v9415_v36 = vpop.eup %7814 }
0x1c30   :  { %4656 = vadd.xlane.f32.xlu0 %v4655_v47  ;;  %v4649_v14 = vsel %vm1083_vm2, %v9415_v36, 0.0 }
0x1c32   :  { %v7817_v34 = vpop.eup %7816 }
0x1c33   :  { %v4658_v3 = vsel %vm1083_vm2, %v7817_v34, 0.0  ;;  %v7819_v10 = vpop.eup %7818 }
0x1c34   :  { %4659 = vadd.xlane.f32.xlu1 %v4658_v3  ;;  %4650 = vadd.xlane.f32.xlu0 %v4649_v14  ;;  %v4652_v59 = vsel %vm1083_vm2, %v7819_v10, 0.0 }
0x1c38   :  { %4653 = vadd.xlane.f32.xlu1 %v4652_v59 }
0x1c49   :  { %4671 = vrot.lane.b32.xlu1 %v9234_v21, %s7962_s27  ;;  %v4860_v21 = vsel %vm1083_vm2, %v4846_v23, -inf }
0x1c4a   :  { %4673 = vrot.lane.b32.xlu0 %v9227_v15, %s7962_s27  ;;  %v4869_v15 = vsel %vm1083_vm2, %v4857_v48, -inf }
0x1c69   :  { %4864 = vmax.xlane.f32.xlu0 %v4863_v0 }
0x1c6d   :  { %4861 = vmax.xlane.f32.xlu1 %v4860_v21  ;;  %4867 = vmax.xlane.f32.xlu0 %v4866_v43 }
0x1c71   :  { %4870 = vmax.xlane.f32.xlu1 %v4869_v15 }
0x1cb9   :  { %v4657_v61 = vpop.xlane.xlu0 %4656 }
0x1cbb   :  { %v7266_v11 = vpop.f32.mrf.mxu0 }
0x1cbd   :  { %v4660_v17 = vpop.xlane.xlu1 %4659  ;;  %v4474_v51 = vpop.f32.mrf.mxu0 }
0x1cbe   :  { %v4651_v26 = vpop.xlane.xlu0 %4650  ;;  %7820 = vrcp.f32 %v4660_v17 }
0x1cbf   :  { %v7267_v41 = vpop.f32.mrf.mxu0  ;;  %7822 = vrcp.f32 %v4651_v26 }
0x1cc0   :  { %7824 = vrcp.f32 %v4657_v61  ;;  %v4490_v30 = vpack.c.bf16 %v7267_v41, %v7266_v11 }
0x1cc1   :  { %v4477_v42 = vpop.f32.mrf.mxu0  ;;  %v4654_v58 = vpop.xlane.xlu1 %4653 }
0x1cc2   :  { %v4489_v37 = vpack.c.bf16 %v4477_v42, %v4474_v51  ;;  %7826 = vrcp.f32 %v4654_v58  ;;  %v4674_v27 = vpop.permute.xlu0 %4673 }
0x1cc3   :  { %7282 = vmatprep.subr.bf16.mxu0 %v4674_v27 }
0x1cc4   :  { %7270 = vmatprep.mubr.msk.bf16.mxu0 %vm1021_vm1, %v4489_v37 }
0x1cc5   :  { %7271 = vmatmul.mubr.msk.bf16.vlgmr.msra.gmra.mxu0 %vm1021_vm1, %v4490_v30  ;;  %v4672_v62 = vpop.permute.xlu1 %4671 }
0x1cc6   :  { %7283 = vmatpush3.bf16.msra.mxu0 %v4674_v27 }
0x1cc7   :  { %7284 = vmatprep.subr.bf16.mxu0 %v4672_v62 }
0x1cca   :  { %7285 = vmatpush3.bf16.msra.mxu0 %v4672_v62  ;;  %v4299_v62 = vadd.f32 %v9442_v18, %v9379_v20 }
0x1ccb   :  { %7290 = vmatprep.subr.bf16.mxu0 %v9453_v2  ;;  %v7821_v25 = vpop.eup %7820 }
0x1ccc   :  { %v7823_v47 = vpop.eup %7822  ;;  %v4668_v59 = vmul.f32 %v7821_v25, %v7817_v34 }
0x1ccd   :  { %v7825_v3 = vpop.eup %7824  ;;  %v4665_v63 = vmul.f32 %v7823_v47, %v9415_v36 }
0x1cce   :  { %v4667_v16 = vmul.f32 %v7825_v3, %v9411_v19  ;;  %v4310_v3 = vadd.f32 %v9444_v31, %v9381_v46 }
0x1ccf   :  { %v7827_v14 = vpop.eup %7826 }
0x1cd0   :  { %v4666_v6 = vmul.f32 %v7827_v14, %v7819_v10  ;;  %v4670_v0 = vpack.c.bf16 %v4668_v59, %v4667_v16 }
0x1cd2   :  { %v4669_v22 = vpack.c.bf16 %v4666_v6, %v4665_v63  ;;  %v4302_v63 = vadd.f32 %v9446_v39, %v9383_v57  ;;  %v9485_v57 = vpack.c.bf16 %v9247_v45, %v9199_v38 }
0x1cd4   :  { %7286 = vmatprep.mubr.msk.bf16.mxu0 %vm1083_vm2, %v4669_v22 }
0x1cd5   :  { %7287 = vmatmul.mubr.msk.bf16.vlgmr.msra.gmra.mxu0 %vm1083_vm2, %v4670_v0 }
0x1cd6   :  { %7291 = vmatpush3.bf16.msra.mxu0 %v9453_v2 }
0x1cd7   :  { %7304 = vmatprep.subr.bf16.mxu0 %v9203_v55 }
0x1cf2   :  { %v4865_v21 = vpop.xlane.xlu0 %4864 }
0x1cf3   :  { %v4873_v43 = vsub.f32 %v4849_v54, %v4865_v21 }
0x1cf5   :  { %v4878_v15 = vmul.f32 1.442695, %v4873_v43 }
0x1cf6   :  { %v4862_v61 = vpop.xlane.xlu1 %4861  ;;  %v4868_v34 = vpop.xlane.xlu0 %4867 }
0x1cf7   :  { %v4872_v11 = vsub.f32 %v4846_v23, %v4862_v61  ;;  %7828 = vpow2.f32 %v4878_v15  ;;  %v4874_v36 = vsub.f32 %v4854_v53, %v4868_v34 }
0x1cf9   :  { %v4880_v10 = vmul.f32 1.442695, %v4874_v36  ;;  %v4876_v19 = vmul.f32 1.442695, %v4872_v11 }
0x1cfa   :  { %v4871_v17 = vpop.xlane.xlu1 %4870 }
0x1cfb   :  { %v4875_v51 = vsub.f32 %v4857_v48, %v4871_v17  ;;  %7830 = vpow2.f32 %v4880_v10  ;;  %v4307_v48 = vadd.f32 %v9440_v4, %v9377_v49 }
0x1cfc   :  { %7832 = vpow2.f32 %v4876_v19 }
0x1cfd   :  { %v4882_v26 = vmul.f32 1.442695, %v4875_v51 }
0x1cff   :  { %7834 = vpow2.f32 %v4882_v26 }
0x1d04   :  { %v7829_v41 = vpop.eup %7828 }
0x1d05   :  { %v4887_v42 = vsel %vm1083_vm2, %v7829_v41, 0.0 }
0x1d06   :  { %4888 = vadd.xlane.f32.xlu1 %v4887_v42 }
0x1d08   :  { %v7831_v58 = vpop.eup %7830 }
0x1d09   :  { %v4890_v54 = vsel %vm1083_vm2, %v7831_v58, 0.0  ;;  %v7833_v37 = vpop.eup %7832 }
0x1d0a   :  { %4891 = vadd.xlane.f32.xlu0 %v4890_v54  ;;  %v4884_v27 = vsel %vm1083_vm2, %v7833_v37, 0.0 }
0x1d0c   :  { %v7835_v23 = vpop.eup %7834 }
0x1d0d   :  { %v4893_v53 = vsel %vm1083_vm2, %v7835_v23, 0.0 }
0x1d0e   :  { %4894 = vadd.xlane.f32.xlu1 %v4893_v53  ;;  %4885 = vadd.xlane.f32.xlu0 %v4884_v27 }
0x1d1f   :  { %4971 = vrot.lane.b32.xlu1 %v9364_v52, %s7960_s29 }
0x1d23   :  { %4965 = vrot.lane.b32.xlu1 %v9205_v7, %s7960_s29 }
0x1d24   :  { %4973 = vrot.lane.b32.xlu0 %v9223_v13, %s7960_s29 }
0x1d27   :  { %4967 = vrot.lane.b32.xlu1 %v9201_v8, %s7960_s29 }
0x1d85   :  { %v7272_v30 = vpop.f32.mrf.mxu0 }
0x1d86   :  { %v4554_v25 = vadd.f32 %v7272_v30, %v4307_v48 }
0x1d87   :  { %v4537_v47 = vpop.f32.mrf.mxu0 }
0x1d88   :  { %v4552_v14 = vadd.f32 %v4537_v47, %v4299_v62 }
0x1d89   :  { %v7273_v59 = vpop.f32.mrf.mxu0 }
0x1d8a   :  { %v4555_v6 = vadd.f32 %v7273_v59, %v4310_v3 }
0x1d8b   :  { %v4540_v16 = vpop.f32.mrf.mxu0 }
0x1d8c   :  { %v4553_v22 = vadd.f32 %v4540_v16, %v4302_v63 }
0x1d8f   :  { %v4889_v0 = vpop.xlane.xlu1 %4888 }
0x1d93   :  { %v4892_v21 = vpop.xlane.xlu0 %4891 }
0x1d94   :  { %7836 = vrcp.f32 %v4892_v21 }
0x1d95   :  { %v7288_v49 = vpop.f32.mrf.mxu0  ;;  %7838 = vrcp.f32 %v4889_v0 }
0x1d97   :  { %v4717_v4 = vpop.f32.mrf.mxu0  ;;  %v4895_v20 = vpop.xlane.xlu1 %4894 }
0x1d98   :  { %v4886_v18 = vpop.xlane.xlu0 %4885  ;;  %7840 = vrcp.f32 %v4895_v20 }
0x1d99   :  { %7842 = vrcp.f32 %v4886_v18  ;;  %v7289_v43 = vpop.f32.mrf.mxu0 }
0x1d9a   :  { %v4733_v15 = vpack.c.bf16 %v7289_v43, %v7288_v49 }
0x1d9b   :  { %v4720_v46 = vpop.f32.mrf.mxu0  ;;  %v4972_v17 = vpop.permute.xlu1 %4971 }
0x1d9c   :  { %v4732_v31 = vpack.c.bf16 %v4720_v46, %v4717_v4  ;;  %v4974_v34 = vpop.permute.xlu0 %4973 }
0x1d9d   :  { %v4985_v42 = vsel %vm1021_vm1, %v4974_v34, 0 }
0x1d9e   :  { %7292 = vmatprep.mubr.msk.bf16.mxu0 %vm1021_vm1, %v4732_v31 }
0x1d9f   :  { %7293 = vmatmul.mubr.msk.bf16.vlgmr.msra.gmra.mxu0 %vm1021_vm1, %v4733_v15  ;;  %v4966_v54 = vpop.permute.xlu1 %4965 }
0x1da0   :  { %7305 = vmatpush3.bf16.msra.mxu0 %v9203_v55 }
0x1da1   :  { %7306 = vmatprep.subr.bf16.mxu0 %v9485_v57  ;;  %v7837_v39 = vpop.eup %7836 }
0x1da2   :  { %v7839_v61 = vpop.eup %7838  ;;  %v4902_v10 = vmul.f32 %v7837_v39, %v7831_v58  ;;  %v4982_v58 = vsel %vm1021_vm1, %v4972_v17, 0 }
0x1da3   :  { %v4901_v45 = vmul.f32 %v7839_v61, %v7829_v41  ;;  %v4968_v41 = vpop.permute.xlu1 %4967 }
0x1da4   :  { %7307 = vmatpush3.bf16.msra.mxu0 %v9485_v57 }
0x1da5   :  { %v7841_v11 = vpop.eup %7840  ;;  %7450 = vmatprep.subr.msk.bf16.mxu0 %vm1021_vm1, %v4974_v34 }
0x1da6   :  { %v7843_v36 = vpop.eup %7842  ;;  %v4903_v19 = vmul.f32 %v7841_v11, %v7835_v23 }
0x1da7   :  { %v4900_v38 = vmul.f32 %v7843_v36, %v7833_v37 }
0x1da8   :  { %v4905_v51 = vpack.c.bf16 %v4903_v19, %v4902_v10 }
0x1da9   :  { %v4904_v26 = vpack.c.bf16 %v4901_v45, %v4900_v38 }
0x1dab   :  { %7308 = vmatprep.mubr.msk.bf16.mxu0 %vm1083_vm2, %v4904_v26 }
0x1dac   :  { %7309 = vmatmul.mubr.msk.bf16.vlgmr.msra.gmra.mxu0 %vm1083_vm2, %v4905_v51 }
0x1dad   :  { %7313 = vmatpush3.bf16.xpose.msra.mxu0 %v4985_v42  ;;  %7316 = vmatprep.mubr.msk.bf16.mxu0 %vm1021_vm1, %v4966_v54 }
0x1dae   :  { %7451 = vmatprep.subr.msk.bf16.mxu0 %vm1021_vm1, %v4972_v17 }
0x1db5   :  { %7315 = vmatpush3.bf16.xpose.msra.mxu0 %v4982_v58 }
0x1db6   :  { %7334 = vmatprep.subr.bf16.mxu0 %v9330_v35 }
0x1dbc   :  { %7317 = vmatmul.mubr.msk.bf16.vlgmr.msra.gmra.mxu0 %vm1021_vm1, %v4968_v41 }
0x1dbd   :  { %7335 = vmatpush3.bf16.msra.mxu0 %v9330_v35 }
0x1e5f   :  { %v7294_v37 = vpop.f32.mrf.mxu0 }
0x1e60   :  { %v9501_v23 = vadd.f32 %v7294_v37, %v4554_v25 }
0x1e61   :  { %v4780_v53 = vpop.f32.mrf.mxu0 }
0x1e62   :  { %v9503_v27 = vadd.f32 %v4780_v53, %v4552_v14 }
0x1e63   :  { %v7295_v48 = vpop.f32.mrf.mxu0 }
0x1e64   :  { %v9505_v30 = vadd.f32 %v7295_v48, %v4555_v6 }
0x1e65   :  { %v4783_v62 = vpop.f32.mrf.mxu0 }
0x1e66   :  { %v9507_v47 = vadd.f32 %v4783_v62, %v4553_v22 }
0x1e6c   :  { %v7310_v3 = vpop.f32.mrf.mxu0 }
0x1e6e   :  { %v4946_v59 = vpop.f32.mrf.mxu0 }
0x1e70   :  { %v7311_v63 = vpop.f32.mrf.mxu0 }
0x1e71   :  { %v4962_v21 = vpack.c.bf16 %v7311_v63, %v7310_v3 }
0x1e72   :  { %v4949_v16 = vpop.f32.mrf.mxu0 }
0x1e73   :  { %v4961_v0 = vpack.c.bf16 %v4949_v16, %v4946_v59 }
0x1e75   :  { %7336 = vmatprep.mubr.msk.bf16.mxu0 %vm1021_vm1, %v4961_v0 }
0x1e76   :  { %7337 = vmatmul.mubr.msk.bf16.vlgmr.msra.gmra.mxu0 %vm1021_vm1, %v4962_v21 }
0x1e7c   :  { %v7318_v35 = vpop.f32.mrf.mxu0 }
0x1e7d   :  { %v5030_v6 = vadd.f32 %v9258_v5, %v7318_v35 }
0x1e7e   :  { %v5021_v25 = vpop.f32.mrf.mxu0 }
0x1e7f   :  { %v5022_v14 = vadd.f32 %v9252_v9, %v5021_v25  ;;  %v5042_v46 = vsel %vm1083_vm2, %v5030_v6, -inf }
0x1e80   :  { %v7319_v49 = vpop.f32.mrf.mxu0 }
0x1e81   :  { %v5036_v22 = vsel %vm1083_vm2, %v5022_v14, -inf  ;;  %v5033_v18 = vadd.f32 %v9271_v56, %v7319_v49 }
0x1e82   :  { %v5024_v4 = vpop.f32.mrf.mxu0  ;;  %5037 = vmax.xlane.f32.xlu0 %v5036_v22 }
0x1e83   :  { %v5025_v20 = vadd.f32 %v9265_v50, %v5024_v4  ;;  %v5045_v31 = vsel %vm1083_vm2, %v5033_v18, -inf }
0x1e85   :  { %v5039_v43 = vsel %vm1083_vm2, %v5025_v20, -inf }
0x1e86   :  { %5040 = vmax.xlane.f32.xlu1 %v5039_v43  ;;  %5043 = vmax.xlane.f32.xlu0 %v5042_v46 }
0x1e8a   :  { %5046 = vmax.xlane.f32.xlu0 %v5045_v31 }
0x1f0b   :  { %v5038_v9 = vpop.xlane.xlu0 %5037 }
0x1f0c   :  { %v5048_v15 = vsub.f32 %v5022_v14, %v5038_v9 }
0x1f0e   :  { %v5052_v36 = vmul.f32 1.442695, %v5048_v15 }
0x1f0f   :  { %v5041_v5 = vpop.xlane.xlu1 %5040  ;;  %v5044_v39 = vpop.xlane.xlu0 %5043 }
0x1f10   :  { %v5050_v61 = vsub.f32 %v5030_v6, %v5044_v39  ;;  %v5049_v34 = vsub.f32 %v5025_v20, %v5041_v5 }
0x1f12   :  { %v5056_v11 = vmul.f32 1.442695, %v5050_v61  ;;  %v5054_v56 = vmul.f32 1.442695, %v5049_v34 }
0x1f13   :  { %v5047_v50 = vpop.xlane.xlu0 %5046 }
0x1f14   :  { %v5051_v10 = vsub.f32 %v5033_v18, %v5047_v50  ;;  %7844 = vpow2.f32 %v5056_v11 }
0x1f15   :  { %7846 = vpow2.f32 %v5052_v36 }
0x1f16   :  { %v5058_v19 = vmul.f32 1.442695, %v5051_v10 }
0x1f18   :  { %7848 = vpow2.f32 %v5058_v19 }
0x1f19   :  { %7850 = vpow2.f32 %v5054_v56 }
0x1f21   :  { %v7845_v17 = vpop.eup %7844 }
0x1f22   :  { %v5066_v38 = vsel %vm1083_vm2, %v7845_v17, 0.0  ;;  %v7847_v45 = vpop.eup %7846 }
0x1f23   :  { %5067 = vadd.xlane.f32.xlu0 %v5066_v38  ;;  %v5060_v54 = vsel %vm1083_vm2, %v7847_v45, 0.0 }
0x1f25   :  { %v7849_v51 = vpop.eup %7848 }
0x1f26   :  { %v5069_v26 = vsel %vm1083_vm2, %v7849_v51, 0.0  ;;  %v7851_v42 = vpop.eup %7850 }
0x1f27   :  { %5070 = vadd.xlane.f32.xlu1 %v5069_v26  ;;  %5061 = vadd.xlane.f32.xlu0 %v5060_v54  ;;  %v5063_v58 = vsel %vm1083_vm2, %v7851_v42, 0.0 }
0x1f2b   :  { %5064 = vadd.xlane.f32.xlu1 %v5063_v58  ;;  %v7936_v58 = vld [vmem:[%s9843_s21 + $0x8] sm:$0xff] }
0x1f3c   :  { %5084 = vrot.lane.b32.xlu1 %v9485_v57, %s7960_s29 }
0x1f3d   :  { %5086 = vrot.lane.b32.xlu0 %v9203_v55, %s7960_s29 }
0x1f40   :  { %5263 = vrot.lane.b32.xlu1 %v9223_v13, %s7961_s3 }
0x1f41   :  { %5257 = vrot.lane.b32.xlu0 %v9205_v7, %s7961_s3 }
0x1f44   :  { %5261 = vrot.lane.b32.xlu1 %v9364_v52, %s7961_s3 }
0x1f45   :  { %5500 = vrot.lane.b32.xlu0 %v9223_v13, %s7962_s27 }
0x1f48   :  { %5259 = vrot.lane.b32.xlu1 %v9201_v8, %s7961_s3 }
0x1f49   :  { %5494 = vrot.lane.b32.xlu0 %v9205_v7, %s7962_s27 }
0x1f4c   :  { %5498 = vrot.lane.b32.xlu1 %v9364_v52, %s7962_s27 }
0x1f50   :  { %5496 = vrot.lane.b32.xlu1 %v9201_v8, %s7962_s27 }
0x1fac   :  { %v5068_v41 = vpop.xlane.xlu0 %5067 }
0x1fb0   :  { %v5071_v37 = vpop.xlane.xlu1 %5070  ;;  %v5062_v53 = vpop.xlane.xlu0 %5061 }
0x1fb1   :  { %7852 = vrcp.f32 %v5071_v37  ;;  %v7937_v37 = vld [vmem:[%s9843_s21 + $0x18] sm:$0xff] }
0x1fb2   :  { %7854 = vrcp.f32 %v5062_v53 }
0x1fb3   :  { %7856 = vrcp.f32 %v5068_v41 }
0x1fb4   :  { %v5065_v48 = vpop.xlane.xlu1 %5064  ;;  %v5087_v13 = vpop.permute.xlu0 %5086 }
0x1fb5   :  { %7858 = vrcp.f32 %v5065_v48  ;;  %7320 = vmatprep.subr.bf16.mxu1 %v5087_v13 }
0x1fb6   :  { %7321 = vmatpush3.bf16.msra.mxu1 %v5087_v13 }
0x1fb8   :  { %v5085_v62 = vpop.permute.xlu1 %5084  ;;  %v5258_v18 = vpop.permute.xlu0 %5257 }
0x1fb9   :  { %7322 = vmatprep.subr.bf16.mxu1 %v5085_v62 }
0x1fba   :  { %7323 = vmatpush3.bf16.msra.mxu1 %v5085_v62 }
0x1fbb   :  { %7328 = vmatprep.subr.bf16.mxu1 %v9337_v24 }
0x1fbc   :  { %v5264_v25 = vpop.permute.xlu1 %5263  ;;  %v5501_v31 = vpop.permute.xlu0 %5500 }
0x1fbd   :  { %v5275_v43 = vsel %vm1021_vm1, %v5264_v25, 0  ;;  %v5512_v15 = vsel %vm1021_vm1, %v5501_v31, 0 }
0x1fbe   :  { %v7853_v7 = vpop.eup %7852 }
0x1fbf   :  { %v7855_v52 = vpop.eup %7854  ;;  %v5079_v59 = vmul.f32 %v7853_v7, %v7849_v51  ;;  %v7935_v51 = vld [vmem:[%s9843_s21 + $0x10] sm:$0xff] }
0x1fc0   :  { %v7857_v3 = vpop.eup %7856  ;;  %v5076_v63 = vmul.f32 %v7855_v52, %v7847_v45  ;;  %v5262_v46 = vpop.permute.xlu1 %5261 }
0x1fc1   :  { %v5078_v0 = vmul.f32 %v7857_v3, %v7845_v17  ;;  %v5495_v5 = vpop.permute.xlu0 %5494  ;;  %v7934_v17 = vld [vmem:[%s9843_s21] sm:$0xff] }
0x1fc2   :  { %v7859_v8 = vpop.eup %7858 }
0x1fc3   :  { %v5077_v16 = vmul.f32 %v7859_v8, %v7851_v42  ;;  %v5081_v35 = vpack.c.bf16 %v5079_v59, %v5078_v0 }
0x1fc4   :  { %v5260_v9 = vpop.permute.xlu1 %5259 }
0x1fc5   :  { %v5080_v21 = vpack.c.bf16 %v5077_v16, %v5076_v63 }
0x1fc7   :  { %7324 = vmatprep.mubr.msk.bf16.mxu1 %vm1083_vm2, %v5080_v21 }
0x1fc8   :  { %7325 = vmatmul.mubr.msk.bf16.vlgmr.msra.gmra.mxu1 %vm1083_vm2, %v5081_v35  ;;  %v5499_v39 = vpop.permute.xlu1 %5498 }
0x1fc9   :  { %7329 = vmatpush3.bf16.msra.mxu1 %v9337_v24  ;;  %v5272_v24 = vsel %vm1021_vm1, %v5262_v46, 0  ;;  %v5509_v61 = vsel %vm1021_vm1, %v5499_v39, 0 }
0x1fca   :  { %7452 = vmatprep.subr.msk.bf16.mxu1 %vm1021_vm1, %v5264_v25 }
0x1fcc   :  { %v5497_v34 = vpop.permute.xlu1 %5496 }
0x2088   :  { %v7326_v14 = vpop.f32.mrf.mxu1 }
0x208a   :  { %v5130_v49 = vpop.f32.mrf.mxu1 }
0x208c   :  { %v7327_v6 = vpop.f32.mrf.mxu1 }
0x208d   :  { %v5146_v20 = vpack.c.bf16 %v7327_v6, %v7326_v14 }
0x208e   :  { %v5133_v22 = vpop.f32.mrf.mxu1 }
0x208f   :  { %v5145_v4 = vpack.c.bf16 %v5133_v22, %v5130_v49 }
0x2091   :  { %7330 = vmatprep.mubr.msk.bf16.mxu1 %vm1021_vm1, %v5145_v4 }
0x2092   :  { %7331 = vmatmul.mubr.msk.bf16.vlgmr.msra.gmra.mxu1 %vm1021_vm1, %v5146_v20 }
0x2093   :  { %7341 = vmatpush3.bf16.xpose.msra.mxu1 %v5275_v43  ;;  %7344 = vmatprep.mubr.msk.bf16.mxu1 %vm1021_vm1, %v5258_v18 }
0x2094   :  { %7453 = vmatprep.subr.msk.bf16.mxu1 %vm1021_vm1, %v5262_v46 }
0x209b   :  { %7343 = vmatpush3.bf16.xpose.msra.mxu1 %v5272_v24 }
0x209c   :  { %7454 = vmatprep.subr.msk.bf16.mxu1 %vm1021_vm1, %v5501_v31 }
0x20a2   :  { %7345 = vmatmul.mubr.msk.bf16.vlgmr.msra.gmra.mxu1 %vm1021_vm1, %v5260_v9 }
0x20a3   :  { %7363 = vmatpush3.bf16.xpose.msra.mxu1 %v5512_v15  ;;  %7366 = vmatprep.mubr.msk.bf16.mxu1 %vm1021_vm1, %v5495_v5 }
0x20a4   :  { %7455 = vmatprep.subr.msk.bf16.mxu1 %vm1021_vm1, %v5499_v39 }
0x20ab   :  { %7365 = vmatpush3.bf16.xpose.msra.mxu1 %v5509_v61 }
0x20b2   :  { %7367 = vmatmul.mubr.msk.bf16.vlgmr.msra.gmra.mxu1 %vm1021_vm1, %v5497_v34 }
0x2152   :  { %v9561_v11 = vpop.f32.mrf.mxu1 }
0x2154   :  { %v9563_v36 = vpop.f32.mrf.mxu1 }
0x2156   :  { %v9565_v50 = vpop.f32.mrf.mxu1 }
0x2158   :  { %v9567_v10 = vpop.f32.mrf.mxu1 }
0x2162   :  { %v7346_v56 = vpop.f32.mrf.mxu1 }
0x2163   :  { %v5320_v26 = vadd.f32 %v7935_v51, %v7346_v56 }
0x2164   :  { %v5311_v19 = vpop.f32.mrf.mxu1 }
0x2165   :  { %v5312_v38 = vadd.f32 %v7934_v17, %v5311_v19  ;;  %v5332_v13 = vsel %vm1083_vm2, %v5320_v26, -inf }
0x2166   :  { %v7347_v45 = vpop.f32.mrf.mxu1 }
0x2167   :  { %v5326_v42 = vsel %vm1083_vm2, %v5312_v38, -inf  ;;  %v5323_v53 = vadd.f32 %v7937_v37, %v7347_v45 }
0x2168   :  { %v5314_v54 = vpop.f32.mrf.mxu1  ;;  %5327 = vmax.xlane.f32.xlu0 %v5326_v42 }
0x2169   :  { %v5315_v41 = vadd.f32 %v7936_v58, %v5314_v54  ;;  %v5335_v62 = vsel %vm1083_vm2, %v5323_v53, -inf }
0x216b   :  { %v5329_v48 = vsel %vm1083_vm2, %v5315_v41, -inf }
0x216c   :  { %5330 = vmax.xlane.f32.xlu1 %v5329_v48  ;;  %5333 = vmax.xlane.f32.xlu0 %v5332_v13 }
0x2170   :  { %5336 = vmax.xlane.f32.xlu0 %v5335_v62 }
0x2172   :  { %v7368_v24 = vpop.f32.mrf.mxu1 }
0x2173   :  { %v5557_v61 = vadd.f32 %v7935_v51, %v7368_v24 }
0x2174   :  { %v5548_v31 = vpop.f32.mrf.mxu1 }
0x2175   :  { %v5549_v39 = vadd.f32 %v7934_v17, %v5548_v31 }
0x2176   :  { %v7369_v9 = vpop.f32.mrf.mxu1 }
0x2177   :  { %v5560_v56 = vadd.f32 %v7937_v37, %v7369_v9  ;;  %v5563_v19 = vsel %vm1083_vm2, %v5549_v39, -inf }
0x2178   :  { %v5551_v15 = vpop.f32.mrf.mxu1 }
0x2179   :  { %v5552_v5 = vadd.f32 %v7936_v58, %v5551_v15  ;;  %v5572_v45 = vsel %vm1083_vm2, %v5560_v56, -inf  ;;  %v5732_v15 = vadd.f32 %v9507_v47, %v9042_v44  ;;  %v5734_v44 = vadd.f32 %v9505_v30, %v9045_v29  ;;  %v7338_v30 = vpop.f32.mrf.mxu0 }
0x217b   :  { %v5566_v34 = vsel %vm1083_vm2, %v5552_v5, -inf  ;;  %v5242_v47 = vpop.f32.mrf.mxu0 }
0x21f1   :  { %v5328_v7 = vpop.xlane.xlu0 %5327 }
0x21f2   :  { %v5338_v52 = vsub.f32 %v5312_v38, %v5328_v7  ;;  %v5569_v38 = vsel %vm1083_vm2, %v5557_v61, -inf }
0x21f4   :  { %v5342_v0 = vmul.f32 1.442695, %v5338_v52 }
0x21f5   :  { %v5331_v3 = vpop.xlane.xlu1 %5330  ;;  %v5334_v8 = vpop.xlane.xlu0 %5333 }
0x21f6   :  { %v5340_v59 = vsub.f32 %v5320_v26, %v5334_v8  ;;  %v5339_v63 = vsub.f32 %v5315_v41, %v5331_v3 }
0x21f8   :  { %v5346_v16 = vmul.f32 1.442695, %v5340_v59  ;;  %v5344_v25 = vmul.f32 1.442695, %v5339_v63 }
0x21f9   :  { %v5337_v21 = vpop.xlane.xlu0 %5336 }
0x21fa   :  { %v5341_v35 = vsub.f32 %v5323_v53, %v5337_v21  ;;  %7860 = vpow2.f32 %v5346_v16 }
0x21fb   :  { %7862 = vpow2.f32 %v5342_v0 }
0x21fc   :  { %v5348_v14 = vmul.f32 1.442695, %v5341_v35 }
0x21fe   :  { %7864 = vpow2.f32 %v5348_v14 }
0x21ff   :  { %7866 = vpow2.f32 %v5344_v25 }
0x2207   :  { %v7861_v49 = vpop.eup %7860 }
0x2208   :  { %v5356_v6 = vsel %vm1083_vm2, %v7861_v49, 0.0  ;;  %v7863_v22 = vpop.eup %7862 }
0x2209   :  { %5357 = vadd.xlane.f32.xlu0 %v5356_v6  ;;  %v5350_v43 = vsel %vm1083_vm2, %v7863_v22, 0.0 }
0x220b   :  { %v7865_v4 = vpop.eup %7864 }
0x220c   :  { %v5359_v20 = vsel %vm1083_vm2, %v7865_v4, 0.0  ;;  %v7867_v18 = vpop.eup %7866 }
0x220d   :  { %5360 = vadd.xlane.f32.xlu1 %v5359_v20  ;;  %5351 = vadd.xlane.f32.xlu0 %v5350_v43  ;;  %v5353_v46 = vsel %vm1083_vm2, %v7867_v18, 0.0 }
0x2211   :  { %5354 = vadd.xlane.f32.xlu1 %v5353_v46 }
0x2222   :  { %5372 = vrot.lane.b32.xlu1 %v9485_v57, %s7961_s3 }
0x2223   :  { %5374 = vrot.lane.b32.xlu0 %v9203_v55, %s7961_s3 }
0x2242   :  { %5567 = vmax.xlane.f32.xlu0 %v5566_v34 }
0x2246   :  { %5564 = vmax.xlane.f32.xlu1 %v5563_v19  ;;  %5570 = vmax.xlane.f32.xlu0 %v5569_v38 }
0x224a   :  { %5573 = vmax.xlane.f32.xlu1 %v5572_v45 }
0x2292   :  { %v5358_v26 = vpop.xlane.xlu0 %5357 }
0x2296   :  { %v5361_v42 = vpop.xlane.xlu1 %5360  ;;  %v5352_v54 = vpop.xlane.xlu0 %5351 }
0x2297   :  { %7868 = vrcp.f32 %v5361_v42 }
0x2298   :  { %7870 = vrcp.f32 %v5352_v54 }
0x2299   :  { %7872 = vrcp.f32 %v5358_v26 }
0x229a   :  { %v5355_v17 = vpop.xlane.xlu1 %5354  ;;  %v5375_v51 = vpop.permute.xlu0 %5374 }
0x229b   :  { %7874 = vrcp.f32 %v5355_v17  ;;  %7348 = vmatprep.subr.bf16.mxu0 %v5375_v51 }
0x229c   :  { %7349 = vmatpush3.bf16.msra.mxu0 %v5375_v51 }
0x229e   :  { %v5373_v58 = vpop.permute.xlu1 %5372 }
0x229f   :  { %7350 = vmatprep.subr.bf16.mxu0 %v5373_v58 }
0x22a0   :  { %7351 = vmatpush3.bf16.msra.mxu0 %v5373_v58 }
0x22a1   :  { %7356 = vmatprep.subr.bf16.mxu0 %v9424_v33 }
0x22a4   :  { %v7869_v41 = vpop.eup %7868 }
0x22a5   :  { %v7871_v37 = vpop.eup %7870  ;;  %v5369_v13 = vmul.f32 %v7869_v41, %v7865_v4 }
0x22a6   :  { %v7873_v53 = vpop.eup %7872  ;;  %v5366_v62 = vmul.f32 %v7871_v37, %v7863_v22 }
0x22a7   :  { %v5368_v52 = vmul.f32 %v7873_v53, %v7861_v49 }
0x22a8   :  { %v7875_v48 = vpop.eup %7874 }
0x22a9   :  { %v5367_v7 = vmul.f32 %v7875_v48, %v7867_v18  ;;  %v5371_v8 = vpack.c.bf16 %v5369_v13, %v5368_v52 }
0x22ab   :  { %v5370_v3 = vpack.c.bf16 %v5367_v7, %v5366_v62 }
0x22ad   :  { %7352 = vmatprep.mubr.msk.bf16.mxu0 %vm1083_vm2, %v5370_v3 }
0x22ae   :  { %7353 = vmatmul.mubr.msk.bf16.vlgmr.msra.gmra.mxu0 %vm1083_vm2, %v5371_v8 }
0x22af   :  { %7357 = vmatpush3.bf16.msra.mxu0 %v9424_v33 }
0x22cb   :  { %v5568_v59 = vpop.xlane.xlu0 %5567 }
0x22cc   :  { %v5576_v35 = vsub.f32 %v5552_v5, %v5568_v59  ;;  %v5731_v5 = vadd.f32 %v9503_v27, %v9034_v1 }
0x22ce   :  { %v5581_v49 = vmul.f32 1.442695, %v5576_v35 }
0x22cf   :  { %v5565_v63 = vpop.xlane.xlu1 %5564  ;;  %v5571_v0 = vpop.xlane.xlu0 %5570 }
0x22d0   :  { %v5575_v16 = vsub.f32 %v5549_v39, %v5565_v63  ;;  %v5577_v21 = vsub.f32 %v5557_v61, %v5571_v0  ;;  %v9619_v39 = vld [vmem:[%s9822_s10 + $0x1] ss:$0 sm:$0xff]  ;;  %v5733_v61 = vadd.f32 %v9501_v23, %v9037_v32 }
0x22d1   :  { %v9624_v34 = vadd.f32 %v9619_v39, %v5732_v15  ;;  %v9639_v32 = vadd.f32 %v9619_v39, %v5734_v44 }
0x22d2   :  { %v5579_v25 = vmul.f32 1.442695, %v5575_v16  ;;  %v5583_v14 = vmul.f32 1.442695, %v5577_v21  ;;  %v5251_v21 = vadd.f32 %v7338_v30, %v9561_v11 }
0x22d3   :  { %v5574_v6 = vpop.xlane.xlu1 %5573  ;;  %v5762_v1 = vsel %vm560_vm0, %v9624_v34, 0.0  ;;  %v5768_v29 = vsel %vm560_vm0, %v9639_v32, 0.0 }
0x22d4   :  { %v5578_v22 = vsub.f32 %v5560_v56, %v5574_v6  ;;  %7876 = vpow2.f32 %v5583_v14  ;;  %v7339_v56 = vpop.f32.mrf.mxu0 }
0x22d5   :  { %7878 = vpow2.f32 %v5579_v25  ;;  %v5243_v25 = vadd.f32 %v5242_v47, %v9563_v36 }
0x22d6   :  { %v5585_v4 = vmul.f32 1.442695, %v5578_v22  ;;  %v5245_v19 = vpop.f32.mrf.mxu0  ;;  %v5254_v22 = vadd.f32 %v7339_v56, %v9565_v50 }
0x22d8   :  { %7880 = vpow2.f32 %v5585_v4 }
0x22d9   :  { %7882 = vpow2.f32 %v5581_v49 }
0x22e1   :  { %v9601_v20 = vpop.eup %7876 }
0x22e2   :  { %v5593_v33 = vsel %vm1083_vm2, %v9601_v20, 0.0  ;;  %v7879_v18 = vpop.eup %7878 }
0x22e3   :  { %5594 = vadd.xlane.f32.xlu0 %v5593_v33  ;;  %v5587_v31 = vsel %vm1083_vm2, %v7879_v18, 0.0 }
0x22e5   :  { %v7881_v43 = vpop.eup %7880 }
0x22e6   :  { %v5596_v46 = vsel %vm1083_vm2, %v7881_v43, 0.0  ;;  %v7883_v24 = vpop.eup %7882 }
0x22e7   :  { %5597 = vadd.xlane.f32.xlu1 %v5596_v46  ;;  %5588 = vadd.xlane.f32.xlu0 %v5587_v31  ;;  %v5590_v9 = vsel %vm1083_vm2, %v7883_v24, 0.0 }
0x22eb   :  { %5591 = vadd.xlane.f32.xlu1 %v5590_v9 }
0x22fc   :  { %5609 = vrot.lane.b32.xlu1 %v9485_v57, %s7962_s27  ;;  %v9627_v57 = vadd.f32 %v9619_v39, %v5731_v5 }
0x22fd   :  { %5611 = vrot.lane.b32.xlu0 %v9203_v55, %s7962_s27  ;;  %v9634_v55 = vadd.f32 %v9619_v39, %v5733_v61 }
0x22fe   :  { %v5759_v27 = vsel %vm560_vm0, %v9627_v57, 0.0 }
0x22ff   :  { %v5765_v23 = vsel %vm560_vm0, %v9634_v55, 0.0 }
0x231c   :  { %5763 = vadd.xlane.f32.xlu0 %v5762_v1 }
0x2320   :  { %5760 = vadd.xlane.f32.xlu1 %v5759_v27  ;;  %5766 = vadd.xlane.f32.xlu0 %v5765_v23 }
0x2324   :  { %5769 = vadd.xlane.f32.xlu1 %v5768_v29 }
0x236c   :  { %v5595_v38 = vpop.xlane.xlu0 %5594 }
0x236e   :  { %v7354_v45 = vpop.f32.mrf.mxu0 }
0x2370   :  { %v5598_v26 = vpop.xlane.xlu1 %5597  ;;  %v5418_v42 = vpop.f32.mrf.mxu0 }
0x2371   :  { %v5589_v54 = vpop.xlane.xlu0 %5588  ;;  %7884 = vrcp.f32 %v5598_v26 }
0x2372   :  { %v7355_v17 = vpop.f32.mrf.mxu0  ;;  %7886 = vrcp.f32 %v5589_v54 }
0x2373   :  { %7888 = vrcp.f32 %v5595_v38  ;;  %v5434_v53 = vpack.c.bf16 %v7355_v17, %v7354_v45 }
0x2374   :  { %v5421_v51 = vpop.f32.mrf.mxu0  ;;  %v5592_v58 = vpop.xlane.xlu1 %5591 }
0x2375   :  { %v5433_v41 = vpack.c.bf16 %v5421_v51, %v5418_v42  ;;  %7890 = vrcp.f32 %v5592_v58  ;;  %v5612_v37 = vpop.permute.xlu0 %5611 }
0x2376   :  { %7370 = vmatprep.subr.bf16.mxu0 %v5612_v37 }
0x2377   :  { %7358 = vmatprep.mubr.msk.bf16.mxu0 %vm1021_vm1, %v5433_v41 }
0x2378   :  { %7359 = vmatmul.mubr.msk.bf16.vlgmr.msra.gmra.mxu0 %vm1021_vm1, %v5434_v53  ;;  %v5610_v48 = vpop.permute.xlu1 %5609 }
0x2379   :  { %7371 = vmatpush3.bf16.msra.mxu0 %v5612_v37 }
0x237a   :  { %7372 = vmatprep.subr.bf16.mxu0 %v5610_v48 }
0x237d   :  { %7373 = vmatpush3.bf16.msra.mxu0 %v5610_v48 }
0x237e   :  { %7378 = vmatprep.subr.bf16.mxu0 %v9453_v2  ;;  %v7885_v13 = vpop.eup %7884 }
0x237f   :  { %v7887_v62 = vpop.eup %7886  ;;  %v5606_v3 = vmul.f32 %v7885_v13, %v7881_v43 }
0x2380   :  { %v7889_v7 = vpop.eup %7888  ;;  %v5603_v8 = vmul.f32 %v7887_v62, %v7879_v18 }
0x2381   :  { %v5605_v63 = vmul.f32 %v7889_v7, %v9601_v20  ;;  %v5246_v20 = vadd.f32 %v5245_v19, %v9567_v10 }
0x2382   :  { %v7891_v52 = vpop.eup %7890 }
0x2383   :  { %v5604_v59 = vmul.f32 %v7891_v52, %v7883_v24  ;;  %v5608_v0 = vpack.c.bf16 %v5606_v3, %v5605_v63  ;;  %v7562_v63 = vld [vmem:[%s9825_s13 + $0x28] sm:$0xff]  }
0x2385   :  { %v5607_v16 = vpack.c.bf16 %v5604_v59, %v5603_v8  ;;  %v7560_v8 = vld [vmem:[%s9825_s13 + $0x38] sm:$0xff]   ;;  %v7561_v59 = vld [vmem:[%s9825_s13 + $0x30] sm:$0xff]  }
0x2386   :  { %7384 = vmatprep.subr.bf16.mxu1 %v7560_v8 }
0x2387   :  { %7374 = vmatprep.mubr.msk.bf16.mxu0 %vm1083_vm2, %v5607_v16  ;;  %7385 = vmatpush3.bf16.msra.mxu1 %v7560_v8  ;;  %v7563_v16 = vld [vmem:[%s9825_s13 + $0x20] sm:$0xff]   ;;  %v7570_v8 = vld [vmem:[%s9827_s15 + $0x48] sm:$0xff]   ;;  %s7963_s13 = smov [#allocation2]  }
0x2388   :  { %7375 = vmatmul.mubr.msk.bf16.vlgmr.msra.gmra.mxu0 %vm1083_vm2, %v5608_v0  ;;  %7386 = vmatprep.subr.bf16.mxu1 %v7561_v59  ;;  %s6233_s30 = sshll.u32 %s7963_s13, 4  ;;  %s6234_s30 = int_to_ptr.vmem [resolvable:$true] %s6233_s30 }
0x2389   :  { %7379 = vmatpush3.bf16.msra.mxu0 %v9453_v2  ;;  %s7938_s20 = scalar_lea.vmem %s6234_s30, 32  ;;  %p7943_p1 = scmp.lt.s32.totalorder %s6234_s30, %s6234_s30 }
0x238a   :  { %p7939_p0 = scmp.ne.s32.totalorder %s6234_s30, %s7938_s20  ;;  %p7944_p2 = scmp.lt.s32.totalorder %s7938_s20, %s7938_s20 }
0x238b   :  { %7387 = vmatpush3.bf16.msra.mxu1 %v7561_v59  ;;  %v7571_v59 = vld [vmem:[%s9827_s15 + $0x40] sm:$0xff]  }
0x238c   :  { %7388 = vmatprep.subr.bf16.mxu1 %v7562_v63  ;;  %p7945_p3 = por %p7944_p2, %p7943_p1 }
0x238e   :  { %p7946_p4 = pnand %p7945_p3, %p7939_p0 }
0x238f   :  { %7389 = vmatpush3.bf16.msra.mxu1 %v7562_v63 }
0x2390   :  { %7390 = vmatprep.subr.bf16.mxu1 %v7563_v16 }
0x2393   :  { %7391 = vmatpush3.bf16.msra.mxu1 %v7563_v16 }
0x23a5   :  { %v5764_v36 = vpop.xlane.xlu0 %5763 }
0x23a6   :  { %v5784_v38 = vmul.f32 0.015625, %v5764_v36 }
0x23a8   :  { %v9673_v58 = vsub.f32 %v9624_v34, %v5784_v38 }
0x23a9   :  { %v5761_v50 = vpop.xlane.xlu1 %5760  ;;  %v5767_v27 = vpop.xlane.xlu0 %5766 }
0x23aa   :  { %v5783_v10 = vmul.f32 0.015625, %v5761_v50  ;;  %v5785_v26 = vmul.f32 0.015625, %v5767_v27  ;;  %v5800_v13 = vmul.f32 %v9673_v58, %v9673_v58 }
0x23ac   :  { %v9664_v45 = vsub.f32 %v9627_v57, %v5783_v10  ;;  %v9676_v41 = vsub.f32 %v9634_v55, %v5785_v26  ;;  %v5810_v52 = vsel %vm560_vm0, %v5800_v13, 0.0  ;;  %v9734_v26 = vld [vmem:[%s9823_s11 + $0x1] ss:$0 sm:$0xff] }
0x23ad   :  { %v5770_v42 = vpop.xlane.xlu1 %5769 }
0x23ae   :  { %v5786_v37 = vmul.f32 0.015625, %v5770_v42  ;;  %v5801_v7 = vmul.f32 %v9676_v41, %v9676_v41 }
0x23b0   :  { %v9686_v34 = vsub.f32 %v9639_v32, %v5786_v37 }
0x23b2   :  { %v5802_v3 = vmul.f32 %v9686_v34, %v9686_v34 }
0x23b4   :  { %v5816_v32 = vsel %vm560_vm0, %v5802_v3, 0.0  ;;  %v7568_v3 = vld [vmem:[%s9827_s15 + $0x58] sm:$0xff]  }
0x2438   :  { %v7360_v35 = vpop.f32.mrf.mxu0 }
0x2439   :  { %v5492_v14 = vadd.f32 %v7360_v35, %v5251_v21 }
0x243a   :  { %v5475_v6 = vpop.f32.mrf.mxu0 }
0x243b   :  { %v5490_v49 = vadd.f32 %v5475_v6, %v5243_v25 }
0x243c   :  { %v7361_v4 = vpop.f32.mrf.mxu0 }
0x243d   :  { %v5493_v33 = vadd.f32 %v7361_v4, %v5254_v22 }
0x243e   :  { %v5478_v18 = vpop.f32.mrf.mxu0 }
0x243f   :  { %v5491_v43 = vadd.f32 %v5478_v18, %v5246_v20 }
0x2448   :  { %v7376_v46 = vpop.f32.mrf.mxu0 }
0x244a   :  { %v5655_v24 = vpop.f32.mrf.mxu0 }
0x244c   :  { %v7377_v31 = vpop.f32.mrf.mxu0 }
0x244d   :  { %v5671_v11 = vpack.c.bf16 %v7377_v31, %v7376_v46 }
0x244e   :  { %v5658_v2 = vpop.f32.mrf.mxu0 }
0x244f   :  { %v5670_v9 = vpack.c.bf16 %v5658_v2, %v5655_v24 }
0x2451   :  { %7380 = vmatprep.mubr.msk.bf16.mxu0 %vm1021_vm1, %v5670_v9 }
0x2452   :  { %7381 = vmatmul.mubr.msk.bf16.vlgmr.msra.gmra.mxu0 %vm1021_vm1, %v5671_v11 }
0x2512   :  { %v7382_v15 = vpop.f32.mrf.mxu0 }
0x2513   :  { %v5729_v5 = vadd.f32 %v7382_v15, %v5492_v14 }
0x2514   :  { %v5712_v61 = vpop.f32.mrf.mxu0 }
0x2515   :  { %v5727_v44 = vadd.f32 %v5712_v61, %v5490_v49  ;;  %v5737_v23 = vadd.f32 %v5729_v5, %v9057_v12 }
0x2516   :  { %v7383_v1 = vpop.f32.mrf.mxu0 }
0x2517   :  { %v5735_v29 = vadd.f32 %v5727_v44, %v9054_v60  ;;  %v5730_v30 = vadd.f32 %v7383_v1, %v5493_v33  ;;  %v5753_v60 = vadd.f32 %v9619_v39, %v5737_v23 }
0x2518   :  { %v5715_v47 = vpop.f32.mrf.mxu0 }
0x2519   :  { %v9661_v56 = vadd.f32 %v9619_v39, %v5735_v29  ;;  %v5728_v19 = vadd.f32 %v5715_v47, %v5491_v43  ;;  %v5738_v54 = vadd.f32 %v5730_v30, %v9065_v40  ;;  %v5777_v53 = vsel %vm560_vm0, %v5753_v60, 0.0 }
0x251b   :  { %v5736_v17 = vadd.f32 %v5728_v19, %v9062_v28  ;;  %v5771_v12 = vsel %vm560_vm0, %v9661_v56, 0.0  ;;  %v5799_v28 = vmul.f32 %v9664_v45, %v9664_v45  ;;  %v5754_v48 = vadd.f32 %v9619_v39, %v5738_v54 }
0x251c   :  { %5772 = vadd.xlane.f32.xlu0 %v5771_v12 }
0x251d   :  { %v5752_v51 = vadd.f32 %v9619_v39, %v5736_v17  ;;  %v5807_v55 = vsel %vm560_vm0, %v5799_v28, 0.0  ;;  %v5780_v62 = vsel %vm560_vm0, %v5754_v48, 0.0  ;;  %v5813_v39 = vsel %vm560_vm0, %v5801_v7, 0.0  ;;  %v7565_v7 = vld [vmem:[%s9827_s15 + $0x70] sm:$0xff]  }
0x251f   :  { %v5774_v40 = vsel %vm560_vm0, %v5752_v51, 0.0 }
0x2520   :  { %5778 = vadd.xlane.f32.xlu0 %v5777_v53  ;;  %5775 = vadd.xlane.f32.xlu1 %v5774_v40 }
0x2524   :  { %5808 = vadd.xlane.f32.xlu0 %v5807_v55  ;;  %5781 = vadd.xlane.f32.xlu1 %v5780_v62 }
0x2528   :  { %5811 = vadd.xlane.f32.xlu1 %v5810_v52  ;;  %5814 = vadd.xlane.f32.xlu0 %v5813_v39  ;;  %v7566_v52 = vld [vmem:[%s9827_s15 + $0x68] sm:$0xff]   ;;  %v7567_v39 = vld [vmem:[%s9827_s15 + $0x60] sm:$0xff]  }
0x252c   :  { %5817 = vadd.xlane.f32.xlu1 %v5816_v32  ;;  %v7569_v32 = vld [vmem:[%s9827_s15 + $0x50] sm:$0xff]  }
0x25a5   :  { %v5773_v0 = vpop.xlane.xlu0 %5772 }
0x25a6   :  { %v5787_v21 = vmul.f32 0.015625, %v5773_v0 }
0x25a8   :  { %v9710_v35 = vsub.f32 %v9661_v56, %v5787_v21 }
0x25a9   :  { %v5776_v25 = vpop.xlane.xlu1 %5775  ;;  %v5779_v14 = vpop.xlane.xlu0 %5778 }
0x25aa   :  { %v5788_v6 = vmul.f32 0.015625, %v5776_v25  ;;  %v5789_v22 = vmul.f32 0.015625, %v5779_v14  ;;  %v5803_v49 = vmul.f32 %v9710_v35, %v9710_v35 }
0x25ac   :  { %v9714_v4 = vsub.f32 %v5752_v51, %v5788_v6  ;;  %v9716_v20 = vsub.f32 %v5753_v60, %v5789_v22  ;;  %v5819_v33 = vsel %vm560_vm0, %v5803_v49, 0.0  ;;  %v9742_v51 = vld [vmem:[%s9824_s12 + $0x1] ss:$0 sm:$0xff] }
0x25ad   :  { %v5782_v18 = vpop.xlane.xlu1 %5781  ;;  %5820 = vadd.xlane.f32.xlu0 %v5819_v33  ;;  %v5809_v43 = vpop.xlane.xlu0 %5808 }
0x25ae   :  { %v5790_v46 = vmul.f32 0.015625, %v5782_v18  ;;  %v5831_v24 = vmul.f32 0.015625, %v5809_v43  ;;  %v5804_v31 = vmul.f32 %v9714_v4, %v9714_v4  ;;  %v5805_v2 = vmul.f32 %v9716_v20, %v9716_v20 }
0x25b0   :  { %v9723_v9 = vsub.f32 %v5754_v48, %v5790_v46  ;;  %v5839_v11 = vadd.f32 1e-05, %v5831_v24  ;;  %v5822_v36 = vsel %vm560_vm0, %v5804_v31, 0.0  ;;  %v5825_v15 = vsel %vm560_vm0, %v5805_v2, 0.0 }
0x25b1   :  { %5823 = vadd.xlane.f32.xlu1 %v5822_v36  ;;  %v5812_v50 = vpop.xlane.xlu1 %5811  ;;  %5826 = vadd.xlane.f32.xlu0 %v5825_v15  ;;  %v5815_v5 = vpop.xlane.xlu0 %5814 }
0x25b2   :  { %7892 = vrsqrt.f32 %v5839_v11  ;;  %v5832_v61 = vmul.f32 0.015625, %v5812_v50  ;;  %v5833_v44 = vmul.f32 0.015625, %v5815_v5  ;;  %v5806_v10 = vmul.f32 %v9723_v9, %v9723_v9 }
0x25b4   :  { %v5840_v1 = vadd.f32 1e-05, %v5832_v61  ;;  %v5841_v27 = vadd.f32 1e-05, %v5833_v44  ;;  %v5828_v23 = vsel %vm560_vm0, %v5806_v10, 0.0 }
0x25b5   :  { %5829 = vadd.xlane.f32.xlu1 %v5828_v23  ;;  %v5818_v29 = vpop.xlane.xlu1 %5817 }
0x25b6   :  { %7894 = vrsqrt.f32 %v5840_v1  ;;  %v5834_v30 = vmul.f32 0.015625, %v5818_v29 }
0x25b7   :  { %7896 = vrsqrt.f32 %v5841_v27 }
0x25b8   :  { %v5842_v47 = vadd.f32 1e-05, %v5834_v30 }
0x25ba   :  { %7898 = vrsqrt.f32 %v5842_v47 }
0x25bf   :  { %v7893_v19 = vpop.eup %7892 }
0x25c0   :  { %v5855_v38 = vmul.f32 %v7893_v19, %v9664_v45 }
0x25c2   :  { %v5869_v12 = vmul.f32 %v9734_v26, %v5855_v38 }
0x25c3   :  { %v7895_v42 = vpop.eup %7894 }
0x25c4   :  { %v7897_v54 = vpop.eup %7896  ;;  %v5856_v17 = vmul.f32 %v7895_v42, %v9673_v58  ;;  %v5883_v28 = vadd.f32 %v9742_v51, %v5869_v12 }
0x25c5   :  { %v5857_v60 = vmul.f32 %v7897_v54, %v9676_v41 }
0x25c6   :  { %v5870_v45 = vmul.f32 %v9734_v26, %v5856_v17 }
0x25c7   :  { %v7899_v37 = vpop.eup %7898  ;;  %v5871_v53 = vmul.f32 %v9734_v26, %v5857_v60 }
0x25c8   :  { %v5858_v40 = vmul.f32 %v7899_v37, %v9686_v34  ;;  %v5884_v58 = vadd.f32 %v9742_v51, %v5870_v45  ;;  %v7564_v34 = vld [vmem:[%s9827_s15 + $0x78] sm:$0xff]  }
0x25c9   :  { %v5885_v41 = vadd.f32 %v9742_v51, %v5871_v53  ;;  %7400 = vmatprep.subr.bf16.mxu0 %v7564_v34 }
0x25ca   :  { %v5872_v48 = vmul.f32 %v9734_v26, %v5858_v40  ;;  %v5891_v13 = vpack.c.bf16 %v5884_v58, %v5883_v28  ;;  %7401 = vmatpush3.bf16.msra.mxu0 %v7564_v34 }
0x25cb   :  { %7402 = vmatprep.subr.bf16.mxu0 %v7565_v7 }
0x25cc   :  { %7392 = vmatprep.mubr.msk.bf16.mxu1 %vm560_vm0, %v5891_v13  ;;  %v5886_v55 = vadd.f32 %v9742_v51, %v5872_v48 }
0x25ce   :  { %v5892_v62 = vpack.c.bf16 %v5886_v55, %v5885_v41  ;;  %7403 = vmatpush3.bf16.msra.mxu0 %v7565_v7 }
0x25cf   :  { %7404 = vmatprep.subr.bf16.mxu0 %v7566_v52 }
0x25d0   :  { %7393 = vmatmul.mubr.msk.bf16.vlgmr.msra.gmra.mxu1 %vm560_vm0, %v5892_v62 }
0x25d2   :  { %7405 = vmatpush3.bf16.msra.mxu0 %v7566_v52 }
0x25d3   :  { %7406 = vmatprep.subr.bf16.mxu0 %v7567_v39 }
0x25d6   :  { %7407 = vmatpush3.bf16.msra.mxu0 %v7567_v39 }
0x25d7   :  { %7408 = vmatprep.subr.bf16.mxu0 %v7568_v3 }
0x25da   :  { %7409 = vmatpush3.bf16.msra.mxu0 %v7568_v3 }
0x25db   :  { %7410 = vmatprep.subr.bf16.mxu0 %v7569_v32 }
0x25de   :  { %7411 = vmatpush3.bf16.msra.mxu0 %v7569_v32 }
0x25df   :  { %7412 = vmatprep.subr.bf16.mxu0 %v7570_v8 }
0x25e2   :  { %7413 = vmatpush3.bf16.msra.mxu0 %v7570_v8 }
0x25e3   :  { %7414 = vmatprep.subr.bf16.mxu0 %v7571_v59 }
0x25e6   :  { %7415 = vmatpush3.bf16.msra.mxu0 %v7571_v59 }
0x2636   :  { %v5821_v63 = vpop.xlane.xlu0 %5820 }
0x2637   :  { %v5835_v16 = vmul.f32 0.015625, %v5821_v63 }
0x2639   :  { %v5843_v0 = vadd.f32 1e-05, %v5835_v16 }
0x263a   :  { %v5824_v21 = vpop.xlane.xlu1 %5823  ;;  %v5827_v25 = vpop.xlane.xlu0 %5826 }
0x263b   :  { %7900 = vrsqrt.f32 %v5843_v0  ;;  %v5836_v14 = vmul.f32 0.015625, %v5824_v21  ;;  %v5837_v6 = vmul.f32 0.015625, %v5827_v25 }
0x263d   :  { %v5844_v22 = vadd.f32 1e-05, %v5836_v14  ;;  %v5845_v49 = vadd.f32 1e-05, %v5837_v6 }
0x263e   :  { %v5830_v33 = vpop.xlane.xlu1 %5829 }
0x263f   :  { %7902 = vrsqrt.f32 %v5844_v22  ;;  %v5838_v18 = vmul.f32 0.015625, %v5830_v33 }
0x2640   :  { %7904 = vrsqrt.f32 %v5845_v49 }
0x2641   :  { %v5846_v43 = vadd.f32 1e-05, %v5838_v18 }
0x2643   :  { %7906 = vrsqrt.f32 %v5846_v43 }
0x2648   :  { %v7901_v46 = vpop.eup %7900 }
0x2649   :  { %v5859_v24 = vmul.f32 %v7901_v46, %v9710_v35 }
0x264b   :  { %v5873_v36 = vmul.f32 %v9734_v26, %v5859_v24 }
0x264c   :  { %v7903_v31 = vpop.eup %7902 }
0x264d   :  { %v7905_v2 = vpop.eup %7904  ;;  %v5860_v11 = vmul.f32 %v7903_v31, %v9714_v4  ;;  %v5887_v44 = vadd.f32 %v9742_v51, %v5873_v36 }
0x264e   :  { %v5861_v15 = vmul.f32 %v7905_v2, %v9716_v20 }
0x264f   :  { %v5874_v50 = vmul.f32 %v9734_v26, %v5860_v11 }
0x2650   :  { %v7907_v5 = vpop.eup %7906  ;;  %v5875_v1 = vmul.f32 %v9734_v26, %v5861_v15 }
0x2651   :  { %v5862_v61 = vmul.f32 %v7907_v5, %v9723_v9  ;;  %v5888_v10 = vadd.f32 %v9742_v51, %v5874_v50  ;;  %v6515_v9 = vld [vmem:[%s9826_s14 + $0x1] ss:$0 sm:$0xff] }
0x2652   :  { %v5889_v4 = vadd.f32 %v9742_v51, %v5875_v1 }
0x2653   :  { %v5893_v35 = vpack.c.bf16 %v5888_v10, %v5887_v44  ;;  %v5876_v27 = vmul.f32 %v9734_v26, %v5862_v61 }
0x2655   :  { %7396 = vmatprep.mubr.msk.bf16.mxu1 %vm560_vm0, %v5893_v35  ;;  %v5890_v20 = vadd.f32 %v9742_v51, %v5876_v27 }
0x2657   :  { %v5894_v23 = vpack.c.bf16 %v5890_v20, %v5889_v4 }
0x2659   :  { %7397 = vmatmul.mubr.msk.bf16.gmra.mxu1 %vm560_vm0, %v5894_v23 }
0x2690   :  { %v7394_v29 = vpop.f32.mrf.mxu1 }
0x2691   :  { %v5991_v30 = vadd.f32 %v7394_v29, %v6515_v9 }
0x2692   :  { %v5982_v47 = vpop.f32.mrf.mxu1 }
0x2693   :  { %v5983_v19 = vadd.f32 %v6515_v9, %v5982_v47  ;;  %v6023_v38 = vmul.f32 0.70710677, %v5991_v30  ;;  %v6015_v34 = vmul.f32 0.5, %v5991_v30  ;;  %v6541_v47 = vld [vmem:[%s9828_s16 + $0x1] ss:$0 sm:$0xff] }
0x2694   :  { %v7395_v42 = vpop.f32.mrf.mxu1 }
0x2695   :  { %v6021_v26 = vmul.f32 0.70710677, %v5983_v19  ;;  %v5994_v54 = vadd.f32 %v7395_v42, %v6515_v9  ;;  %v6013_v41 = vmul.f32 0.5, %v5983_v19 }
0x2696   :  { %v5985_v17 = vpop.f32.mrf.mxu1 }
0x2697   :  { %7908 = verf.f32 %v6021_v26  ;;  %v6024_v12 = vmul.f32 0.70710677, %v5994_v54  ;;  %v5986_v60 = vadd.f32 %v6515_v9, %v5985_v17  ;;  %v6016_v13 = vmul.f32 0.5, %v5994_v54 }
0x2698   :  { %7910 = verf.f32 %v6023_v38 }
0x2699   :  { %7912 = verf.f32 %v6024_v12  ;;  %v6022_v51 = vmul.f32 0.70710677, %v5986_v60  ;;  %v6014_v55 = vmul.f32 0.5, %v5986_v60 }
0x269b   :  { %7914 = verf.f32 %v6022_v51 }
0x26a4   :  { %v7909_v45 = vpop.eup %7908 }
0x26a5   :  { %v7911_v37 = vpop.eup %7910  ;;  %v6037_v40 = vadd.f32 1.0, %v7909_v45 }
0x26a6   :  { %v7913_v53 = vpop.eup %7912  ;;  %v6039_v48 = vadd.f32 1.0, %v7911_v37 }
0x26a7   :  { %v6040_v28 = vadd.f32 1.0, %v7913_v53  ;;  %v6045_v52 = vmul.f32 %v6037_v40, %v6013_v41 }
0x26a8   :  { %v7915_v58 = vpop.eup %7914  ;;  %v6047_v3 = vmul.f32 %v6039_v48, %v6015_v34  ;;  %v6551_v34 = vld [vmem:[%s9830_s18] ss:$0 sm:$0xff] }
0x26a9   :  { %v6038_v62 = vadd.f32 1.0, %v7915_v58  ;;  %v6048_v7 = vmul.f32 %v6040_v28, %v6016_v13 }
0x26ab   :  { %v6046_v39 = vmul.f32 %v6038_v62, %v6014_v55  ;;  %v6054_v8 = vpack.c.bf16 %v6048_v7, %v6047_v3 }
0x26ad   :  { %v6053_v32 = vpack.c.bf16 %v6046_v39, %v6045_v52 }
0x26af   :  { %7416 = vmatprep.mubr.bf16.mxu0 %v6053_v32 }
0x26b0   :  { %7417 = vmatmul.mubr.bf16.vlgmr.msra.gmra.mxu0 %v6054_v8 }
0x2719   :  { %v7398_v59 = vpop.f32.mrf.mxu1 }
0x271a   :  { %v6007_v63 = vadd.f32 %v7398_v59, %v6515_v9 }
0x271b   :  { %v5998_v16 = vpop.f32.mrf.mxu1 }
0x271c   :  { %v5999_v0 = vadd.f32 %v6515_v9, %v5998_v16  ;;  %v6027_v21 = vmul.f32 0.70710677, %v6007_v63  ;;  %v6019_v44 = vmul.f32 0.5, %v6007_v63 }
0x271d   :  { %v7399_v25 = vpop.f32.mrf.mxu1 }
0x271e   :  { %v6025_v14 = vmul.f32 0.70710677, %v5999_v0  ;;  %v6010_v6 = vadd.f32 %v7399_v25, %v6515_v9  ;;  %v6017_v50 = vmul.f32 0.5, %v5999_v0 }
0x271f   :  { %v6001_v22 = vpop.f32.mrf.mxu1 }
0x2720   :  { %7916 = verf.f32 %v6025_v14  ;;  %v6028_v49 = vmul.f32 0.70710677, %v6010_v6  ;;  %v6002_v33 = vadd.f32 %v6515_v9, %v6001_v22  ;;  %v6020_v15 = vmul.f32 0.5, %v6010_v6 }
0x2721   :  { %7918 = verf.f32 %v6027_v21 }
0x2722   :  { %7920 = verf.f32 %v6028_v49  ;;  %v6026_v18 = vmul.f32 0.70710677, %v6002_v33  ;;  %v6018_v5 = vmul.f32 0.5, %v6002_v33 }
0x2724   :  { %7922 = verf.f32 %v6026_v18 }
0x272d   :  { %v7917_v43 = vpop.eup %7916 }
0x272e   :  { %v7919_v46 = vpop.eup %7918  ;;  %v6041_v31 = vadd.f32 1.0, %v7917_v43 }
0x272f   :  { %v7921_v24 = vpop.eup %7920  ;;  %v6043_v36 = vadd.f32 1.0, %v7919_v46 }
0x2730   :  { %v6044_v2 = vadd.f32 1.0, %v7921_v24  ;;  %v6049_v1 = vmul.f32 %v6041_v31, %v6017_v50 }
0x2731   :  { %v7923_v11 = vpop.eup %7922  ;;  %v6051_v27 = vmul.f32 %v6043_v36, %v6019_v44 }
0x2732   :  { %v6042_v61 = vadd.f32 1.0, %v7923_v11  ;;  %v6052_v10 = vmul.f32 %v6044_v2, %v6020_v15 }
0x2734   :  { %v6050_v35 = vmul.f32 %v6042_v61, %v6018_v5  ;;  %v6056_v20 = vpack.c.bf16 %v6052_v10, %v6051_v27 }
0x2736   :  { %v6055_v4 = vpack.c.bf16 %v6050_v35, %v6049_v1 }
0x2738   :  { %7420 = vmatprep.mubr.bf16.mxu0 %v6055_v4 }
0x2739   :  { %7421 = vmatmul.mubr.bf16.gmra.mxu0 %v6056_v20 }
0x2770   :  { %v7418_v23 = vpop.f32.mrf.mxu0 }
0x2772   :  { %v6164_v9 = vpop.f32.mrf.mxu0 }
0x2773   :  { %v6165_v42 = vadd.f32 %v6541_v47, %v6164_v9 }
0x2774   :  { %v7419_v29 = vpop.f32.mrf.mxu0 }
0x2775   :  { %v6189_v60 = vadd.f32 %v6165_v42, %v9627_v57  ;;  %v6550_v57 = vld [vmem:[%s9829_s17] ss:$0 sm:$0xff] }
0x2776   :  { %v6167_v30 = vpop.f32.mrf.mxu0 }
0x27f9   :  { %v7422_v19 = vpop.f32.mrf.mxu0 }
0x27fb   :  { %v6177_v38 = vpop.f32.mrf.mxu0 }
0x27fc   :  { %v6178_v26 = vadd.f32 %v6541_v47, %v6177_v38 }
0x27fd   :  { %v7423_v54 = vpop.f32.mrf.mxu0 }
0x27fe   :  { %v6190_v17 = vadd.f32 %v6178_v26, %v9661_v56 }
0x27ff   :  { %v6180_v12 = vpop.f32.mrf.mxu0 }
0x2800   :  { %v6192_v51 = vrot.slane %v6190_v17, 7 }
0x2802   :  { %v6195_v45 = vsel %vm6194_vm3, %v6189_v60, %v6192_v51 }
0x2803   :  { %v6199_v37 = vsel %vm6198_vm4, %v6195_v45, 0.0 }
0x2804   :  { %6200 = vadd.xlane.f32.xlu0 %v6199_v37 }
0x288d   :  { %v6201_v53 = vpop.xlane.xlu0 %6200 }
0x288e   :  { %v6202_v40 = vmul.f32 0.015625, %v6201_v53 }
0x2890   :  { %v6203_v28 = vsub.f32 %v6195_v45, %v6202_v40 }
0x2892   :  { %v6204_v58 = vmul.f32 %v6203_v28, %v6203_v28 }
0x2894   :  { %v6205_v48 = vsel %vm6198_vm4, %v6204_v58, 0.0 }
0x2895   :  { %6206 = vadd.xlane.f32.xlu1 %v6205_v48 }
0x291e   :  { %v6207_v13 = vpop.xlane.xlu1 %6206 }
0x291f   :  { %v6208_v41 = vmul.f32 0.015625, %v6207_v13 }
0x2921   :  { %v6209_v56 = vadd.f32 1e-05, %v6208_v41 }
0x2923   :  { %7924 = vrsqrt.f32 %v6209_v56 }
0x2930   :  { %v7925_v55 = vpop.eup %7924 }
0x2931   :  { %v6211_v62 = vmul.f32 %v7925_v55, %v6203_v28 }
0x2933   :  { %v6218_v7 = vmul.f32 %v6550_v57, %v6211_v62 }
0x2935   :  { %v6225_v52 = vadd.f32 %v6551_v34, %v6218_v7 }
0x2937   :  { %6226 = vst.msk [vmem:[#allocation2] sm:$0x3] %vm6198_vm4, %v6225_v52 }
0x2938   :  { %7949 = shalt.err (!%p7946_p4)
}
0x2939   :  { %6236 = dma.vmem_to_hbm [thread:$0]  %s6234_s30, 32, %s9831_s19, [#allocation3]  }
0x293a   :  { %7958 = dma.done.wait [#allocation3], 32  }
0x293b   :  { %7959 = vsyncadd [#allocation3], 4294967264 }
0x293c   :  { %6240 = vsyncpa [#allocation3], 1 }

</bundles_post_ra>
